<compile_context>
chip_gen: v7x
topology: tpu7x:2x2x1
jax: 0.10.0
libtpu: 0.0.40
codegen_flags: <defaults>
</compile_context>

<pallas_src>
import math
from functools import partial

import jax
import jax.numpy as jnp
from jax import lax
from jax.experimental import pallas as pl
from jax.experimental.pallas import tpu as pltpu


def _round_up(x: int, m: int) -> int:
    return ((x + m - 1) // m) * m


# ---------------------------------------------------------------------------
# Fused kernel.
#   x_ref    : (S, B_pad, U_pad)  time-major, zero-padded input (layer-0 input)
#   wih_ref  : (L, U_pad, G)      per-layer weight_ih, transposed + zero-padded
#   whh_ref  : (L, U_pad, G)      per-layer weight_hh, transposed + zero-padded
#   b_ref    : (L, 1, G)          per-layer b_ih + b_hh, zero-padded
#   wlin_ref : (U_pad, U_pad)     hidden Linear weight, transposed + zero-padded
#   blin_ref : (1, U_pad)         hidden Linear bias, zero-padded
#   o_ref    : (S, B_pad, U_pad)  time-major, lane-dense output
#   buf      : (S, B_pad, U_pad)  VMEM scratch: per-layer output (in-place carry)
#   gx_ref   : (S, B_pad, G)      VMEM scratch: hoisted x @ W_ih + b projection
# Padded layout: U_pad = round_up(U,128), G = 4*U_pad (PyTorch gate order
# i|f|g|o, one 128-lane block per gate), B_pad = round_up(B,8).
# ---------------------------------------------------------------------------
def _expert_lstm_kernel(x_ref, wih_ref, whh_ref, b_ref, wlin_ref, blin_ref,
                        o_ref, buf, gx_ref):
    S, B_pad, U_pad = x_ref.shape
    L, _, G = wih_ref.shape
    GP = G // 4                       # per-gate padded lane width (== U_pad)

    def _cell(gates, h, c):
        i_g = jax.nn.sigmoid(gates[:, 0 * GP:1 * GP])
        f_g = jax.nn.sigmoid(gates[:, 1 * GP:2 * GP])
        g_g = jnp.tanh(gates[:, 2 * GP:3 * GP])
        o_g = jax.nn.sigmoid(gates[:, 3 * GP:4 * GP])
        c = f_g * c + i_g * g_g
        h = o_g * jnp.tanh(c)
        return h, c

    for l in range(L):                                 # layers are static
        cur = x_ref if l == 0 else buf                 # layer input
        wih_l = wih_ref[l]                             # (U_pad, G)
        whh_l = whh_ref[l]                             # (U_pad, G)
        b_l = b_ref[l]                                 # (1, G)

        # Hoisted input projection for ALL timesteps: one MXU pass per layer.
        # (Fully consumes `cur`, so the recurrence may overwrite `buf` in place.)
        xin = cur[...].reshape(S * B_pad, U_pad)
        gx_ref[...] = (
            jnp.dot(xin, wih_l, preferred_element_type=jnp.float32) + b_l
        ).reshape(S, B_pad, G)

        # Serial recurrence. Only h @ W_hh + gate math is on the critical
        # path; all slices below are full (8,128)-vreg aligned.
        h = jnp.zeros((B_pad, U_pad), jnp.float32)
        c = jnp.zeros((B_pad, U_pad), jnp.float32)

        if S <= 16:
            # Small static S: full unroll (LLO scheduling visibility).
            for t in range(S):
                gates = gx_ref[t] + jnp.dot(
                    h, whh_l, preferred_element_type=jnp.float32)
                h, c = _cell(gates, h, c)
                buf[t] = h                             # dense (B_pad,U_pad) store
        else:
            # Larger S: bound live ranges with a carried fori_loop.
            def step(t, carry, whh_l=whh_l):
                h, c = carry
                gates = gx_ref[t] + jnp.dot(
                    h, whh_l, preferred_element_type=jnp.float32)
                h, c = _cell(gates, h, c)
                buf[t] = h
                return (h, c)
            h, c = lax.fori_loop(0, S, step, (h, c), unroll=2)
        # TODO(synk): inter-layer dropout (p=0.3) is train-mode only; skipped.

    # ---- fused tanh + Linear(units, units), lane-dense single store ---------
    hseq = buf[...].reshape(S * B_pad, U_pad)
    pred = (jnp.dot(jnp.tanh(hseq), wlin_ref[...],
                    preferred_element_type=jnp.float32) + blin_ref[...])
    o_ref[...] = pred.reshape(S, B_pad, U_pad).astype(o_ref.dtype)


def _vmem_limit_bytes(S, B_pad, U_pad, G, L):
    f32 = 4
    scratch = f32 * S * B_pad * (U_pad + G)                    # buf + gx
    io = 2 * 2 * f32 * S * B_pad * U_pad                       # in + out (x2 buffers)
    weights = 2 * f32 * (2 * L * U_pad * G + L * G + U_pad * U_pad + U_pad)
    est = scratch + io + weights
    # generous headroom, floor at 32 MiB, cap at 64 MiB (v7x physical per TC)
    return int(min(max(2 * est + (1 << 20), 32 << 20), 64 << 20))


# ---------------------------------------------------------------------------
# Wrapper: one grid-less pallas_call, everything resident in VMEM.
# The batch-first<->time-major padding/transpose lives here (cheap XLA copies),
# so the kernel's input and output blocks are lane/sublane-dense.
# ---------------------------------------------------------------------------
@partial(jax.jit, static_argnames=("units",))
def expert_lstm_forward(inputs, params, *, units):
    """Equivalent of Expert_LSTM.forward (inference). inputs: (B, S, F)."""
    B, S, F = inputs.shape
    L, U_pad, G = params["wih"].shape
    U = units
    B_pad = _round_up(B, 8)
    assert F <= U_pad and U <= U_pad

    # batch-first -> time-major, zero-padded, lane-dense (S, B_pad, U_pad) slab
    x_tm = jnp.zeros((S, B_pad, U_pad), jnp.float32)
    x_tm = x_tm.at[:, :B, :F].set(
        jnp.transpose(inputs.astype(jnp.float32), (1, 0, 2)))

    out_tm = pl.pallas_call(
        _expert_lstm_kernel,
        out_shape=jax.ShapeDtypeStruct((S, B_pad, U_pad), jnp.float32),
        in_specs=[
            pl.BlockSpec((S, B_pad, U_pad), lambda: (0, 0, 0)),
            pl.BlockSpec((L, U_pad, G), lambda: (0, 0, 0)),
            pl.BlockSpec((L, U_pad, G), lambda: (0, 0, 0)),
            pl.BlockSpec((L, 1, G), lambda: (0, 0, 0)),
            pl.BlockSpec((U_pad, U_pad), lambda: (0, 0)),
            pl.BlockSpec((1, U_pad), lambda: (0, 0)),
        ],
        out_specs=pl.BlockSpec((S, B_pad, U_pad), lambda: (0, 0, 0)),
        scratch_shapes=[
            pltpu.VMEM((S, B_pad, U_pad), jnp.float32),   # layer output (in-place)
            pltpu.VMEM((S, B_pad, G), jnp.float32),       # hoisted x-projection
        ],
        compiler_params=pltpu.CompilerParams(
            vmem_limit_bytes=_vmem_limit_bytes(S, B_pad, U_pad, G, L)),
    )(x_tm, params["wih"], params["whh"], params["b"],
      params["wlin"], params["blin"])

    # lane-dense time-major output -> (B, S, U) batch-first
    return jnp.transpose(out_tm[:, :B, :U], (1, 0, 2))


# ---------------------------------------------------------------------------
# Parameter construction (PyTorch-style uniform(-1/sqrt(U), 1/sqrt(U)) init)
# and packing into the lane/sublane-dense kernel layout.
# ---------------------------------------------------------------------------
def init_expert_lstm_params(key, units, num_features, n_layers):
    k = 1.0 / math.sqrt(units)
    raw = {"lstm": []}
    for layer in range(n_layers):
        in_size = num_features if layer == 0 else units
        key, k1, k2, k3, k4 = jax.random.split(key, 5)
        raw["lstm"].append({
            "w_ih": jax.random.uniform(k1, (4 * units, in_size), jnp.float32, -k, k),
            "w_hh": jax.random.uniform(k2, (4 * units, units), jnp.float32, -k, k),
            "b_ih": jax.random.uniform(k3, (4 * units,), jnp.float32, -k, k),
            "b_hh": jax.random.uniform(k4, (4 * units,), jnp.float32, -k, k),
        })
    key, k5, k6 = jax.random.split(key, 3)
    raw["hidden_w"] = jax.random.uniform(k5, (units, units), jnp.float32, -k, k)
    raw["hidden_b"] = jax.random.uniform(k6, (units,), jnp.float32, -k, k)
    return raw


def pack_params(raw):
    """Pad/stack raw PyTorch-layout weights into the padded kernel layout."""
    U = raw["hidden_w"].shape[0]
    U_pad = _round_up(U, 128)
    G = 4 * U_pad

    def pad_gate_cols(w_t):            # (rows, 4U) -> (rows, G), zero padding
        rows = w_t.shape[0]
        out = jnp.zeros((rows, G), jnp.float32)
        for g in range(4):             # PyTorch gate order: i, f, g, o
            out = out.at[:, g * U_pad: g * U_pad + U].set(w_t[:, g * U:(g + 1) * U])
        return out

    wih, whh, bias = [], [], []
    for lp in raw["lstm"]:
        in_size = lp["w_ih"].shape[1]
        wih.append(jnp.zeros((U_pad, G), jnp.float32)
                   .at[:in_size, :].set(pad_gate_cols(lp["w_ih"].T)))
        whh.append(jnp.zeros((U_pad, G), jnp.float32)
                   .at[:U, :].set(pad_gate_cols(lp["w_hh"].T)))
        bias.append(pad_gate_cols((lp["b_ih"] + lp["b_hh"]).reshape(1, 4 * U)))

    wlin = jnp.zeros((U_pad, U_pad), jnp.float32).at[:U, :U].set(raw["hidden_w"].T)
    blin = jnp.zeros((1, U_pad), jnp.float32).at[0, :U].set(raw["hidden_b"])
    return {"wih": jnp.stack(wih), "whh": jnp.stack(whh), "b": jnp.stack(bias),
            "wlin": wlin, "blin": blin}


def check_padded_regions_zero(params, units):
    """Padded-lane correctness of h/c relies on zero padding; assert it."""
    L, U_pad, G = params["wih"].shape
    ok = True
    for g in range(4):                                  # padded lanes per gate
        lo, hi = g * U_pad + units, (g + 1) * U_pad
        for name in ("wih", "whh", "b"):
            ok &= bool(jnp.all(params[name][..., lo:hi] == 0))
    ok &= bool(jnp.all(params["whh"][:, units:, :] == 0))   # padded W_hh rows
    ok &= bool(jnp.all(params["wlin"][units:, :] == 0))
    ok &= bool(jnp.all(params["wlin"][:, units:] == 0))
    ok &= bool(jnp.all(params["blin"][:, units:] == 0))
    assert ok, "padded weight/bias regions must be exactly zero"


# ---------------------------------------------------------------------------
# Pure-JAX reference (matches PyTorch Expert_LSTM.forward in eval mode).
# ---------------------------------------------------------------------------
def reference_forward(inputs, raw):
    x = jnp.transpose(inputs, (1, 0, 2)).astype(jnp.float32)   # (S, B, F)
    for lp in raw["lstm"]:
        U = lp["w_hh"].shape[1]
        B = x.shape[1]

        def step(carry, xt, lp=lp):
            h, c = carry
            gates = xt @ lp["w_ih"].T + lp["b_ih"] + h @ lp["w_hh"].T + lp["b_hh"]
            i, f, g, o = jnp.split(gates, 4, axis=-1)
            c = jax.nn.sigmoid(f) * c + jax.nn.sigmoid(i) * jnp.tanh(g)
            h = jax.nn.sigmoid(o) * jnp.tanh(c)
            return (h, c), h

        init = (jnp.zeros((B, U), jnp.float32), jnp.zeros((B, U), jnp.float32))
        _, x = lax.scan(step, init, x)
    y = jnp.tanh(x) @ raw["hidden_w"].T + raw["hidden_b"]
    return jnp.transpose(y, (1, 0, 2))


if __name__ == "__main__":
    units, seqlen, num_features, n_layers = 32, 8, 4, 2
    batch = 2

    key = jax.random.PRNGKey(0)
    key, pkey, xkey = jax.random.split(key, 3)
    raw = init_expert_lstm_params(pkey, units, num_features, n_layers)
    params = pack_params(raw)
    check_padded_regions_zero(params, units)
    inputs = jax.random.normal(xkey, (batch, seqlen, num_features), jnp.float32)

    out = expert_lstm_forward(inputs, params, units=units)
    jax.block_until_ready(out)
    assert out.shape == (batch, seqlen, units), out.shape

    ref = reference_forward(inputs, raw)
    err = float(jnp.max(jnp.abs(out - ref)))
    assert err < 1e-3, f"max abs error vs reference: {err}"
    print("KERNEL_OK")
</pallas_src>

<mosaic_0001>
module attributes {stable_mosaic.version = 11 : i64} {
  func.func @_expert_lstm_kernel(%arg0: memref<8x8x128xf32, #tpu.memory_space<vmem>>, %arg1: memref<2x128x512xf32, #tpu.memory_space<vmem>>, %arg2: memref<2x128x512xf32, #tpu.memory_space<vmem>>, %arg3: memref<2x1x512xf32, #tpu.memory_space<vmem>>, %arg4: memref<128x128xf32, #tpu.memory_space<vmem>>, %arg5: memref<1x128xf32, #tpu.memory_space<vmem>>, %arg6: memref<8x8x128xf32, #tpu.memory_space<vmem>>, %arg7: memref<8x8x128xf32, #tpu.memory_space<vmem>>, %arg8: memref<8x8x512xf32, #tpu.memory_space<vmem>>) attributes {dimension_semantics = [], scalar_prefetch = 0 : i64, scratch_operands = 2 : i64, tpu.core_type = #tpu.core_type<tc>} {
    %c0 = arith.constant 0 : index
    %c0_0 = arith.constant 0 : index
    %c0_1 = arith.constant 0 : index
    %0 = vector.load %arg1[%c0, %c0_0, %c0_1] : memref<2x128x512xf32, #tpu.memory_space<vmem>>, vector<1x128x512xf32>
    %1 = vector.shape_cast %0 : vector<1x128x512xf32> to vector<128x512xf32>
    %c0_2 = arith.constant 0 : index
    %c0_3 = arith.constant 0 : index
    %c0_4 = arith.constant 0 : index
    %2 = vector.load %arg2[%c0_2, %c0_3, %c0_4] : memref<2x128x512xf32, #tpu.memory_space<vmem>>, vector<1x128x512xf32>
    %3 = vector.shape_cast %2 : vector<1x128x512xf32> to vector<128x512xf32>
    %c0_5 = arith.constant 0 : index
    %c0_6 = arith.constant 0 : index
    %c0_7 = arith.constant 0 : index
    %4 = vector.load %arg3[%c0_5, %c0_6, %c0_7] : memref<2x1x512xf32, #tpu.memory_space<vmem>>, vector<1x1x512xf32>
    %5 = vector.shape_cast %4 : vector<1x1x512xf32> to vector<1x512xf32>
    %c0_8 = arith.constant 0 : index
    %c0_9 = arith.constant 0 : index
    %c0_10 = arith.constant 0 : index
    %6 = vector.load %arg0[%c0_8, %c0_9, %c0_10] : memref<8x8x128xf32, #tpu.memory_space<vmem>>, vector<8x8x128xf32>
    %7 = vector.shape_cast %6 : vector<8x8x128xf32> to vector<64x128xf32>
    %cst = arith.constant dense<0.000000e+00> : vector<64x512xf32>
    %8 = tpu.matmul %7, %1, %cst {dimension_numbers = #tpu.dot_dimension_numbers<[1], [0], [0], [1], [0, 0, 1, 1], [], []>} : vector<64x128xf32>, vector<128x512xf32>, vector<64x512xf32> -> vector<64x512xf32>
    %9 = vector.broadcast %5 : vector<1x512xf32> to vector<64x512xf32>
    %10 = arith.addf %8, %9 : vector<64x512xf32>
    %11 = vector.shape_cast %10 : vector<64x512xf32> to vector<8x8x512xf32>
    %c0_11 = arith.constant 0 : index
    %c0_12 = arith.constant 0 : index
    %c0_13 = arith.constant 0 : index
    %12 = vector.load %arg8[%c0_11, %c0_12, %c0_13] : memref<8x8x512xf32, #tpu.memory_space<vmem>>, vector<8x8x512xf32>
    tpu.vector_store %arg8[%c0_11, %c0_12, %c0_13], %11 {strides = array<i32>} : memref<8x8x512xf32, #tpu.memory_space<vmem>>, vector<8x8x512xf32>,
    %cst_14 = arith.constant 0.000000e+00 : f32
    %13 = vector.broadcast %cst_14 : f32 to vector<8x128xf32>
    %cst_15 = arith.constant 0.000000e+00 : f32
    %14 = vector.broadcast %cst_15 : f32 to vector<8x128xf32>
    %c0_16 = arith.constant 0 : index
    %c0_17 = arith.constant 0 : index
    %c0_18 = arith.constant 0 : index
    %15 = vector.load %arg8[%c0_16, %c0_17, %c0_18] : memref<8x8x512xf32, #tpu.memory_space<vmem>>, vector<1x8x512xf32>
    %16 = vector.shape_cast %15 : vector<1x8x512xf32> to vector<8x512xf32>
    %cst_19 = arith.constant dense<0.000000e+00> : vector<8x512xf32>
    %17 = tpu.matmul %13, %3, %cst_19 {dimension_numbers = #tpu.dot_dimension_numbers<[1], [0], [0], [1], [0, 0, 1, 1], [], []>} : vector<8x128xf32>, vector<128x512xf32>, vector<8x512xf32> -> vector<8x512xf32>
    %18 = arith.addf %16, %17 : vector<8x512xf32>
    %19 = vector.extract_strided_slice %18 {offsets = [0, 0], sizes = [8, 128], strides = [1, 1]} : vector<8x512xf32> to vector<8x128xf32>
    %20 = arith.negf %19 : vector<8x128xf32>
    %21 = math.exp %20 : vector<8x128xf32>
    %cst_20 = arith.constant 1.000000e+00 : f32
    %22 = vector.broadcast %cst_20 : f32 to vector<8x128xf32>
    %23 = arith.addf %22, %21 : vector<8x128xf32>
    %24 = arith.divf %22, %23 : vector<8x128xf32>
    %25 = vector.extract_strided_slice %18 {offsets = [0, 128], sizes = [8, 128], strides = [1, 1]} : vector<8x512xf32> to vector<8x128xf32>
    %26 = arith.negf %25 : vector<8x128xf32>
    %27 = math.exp %26 : vector<8x128xf32>
    %cst_21 = arith.constant 1.000000e+00 : f32
    %28 = vector.broadcast %cst_21 : f32 to vector<8x128xf32>
    %29 = arith.addf %28, %27 : vector<8x128xf32>
    %30 = arith.divf %28, %29 : vector<8x128xf32>
    %31 = vector.extract_strided_slice %18 {offsets = [0, 256], sizes = [8, 128], strides = [1, 1]} : vector<8x512xf32> to vector<8x128xf32>
    %32 = math.tanh %31 : vector<8x128xf32>
    %33 = vector.extract_strided_slice %18 {offsets = [0, 384], sizes = [8, 128], strides = [1, 1]} : vector<8x512xf32> to vector<8x128xf32>
    %34 = arith.negf %33 : vector<8x128xf32>
    %35 = math.exp %34 : vector<8x128xf32>
    %cst_22 = arith.constant 1.000000e+00 : f32
    %36 = vector.broadcast %cst_22 : f32 to vector<8x128xf32>
    %37 = arith.addf %36, %35 : vector<8x128xf32>
    %38 = arith.divf %36, %37 : vector<8x128xf32>
    %39 = arith.mulf %30, %14 : vector<8x128xf32>
    %40 = arith.mulf %24, %32 : vector<8x128xf32>
    %41 = arith.addf %39, %40 : vector<8x128xf32>
    %42 = math.tanh %41 : vector<8x128xf32>
    %43 = arith.mulf %38, %42 : vector<8x128xf32>
    %c0_23 = arith.constant 0 : index
    %c0_24 = arith.constant 0 : index
    %c0_25 = arith.constant 0 : index
    %44 = vector.load %arg7[%c0_23, %c0_24, %c0_25] : memref<8x8x128xf32, #tpu.memory_space<vmem>>, vector<1x8x128xf32>
    %45 = vector.shape_cast %44 : vector<1x8x128xf32> to vector<8x128xf32>
    %46 = vector.shape_cast %43 : vector<8x128xf32> to vector<1x8x128xf32>
    tpu.vector_store %arg7[%c0_23, %c0_24, %c0_25], %46 {strides = array<i32>} : memref<8x8x128xf32, #tpu.memory_space<vmem>>, vector<1x8x128xf32>,
    %c1 = arith.constant 1 : index
    %c0_26 = arith.constant 0 : index
    %c0_27 = arith.constant 0 : index
    %47 = vector.load %arg8[%c1, %c0_26, %c0_27] : memref<8x8x512xf32, #tpu.memory_space<vmem>>, vector<1x8x512xf32>
    %48 = vector.shape_cast %47 : vector<1x8x512xf32> to vector<8x512xf32>
    %cst_28 = arith.constant dense<0.000000e+00> : vector<8x512xf32>
    %49 = tpu.matmul %43, %3, %cst_28 {dimension_numbers = #tpu.dot_dimension_numbers<[1], [0], [0], [1], [0, 0, 1, 1], [], []>} : vector<8x128xf32>, vector<128x512xf32>, vector<8x512xf32> -> vector<8x512xf32>
    %50 = arith.addf %48, %49 : vector<8x512xf32>
    %51 = vector.extract_strided_slice %50 {offsets = [0, 0], sizes = [8, 128], strides = [1, 1]} : vector<8x512xf32> to vector<8x128xf32>
    %52 = arith.negf %51 : vector<8x128xf32>
    %53 = math.exp %52 : vector<8x128xf32>
    %cst_29 = arith.constant 1.000000e+00 : f32
    %54 = vector.broadcast %cst_29 : f32 to vector<8x128xf32>
    %55 = arith.addf %54, %53 : vector<8x128xf32>
    %56 = arith.divf %54, %55 : vector<8x128xf32>
    %57 = vector.extract_strided_slice %50 {offsets = [0, 128], sizes = [8, 128], strides = [1, 1]} : vector<8x512xf32> to vector<8x128xf32>
    %58 = arith.negf %57 : vector<8x128xf32>
    %59 = math.exp %58 : vector<8x128xf32>
    %cst_30 = arith.constant 1.000000e+00 : f32
    %60 = vector.broadcast %cst_30 : f32 to vector<8x128xf32>
    %61 = arith.addf %60, %59 : vector<8x128xf32>
    %62 = arith.divf %60, %61 : vector<8x128xf32>
    %63 = vector.extract_strided_slice %50 {offsets = [0, 256], sizes = [8, 128], strides = [1, 1]} : vector<8x512xf32> to vector<8x128xf32>
    %64 = math.tanh %63 : vector<8x128xf32>
    %65 = vector.extract_strided_slice %50 {offsets = [0, 384], sizes = [8, 128], strides = [1, 1]} : vector<8x512xf32> to vector<8x128xf32>
    %66 = arith.negf %65 : vector<8x128xf32>
    %67 = math.exp %66 : vector<8x128xf32>
    %cst_31 = arith.constant 1.000000e+00 : f32
    %68 = vector.broadcast %cst_31 : f32 to vector<8x128xf32>
    %69 = arith.addf %68, %67 : vector<8x128xf32>
    %70 = arith.divf %68, %69 : vector<8x128xf32>
    %71 = arith.mulf %62, %41 : vector<8x128xf32>
    %72 = arith.mulf %56, %64 : vector<8x128xf32>
    %73 = arith.addf %71, %72 : vector<8x128xf32>
    %74 = math.tanh %73 : vector<8x128xf32>
    %75 = arith.mulf %70, %74 : vector<8x128xf32>
    %c1_32 = arith.constant 1 : index
    %c0_33 = arith.constant 0 : index
    %c0_34 = arith.constant 0 : index
    %76 = vector.load %arg7[%c1_32, %c0_33, %c0_34] : memref<8x8x128xf32, #tpu.memory_space<vmem>>, vector<1x8x128xf32>
    %77 = vector.shape_cast %76 : vector<1x8x128xf32> to vector<8x128xf32>
    %78 = vector.shape_cast %75 : vector<8x128xf32> to vector<1x8x128xf32>
    tpu.vector_store %arg7[%c1_32, %c0_33, %c0_34], %78 {strides = array<i32>} : memref<8x8x128xf32, #tpu.memory_space<vmem>>, vector<1x8x128xf32>,
    %c2 = arith.constant 2 : index
    %c0_35 = arith.constant 0 : index
    %c0_36 = arith.constant 0 : index
    %79 = vector.load %arg8[%c2, %c0_35, %c0_36] : memref<8x8x512xf32, #tpu.memory_space<vmem>>, vector<1x8x512xf32>
    %80 = vector.shape_cast %79 : vector<1x8x512xf32> to vector<8x512xf32>
    %cst_37 = arith.constant dense<0.000000e+00> : vector<8x512xf32>
    %81 = tpu.matmul %75, %3, %cst_37 {dimension_numbers = #tpu.dot_dimension_numbers<[1], [0], [0], [1], [0, 0, 1, 1], [], []>} : vector<8x128xf32>, vector<128x512xf32>, vector<8x512xf32> -> vector<8x512xf32>
    %82 = arith.addf %80, %81 : vector<8x512xf32>
    %83 = vector.extract_strided_slice %82 {offsets = [0, 0], sizes = [8, 128], strides = [1, 1]} : vector<8x512xf32> to vector<8x128xf32>
    %84 = arith.negf %83 : vector<8x128xf32>
    %85 = math.exp %84 : vector<8x128xf32>
    %cst_38 = arith.constant 1.000000e+00 : f32
    %86 = vector.broadcast %cst_38 : f32 to vector<8x128xf32>
    %87 = arith.addf %86, %85 : vector<8x128xf32>
    %88 = arith.divf %86, %87 : vector<8x128xf32>
    %89 = vector.extract_strided_slice %82 {offsets = [0, 128], sizes = [8, 128], strides = [1, 1]} : vector<8x512xf32> to vector<8x128xf32>
    %90 = arith.negf %89 : vector<8x128xf32>
    %91 = math.exp %90 : vector<8x128xf32>
    %cst_39 = arith.constant 1.000000e+00 : f32
    %92 = vector.broadcast %cst_39 : f32 to vector<8x128xf32>
    %93 = arith.addf %92, %91 : vector<8x128xf32>
    %94 = arith.divf %92, %93 : vector<8x128xf32>
    %95 = vector.extract_strided_slice %82 {offsets = [0, 256], sizes = [8, 128], strides = [1, 1]} : vector<8x512xf32> to vector<8x128xf32>
    %96 = math.tanh %95 : vector<8x128xf32>
    %97 = vector.extract_strided_slice %82 {offsets = [0, 384], sizes = [8, 128], strides = [1, 1]} : vector<8x512xf32> to vector<8x128xf32>
    %98 = arith.negf %97 : vector<8x128xf32>
    %99 = math.exp %98 : vector<8x128xf32>
    %cst_40 = arith.constant 1.000000e+00 : f32
    %100 = vector.broadcast %cst_40 : f32 to vector<8x128xf32>
    %101 = arith.addf %100, %99 : vector<8x128xf32>
    %102 = arith.divf %100, %101 : vector<8x128xf32>
    %103 = arith.mulf %94, %73 : vector<8x128xf32>
    %104 = arith.mulf %88, %96 : vector<8x128xf32>
    %105 = arith.addf %103, %104 : vector<8x128xf32>
    %106 = math.tanh %105 : vector<8x128xf32>
    %107 = arith.mulf %102, %106 : vector<8x128xf32>
    %c2_41 = arith.constant 2 : index
    %c0_42 = arith.constant 0 : index
    %c0_43 = arith.constant 0 : index
    %108 = vector.load %arg7[%c2_41, %c0_42, %c0_43] : memref<8x8x128xf32, #tpu.memory_space<vmem>>, vector<1x8x128xf32>
    %109 = vector.shape_cast %108 : vector<1x8x128xf32> to vector<8x128xf32>
    %110 = vector.shape_cast %107 : vector<8x128xf32> to vector<1x8x128xf32>
    tpu.vector_store %arg7[%c2_41, %c0_42, %c0_43], %110 {strides = array<i32>} : memref<8x8x128xf32, #tpu.memory_space<vmem>>, vector<1x8x128xf32>,
    %c3 = arith.constant 3 : index
    %c0_44 = arith.constant 0 : index
    %c0_45 = arith.constant 0 : index
    %111 = vector.load %arg8[%c3, %c0_44, %c0_45] : memref<8x8x512xf32, #tpu.memory_space<vmem>>, vector<1x8x512xf32>
    %112 = vector.shape_cast %111 : vector<1x8x512xf32> to vector<8x512xf32>
    %cst_46 = arith.constant dense<0.000000e+00> : vector<8x512xf32>
    %113 = tpu.matmul %107, %3, %cst_46 {dimension_numbers = #tpu.dot_dimension_numbers<[1], [0], [0], [1], [0, 0, 1, 1], [], []>} : vector<8x128xf32>, vector<128x512xf32>, vector<8x512xf32> -> vector<8x512xf32>
    %114 = arith.addf %112, %113 : vector<8x512xf32>
    %115 = vector.extract_strided_slice %114 {offsets = [0, 0], sizes = [8, 128], strides = [1, 1]} : vector<8x512xf32> to vector<8x128xf32>
    %116 = arith.negf %115 : vector<8x128xf32>
    %117 = math.exp %116 : vector<8x128xf32>
    %cst_47 = arith.constant 1.000000e+00 : f32
    %118 = vector.broadcast %cst_47 : f32 to vector<8x128xf32>
    %119 = arith.addf %118, %117 : vector<8x128xf32>
    %120 = arith.divf %118, %119 : vector<8x128xf32>
    %121 = vector.extract_strided_slice %114 {offsets = [0, 128], sizes = [8, 128], strides = [1, 1]} : vector<8x512xf32> to vector<8x128xf32>
    %122 = arith.negf %121 : vector<8x128xf32>
    %123 = math.exp %122 : vector<8x128xf32>
    %cst_48 = arith.constant 1.000000e+00 : f32
    %124 = vector.broadcast %cst_48 : f32 to vector<8x128xf32>
    %125 = arith.addf %124, %123 : vector<8x128xf32>
    %126 = arith.divf %124, %125 : vector<8x128xf32>
    %127 = vector.extract_strided_slice %114 {offsets = [0, 256], sizes = [8, 128], strides = [1, 1]} : vector<8x512xf32> to vector<8x128xf32>
    %128 = math.tanh %127 : vector<8x128xf32>
    %129 = vector.extract_strided_slice %114 {offsets = [0, 384], sizes = [8, 128], strides = [1, 1]} : vector<8x512xf32> to vector<8x128xf32>
    %130 = arith.negf %129 : vector<8x128xf32>
    %131 = math.exp %130 : vector<8x128xf32>
    %cst_49 = arith.constant 1.000000e+00 : f32
    %132 = vector.broadcast %cst_49 : f32 to vector<8x128xf32>
    %133 = arith.addf %132, %131 : vector<8x128xf32>
    %134 = arith.divf %132, %133 : vector<8x128xf32>
    %135 = arith.mulf %126, %105 : vector<8x128xf32>
    %136 = arith.mulf %120, %128 : vector<8x128xf32>
    %137 = arith.addf %135, %136 : vector<8x128xf32>
    %138 = math.tanh %137 : vector<8x128xf32>
    %139 = arith.mulf %134, %138 : vector<8x128xf32>
    %c3_50 = arith.constant 3 : index
    %c0_51 = arith.constant 0 : index
    %c0_52 = arith.constant 0 : index
    %140 = vector.load %arg7[%c3_50, %c0_51, %c0_52] : memref<8x8x128xf32, #tpu.memory_space<vmem>>, vector<1x8x128xf32>
    %141 = vector.shape_cast %140 : vector<1x8x128xf32> to vector<8x128xf32>
    %142 = vector.shape_cast %139 : vector<8x128xf32> to vector<1x8x128xf32>
    tpu.vector_store %arg7[%c3_50, %c0_51, %c0_52], %142 {strides = array<i32>} : memref<8x8x128xf32, #tpu.memory_space<vmem>>, vector<1x8x128xf32>,
    %c4 = arith.constant 4 : index
    %c0_53 = arith.constant 0 : index
    %c0_54 = arith.constant 0 : index
    %143 = vector.load %arg8[%c4, %c0_53, %c0_54] : memref<8x8x512xf32, #tpu.memory_space<vmem>>, vector<1x8x512xf32>
    %144 = vector.shape_cast %143 : vector<1x8x512xf32> to vector<8x512xf32>
    %cst_55 = arith.constant dense<0.000000e+00> : vector<8x512xf32>
    %145 = tpu.matmul %139, %3, %cst_55 {dimension_numbers = #tpu.dot_dimension_numbers<[1], [0], [0], [1], [0, 0, 1, 1], [], []>} : vector<8x128xf32>, vector<128x512xf32>, vector<8x512xf32> -> vector<8x512xf32>
    %146 = arith.addf %144, %145 : vector<8x512xf32>
    %147 = vector.extract_strided_slice %146 {offsets = [0, 0], sizes = [8, 128], strides = [1, 1]} : vector<8x512xf32> to vector<8x128xf32>
    %148 = arith.negf %147 : vector<8x128xf32>
    %149 = math.exp %148 : vector<8x128xf32>
    %cst_56 = arith.constant 1.000000e+00 : f32
    %150 = vector.broadcast %cst_56 : f32 to vector<8x128xf32>
    %151 = arith.addf %150, %149 : vector<8x128xf32>
    %152 = arith.divf %150, %151 : vector<8x128xf32>
    %153 = vector.extract_strided_slice %146 {offsets = [0, 128], sizes = [8, 128], strides = [1, 1]} : vector<8x512xf32> to vector<8x128xf32>
    %154 = arith.negf %153 : vector<8x128xf32>
    %155 = math.exp %154 : vector<8x128xf32>
    %cst_57 = arith.constant 1.000000e+00 : f32
    %156 = vector.broadcast %cst_57 : f32 to vector<8x128xf32>
    %157 = arith.addf %156, %155 : vector<8x128xf32>
    %158 = arith.divf %156, %157 : vector<8x128xf32>
    %159 = vector.extract_strided_slice %146 {offsets = [0, 256], sizes = [8, 128], strides = [1, 1]} : vector<8x512xf32> to vector<8x128xf32>
    %160 = math.tanh %159 : vector<8x128xf32>
    %161 = vector.extract_strided_slice %146 {offsets = [0, 384], sizes = [8, 128], strides = [1, 1]} : vector<8x512xf32> to vector<8x128xf32>
    %162 = arith.negf %161 : vector<8x128xf32>
    %163 = math.exp %162 : vector<8x128xf32>
    %cst_58 = arith.constant 1.000000e+00 : f32
    %164 = vector.broadcast %cst_58 : f32 to vector<8x128xf32>
    %165 = arith.addf %164, %163 : vector<8x128xf32>
    %166 = arith.divf %164, %165 : vector<8x128xf32>
    %167 = arith.mulf %158, %137 : vector<8x128xf32>
    %168 = arith.mulf %152, %160 : vector<8x128xf32>
    %169 = arith.addf %167, %168 : vector<8x128xf32>
    %170 = math.tanh %169 : vector<8x128xf32>
    %171 = arith.mulf %166, %170 : vector<8x128xf32>
    %c4_59 = arith.constant 4 : index
    %c0_60 = arith.constant 0 : index
    %c0_61 = arith.constant 0 : index
    %172 = vector.load %arg7[%c4_59, %c0_60, %c0_61] : memref<8x8x128xf32, #tpu.memory_space<vmem>>, vector<1x8x128xf32>
    %173 = vector.shape_cast %172 : vector<1x8x128xf32> to vector<8x128xf32>
    %174 = vector.shape_cast %171 : vector<8x128xf32> to vector<1x8x128xf32>
    tpu.vector_store %arg7[%c4_59, %c0_60, %c0_61], %174 {strides = array<i32>} : memref<8x8x128xf32, #tpu.memory_space<vmem>>, vector<1x8x128xf32>,
    %c5 = arith.constant 5 : index
    %c0_62 = arith.constant 0 : index
    %c0_63 = arith.constant 0 : index
    %175 = vector.load %arg8[%c5, %c0_62, %c0_63] : memref<8x8x512xf32, #tpu.memory_space<vmem>>, vector<1x8x512xf32>
    %176 = vector.shape_cast %175 : vector<1x8x512xf32> to vector<8x512xf32>
    %cst_64 = arith.constant dense<0.000000e+00> : vector<8x512xf32>
    %177 = tpu.matmul %171, %3, %cst_64 {dimension_numbers = #tpu.dot_dimension_numbers<[1], [0], [0], [1], [0, 0, 1, 1], [], []>} : vector<8x128xf32>, vector<128x512xf32>, vector<8x512xf32> -> vector<8x512xf32>
    %178 = arith.addf %176, %177 : vector<8x512xf32>
    %179 = vector.extract_strided_slice %178 {offsets = [0, 0], sizes = [8, 128], strides = [1, 1]} : vector<8x512xf32> to vector<8x128xf32>
    %180 = arith.negf %179 : vector<8x128xf32>
    %181 = math.exp %180 : vector<8x128xf32>
    %cst_65 = arith.constant 1.000000e+00 : f32
    %182 = vector.broadcast %cst_65 : f32 to vector<8x128xf32>
    %183 = arith.addf %182, %181 : vector<8x128xf32>
    %184 = arith.divf %182, %183 : vector<8x128xf32>
    %185 = vector.extract_strided_slice %178 {offsets = [0, 128], sizes = [8, 128], strides = [1, 1]} : vector<8x512xf32> to vector<8x128xf32>
    %186 = arith.negf %185 : vector<8x128xf32>
    %187 = math.exp %186 : vector<8x128xf32>
    %cst_66 = arith.constant 1.000000e+00 : f32
    %188 = vector.broadcast %cst_66 : f32 to vector<8x128xf32>
    %189 = arith.addf %188, %187 : vector<8x128xf32>
    %190 = arith.divf %188, %189 : vector<8x128xf32>
    %191 = vector.extract_strided_slice %178 {offsets = [0, 256], sizes = [8, 128], strides = [1, 1]} : vector<8x512xf32> to vector<8x128xf32>
    %192 = math.tanh %191 : vector<8x128xf32>
    %193 = vector.extract_strided_slice %178 {offsets = [0, 384], sizes = [8, 128], strides = [1, 1]} : vector<8x512xf32> to vector<8x128xf32>
    %194 = arith.negf %193 : vector<8x128xf32>
    %195 = math.exp %194 : vector<8x128xf32>
    %cst_67 = arith.constant 1.000000e+00 : f32
    %196 = vector.broadcast %cst_67 : f32 to vector<8x128xf32>
    %197 = arith.addf %196, %195 : vector<8x128xf32>
    %198 = arith.divf %196, %197 : vector<8x128xf32>
    %199 = arith.mulf %190, %169 : vector<8x128xf32>
    %200 = arith.mulf %184, %192 : vector<8x128xf32>
    %201 = arith.addf %199, %200 : vector<8x128xf32>
    %202 = math.tanh %201 : vector<8x128xf32>
    %203 = arith.mulf %198, %202 : vector<8x128xf32>
    %c5_68 = arith.constant 5 : index
    %c0_69 = arith.constant 0 : index
    %c0_70 = arith.constant 0 : index
    %204 = vector.load %arg7[%c5_68, %c0_69, %c0_70] : memref<8x8x128xf32, #tpu.memory_space<vmem>>, vector<1x8x128xf32>
    %205 = vector.shape_cast %204 : vector<1x8x128xf32> to vector<8x128xf32>
    %206 = vector.shape_cast %203 : vector<8x128xf32> to vector<1x8x128xf32>
    tpu.vector_store %arg7[%c5_68, %c0_69, %c0_70], %206 {strides = array<i32>} : memref<8x8x128xf32, #tpu.memory_space<vmem>>, vector<1x8x128xf32>,
    %c6 = arith.constant 6 : index
    %c0_71 = arith.constant 0 : index
    %c0_72 = arith.constant 0 : index
    %207 = vector.load %arg8[%c6, %c0_71, %c0_72] : memref<8x8x512xf32, #tpu.memory_space<vmem>>, vector<1x8x512xf32>
    %208 = vector.shape_cast %207 : vector<1x8x512xf32> to vector<8x512xf32>
    %cst_73 = arith.constant dense<0.000000e+00> : vector<8x512xf32>
    %209 = tpu.matmul %203, %3, %cst_73 {dimension_numbers = #tpu.dot_dimension_numbers<[1], [0], [0], [1], [0, 0, 1, 1], [], []>} : vector<8x128xf32>, vector<128x512xf32>, vector<8x512xf32> -> vector<8x512xf32>
    %210 = arith.addf %208, %209 : vector<8x512xf32>
    %211 = vector.extract_strided_slice %210 {offsets = [0, 0], sizes = [8, 128], strides = [1, 1]} : vector<8x512xf32> to vector<8x128xf32>
    %212 = arith.negf %211 : vector<8x128xf32>
    %213 = math.exp %212 : vector<8x128xf32>
    %cst_74 = arith.constant 1.000000e+00 : f32
    %214 = vector.broadcast %cst_74 : f32 to vector<8x128xf32>
    %215 = arith.addf %214, %213 : vector<8x128xf32>
    %216 = arith.divf %214, %215 : vector<8x128xf32>
    %217 = vector.extract_strided_slice %210 {offsets = [0, 128], sizes = [8, 128], strides = [1, 1]} : vector<8x512xf32> to vector<8x128xf32>
    %218 = arith.negf %217 : vector<8x128xf32>
    %219 = math.exp %218 : vector<8x128xf32>
    %cst_75 = arith.constant 1.000000e+00 : f32
    %220 = vector.broadcast %cst_75 : f32 to vector<8x128xf32>
    %221 = arith.addf %220, %219 : vector<8x128xf32>
    %222 = arith.divf %220, %221 : vector<8x128xf32>
    %223 = vector.extract_strided_slice %210 {offsets = [0, 256], sizes = [8, 128], strides = [1, 1]} : vector<8x512xf32> to vector<8x128xf32>
    %224 = math.tanh %223 : vector<8x128xf32>
    %225 = vector.extract_strided_slice %210 {offsets = [0, 384], sizes = [8, 128], strides = [1, 1]} : vector<8x512xf32> to vector<8x128xf32>
    %226 = arith.negf %225 : vector<8x128xf32>
    %227 = math.exp %226 : vector<8x128xf32>
    %cst_76 = arith.constant 1.000000e+00 : f32
    %228 = vector.broadcast %cst_76 : f32 to vector<8x128xf32>
    %229 = arith.addf %228, %227 : vector<8x128xf32>
    %230 = arith.divf %228, %229 : vector<8x128xf32>
    %231 = arith.mulf %222, %201 : vector<8x128xf32>
    %232 = arith.mulf %216, %224 : vector<8x128xf32>
    %233 = arith.addf %231, %232 : vector<8x128xf32>
    %234 = math.tanh %233 : vector<8x128xf32>
    %235 = arith.mulf %230, %234 : vector<8x128xf32>
    %c6_77 = arith.constant 6 : index
    %c0_78 = arith.constant 0 : index
    %c0_79 = arith.constant 0 : index
    %236 = vector.load %arg7[%c6_77, %c0_78, %c0_79] : memref<8x8x128xf32, #tpu.memory_space<vmem>>, vector<1x8x128xf32>
    %237 = vector.shape_cast %236 : vector<1x8x128xf32> to vector<8x128xf32>
    %238 = vector.shape_cast %235 : vector<8x128xf32> to vector<1x8x128xf32>
    tpu.vector_store %arg7[%c6_77, %c0_78, %c0_79], %238 {strides = array<i32>} : memref<8x8x128xf32, #tpu.memory_space<vmem>>, vector<1x8x128xf32>,
    %c7 = arith.constant 7 : index
    %c0_80 = arith.constant 0 : index
    %c0_81 = arith.constant 0 : index
    %239 = vector.load %arg8[%c7, %c0_80, %c0_81] : memref<8x8x512xf32, #tpu.memory_space<vmem>>, vector<1x8x512xf32>
    %240 = vector.shape_cast %239 : vector<1x8x512xf32> to vector<8x512xf32>
    %cst_82 = arith.constant dense<0.000000e+00> : vector<8x512xf32>
    %241 = tpu.matmul %235, %3, %cst_82 {dimension_numbers = #tpu.dot_dimension_numbers<[1], [0], [0], [1], [0, 0, 1, 1], [], []>} : vector<8x128xf32>, vector<128x512xf32>, vector<8x512xf32> -> vector<8x512xf32>
    %242 = arith.addf %240, %241 : vector<8x512xf32>
    %243 = vector.extract_strided_slice %242 {offsets = [0, 0], sizes = [8, 128], strides = [1, 1]} : vector<8x512xf32> to vector<8x128xf32>
    %244 = arith.negf %243 : vector<8x128xf32>
    %245 = math.exp %244 : vector<8x128xf32>
    %cst_83 = arith.constant 1.000000e+00 : f32
    %246 = vector.broadcast %cst_83 : f32 to vector<8x128xf32>
    %247 = arith.addf %246, %245 : vector<8x128xf32>
    %248 = arith.divf %246, %247 : vector<8x128xf32>
    %249 = vector.extract_strided_slice %242 {offsets = [0, 128], sizes = [8, 128], strides = [1, 1]} : vector<8x512xf32> to vector<8x128xf32>
    %250 = arith.negf %249 : vector<8x128xf32>
    %251 = math.exp %250 : vector<8x128xf32>
    %cst_84 = arith.constant 1.000000e+00 : f32
    %252 = vector.broadcast %cst_84 : f32 to vector<8x128xf32>
    %253 = arith.addf %252, %251 : vector<8x128xf32>
    %254 = arith.divf %252, %253 : vector<8x128xf32>
    %255 = vector.extract_strided_slice %242 {offsets = [0, 256], sizes = [8, 128], strides = [1, 1]} : vector<8x512xf32> to vector<8x128xf32>
    %256 = math.tanh %255 : vector<8x128xf32>
    %257 = vector.extract_strided_slice %242 {offsets = [0, 384], sizes = [8, 128], strides = [1, 1]} : vector<8x512xf32> to vector<8x128xf32>
    %258 = arith.negf %257 : vector<8x128xf32>
    %259 = math.exp %258 : vector<8x128xf32>
    %cst_85 = arith.constant 1.000000e+00 : f32
    %260 = vector.broadcast %cst_85 : f32 to vector<8x128xf32>
    %261 = arith.addf %260, %259 : vector<8x128xf32>
    %262 = arith.divf %260, %261 : vector<8x128xf32>
    %263 = arith.mulf %254, %233 : vector<8x128xf32>
    %264 = arith.mulf %248, %256 : vector<8x128xf32>
    %265 = arith.addf %263, %264 : vector<8x128xf32>
    %266 = math.tanh %265 : vector<8x128xf32>
    %267 = arith.mulf %262, %266 : vector<8x128xf32>
    %c7_86 = arith.constant 7 : index
    %c0_87 = arith.constant 0 : index
    %c0_88 = arith.constant 0 : index
    %268 = vector.load %arg7[%c7_86, %c0_87, %c0_88] : memref<8x8x128xf32, #tpu.memory_space<vmem>>, vector<1x8x128xf32>
    %269 = vector.shape_cast %268 : vector<1x8x128xf32> to vector<8x128xf32>
    %270 = vector.shape_cast %267 : vector<8x128xf32> to vector<1x8x128xf32>
    tpu.vector_store %arg7[%c7_86, %c0_87, %c0_88], %270 {strides = array<i32>} : memref<8x8x128xf32, #tpu.memory_space<vmem>>, vector<1x8x128xf32>,
    %c1_89 = arith.constant 1 : index
    %c0_90 = arith.constant 0 : index
    %c0_91 = arith.constant 0 : index
    %271 = vector.load %arg1[%c1_89, %c0_90, %c0_91] : memref<2x128x512xf32, #tpu.memory_space<vmem>>, vector<1x128x512xf32>
    %272 = vector.shape_cast %271 : vector<1x128x512xf32> to vector<128x512xf32>
    %c1_92 = arith.constant 1 : index
    %c0_93 = arith.constant 0 : index
    %c0_94 = arith.constant 0 : index
    %273 = vector.load %arg2[%c1_92, %c0_93, %c0_94] : memref<2x128x512xf32, #tpu.memory_space<vmem>>, vector<1x128x512xf32>
    %274 = vector.shape_cast %273 : vector<1x128x512xf32> to vector<128x512xf32>
    %c1_95 = arith.constant 1 : index
    %c0_96 = arith.constant 0 : index
    %c0_97 = arith.constant 0 : index
    %275 = vector.load %arg3[%c1_95, %c0_96, %c0_97] : memref<2x1x512xf32, #tpu.memory_space<vmem>>, vector<1x1x512xf32>
    %276 = vector.shape_cast %275 : vector<1x1x512xf32> to vector<1x512xf32>
    %c0_98 = arith.constant 0 : index
    %c0_99 = arith.constant 0 : index
    %c0_100 = arith.constant 0 : index
    %277 = vector.load %arg7[%c0_98, %c0_99, %c0_100] : memref<8x8x128xf32, #tpu.memory_space<vmem>>, vector<8x8x128xf32>
    %278 = vector.shape_cast %277 : vector<8x8x128xf32> to vector<64x128xf32>
    %cst_101 = arith.constant dense<0.000000e+00> : vector<64x512xf32>
    %279 = tpu.matmul %278, %272, %cst_101 {dimension_numbers = #tpu.dot_dimension_numbers<[1], [0], [0], [1], [0, 0, 1, 1], [], []>} : vector<64x128xf32>, vector<128x512xf32>, vector<64x512xf32> -> vector<64x512xf32>
    %280 = vector.broadcast %276 : vector<1x512xf32> to vector<64x512xf32>
    %281 = arith.addf %279, %280 : vector<64x512xf32>
    %282 = vector.shape_cast %281 : vector<64x512xf32> to vector<8x8x512xf32>
    %c0_102 = arith.constant 0 : index
    %c0_103 = arith.constant 0 : index
    %c0_104 = arith.constant 0 : index
    %283 = vector.load %arg8[%c0_102, %c0_103, %c0_104] : memref<8x8x512xf32, #tpu.memory_space<vmem>>, vector<8x8x512xf32>
    tpu.vector_store %arg8[%c0_102, %c0_103, %c0_104], %282 {strides = array<i32>} : memref<8x8x512xf32, #tpu.memory_space<vmem>>, vector<8x8x512xf32>,
    %cst_105 = arith.constant 0.000000e+00 : f32
    %284 = vector.broadcast %cst_105 : f32 to vector<8x128xf32>
    %cst_106 = arith.constant 0.000000e+00 : f32
    %285 = vector.broadcast %cst_106 : f32 to vector<8x128xf32>
    %c0_107 = arith.constant 0 : index
    %c0_108 = arith.constant 0 : index
    %c0_109 = arith.constant 0 : index
    %286 = vector.load %arg8[%c0_107, %c0_108, %c0_109] : memref<8x8x512xf32, #tpu.memory_space<vmem>>, vector<1x8x512xf32>
    %287 = vector.shape_cast %286 : vector<1x8x512xf32> to vector<8x512xf32>
    %cst_110 = arith.constant dense<0.000000e+00> : vector<8x512xf32>
    %288 = tpu.matmul %284, %274, %cst_110 {dimension_numbers = #tpu.dot_dimension_numbers<[1], [0], [0], [1], [0, 0, 1, 1], [], []>} : vector<8x128xf32>, vector<128x512xf32>, vector<8x512xf32> -> vector<8x512xf32>
    %289 = arith.addf %287, %288 : vector<8x512xf32>
    %290 = vector.extract_strided_slice %289 {offsets = [0, 0], sizes = [8, 128], strides = [1, 1]} : vector<8x512xf32> to vector<8x128xf32>
    %291 = arith.negf %290 : vector<8x128xf32>
    %292 = math.exp %291 : vector<8x128xf32>
    %cst_111 = arith.constant 1.000000e+00 : f32
    %293 = vector.broadcast %cst_111 : f32 to vector<8x128xf32>
    %294 = arith.addf %293, %292 : vector<8x128xf32>
    %295 = arith.divf %293, %294 : vector<8x128xf32>
    %296 = vector.extract_strided_slice %289 {offsets = [0, 128], sizes = [8, 128], strides = [1, 1]} : vector<8x512xf32> to vector<8x128xf32>
    %297 = arith.negf %296 : vector<8x128xf32>
    %298 = math.exp %297 : vector<8x128xf32>
    %cst_112 = arith.constant 1.000000e+00 : f32
    %299 = vector.broadcast %cst_112 : f32 to vector<8x128xf32>
    %300 = arith.addf %299, %298 : vector<8x128xf32>
    %301 = arith.divf %299, %300 : vector<8x128xf32>
    %302 = vector.extract_strided_slice %289 {offsets = [0, 256], sizes = [8, 128], strides = [1, 1]} : vector<8x512xf32> to vector<8x128xf32>
    %303 = math.tanh %302 : vector<8x128xf32>
    %304 = vector.extract_strided_slice %289 {offsets = [0, 384], sizes = [8, 128], strides = [1, 1]} : vector<8x512xf32> to vector<8x128xf32>
    %305 = arith.negf %304 : vector<8x128xf32>
    %306 = math.exp %305 : vector<8x128xf32>
    %cst_113 = arith.constant 1.000000e+00 : f32
    %307 = vector.broadcast %cst_113 : f32 to vector<8x128xf32>
    %308 = arith.addf %307, %306 : vector<8x128xf32>
    %309 = arith.divf %307, %308 : vector<8x128xf32>
    %310 = arith.mulf %301, %285 : vector<8x128xf32>
    %311 = arith.mulf %295, %303 : vector<8x128xf32>
    %312 = arith.addf %310, %311 : vector<8x128xf32>
    %313 = math.tanh %312 : vector<8x128xf32>
    %314 = arith.mulf %309, %313 : vector<8x128xf32>
    %c0_114 = arith.constant 0 : index
    %c0_115 = arith.constant 0 : index
    %c0_116 = arith.constant 0 : index
    %315 = vector.load %arg7[%c0_114, %c0_115, %c0_116] : memref<8x8x128xf32, #tpu.memory_space<vmem>>, vector<1x8x128xf32>
    %316 = vector.shape_cast %315 : vector<1x8x128xf32> to vector<8x128xf32>
    %317 = vector.shape_cast %314 : vector<8x128xf32> to vector<1x8x128xf32>
    tpu.vector_store %arg7[%c0_114, %c0_115, %c0_116], %317 {strides = array<i32>} : memref<8x8x128xf32, #tpu.memory_space<vmem>>, vector<1x8x128xf32>,
    %c1_117 = arith.constant 1 : index
    %c0_118 = arith.constant 0 : index
    %c0_119 = arith.constant 0 : index
    %318 = vector.load %arg8[%c1_117, %c0_118, %c0_119] : memref<8x8x512xf32, #tpu.memory_space<vmem>>, vector<1x8x512xf32>
    %319 = vector.shape_cast %318 : vector<1x8x512xf32> to vector<8x512xf32>
    %cst_120 = arith.constant dense<0.000000e+00> : vector<8x512xf32>
    %320 = tpu.matmul %314, %274, %cst_120 {dimension_numbers = #tpu.dot_dimension_numbers<[1], [0], [0], [1], [0, 0, 1, 1], [], []>} : vector<8x128xf32>, vector<128x512xf32>, vector<8x512xf32> -> vector<8x512xf32>
    %321 = arith.addf %319, %320 : vector<8x512xf32>
    %322 = vector.extract_strided_slice %321 {offsets = [0, 0], sizes = [8, 128], strides = [1, 1]} : vector<8x512xf32> to vector<8x128xf32>
    %323 = arith.negf %322 : vector<8x128xf32>
    %324 = math.exp %323 : vector<8x128xf32>
    %cst_121 = arith.constant 1.000000e+00 : f32
    %325 = vector.broadcast %cst_121 : f32 to vector<8x128xf32>
    %326 = arith.addf %325, %324 : vector<8x128xf32>
    %327 = arith.divf %325, %326 : vector<8x128xf32>
    %328 = vector.extract_strided_slice %321 {offsets = [0, 128], sizes = [8, 128], strides = [1, 1]} : vector<8x512xf32> to vector<8x128xf32>
    %329 = arith.negf %328 : vector<8x128xf32>
    %330 = math.exp %329 : vector<8x128xf32>
    %cst_122 = arith.constant 1.000000e+00 : f32
    %331 = vector.broadcast %cst_122 : f32 to vector<8x128xf32>
    %332 = arith.addf %331, %330 : vector<8x128xf32>
    %333 = arith.divf %331, %332 : vector<8x128xf32>
    %334 = vector.extract_strided_slice %321 {offsets = [0, 256], sizes = [8, 128], strides = [1, 1]} : vector<8x512xf32> to vector<8x128xf32>
    %335 = math.tanh %334 : vector<8x128xf32>
    %336 = vector.extract_strided_slice %321 {offsets = [0, 384], sizes = [8, 128], strides = [1, 1]} : vector<8x512xf32> to vector<8x128xf32>
    %337 = arith.negf %336 : vector<8x128xf32>
    %338 = math.exp %337 : vector<8x128xf32>
    %cst_123 = arith.constant 1.000000e+00 : f32
    %339 = vector.broadcast %cst_123 : f32 to vector<8x128xf32>
    %340 = arith.addf %339, %338 : vector<8x128xf32>
    %341 = arith.divf %339, %340 : vector<8x128xf32>
    %342 = arith.mulf %333, %312 : vector<8x128xf32>
    %343 = arith.mulf %327, %335 : vector<8x128xf32>
    %344 = arith.addf %342, %343 : vector<8x128xf32>
    %345 = math.tanh %344 : vector<8x128xf32>
    %346 = arith.mulf %341, %345 : vector<8x128xf32>
    %c1_124 = arith.constant 1 : index
    %c0_125 = arith.constant 0 : index
    %c0_126 = arith.constant 0 : index
    %347 = vector.load %arg7[%c1_124, %c0_125, %c0_126] : memref<8x8x128xf32, #tpu.memory_space<vmem>>, vector<1x8x128xf32>
    %348 = vector.shape_cast %347 : vector<1x8x128xf32> to vector<8x128xf32>
    %349 = vector.shape_cast %346 : vector<8x128xf32> to vector<1x8x128xf32>
    tpu.vector_store %arg7[%c1_124, %c0_125, %c0_126], %349 {strides = array<i32>} : memref<8x8x128xf32, #tpu.memory_space<vmem>>, vector<1x8x128xf32>,
    %c2_127 = arith.constant 2 : index
    %c0_128 = arith.constant 0 : index
    %c0_129 = arith.constant 0 : index
    %350 = vector.load %arg8[%c2_127, %c0_128, %c0_129] : memref<8x8x512xf32, #tpu.memory_space<vmem>>, vector<1x8x512xf32>
    %351 = vector.shape_cast %350 : vector<1x8x512xf32> to vector<8x512xf32>
    %cst_130 = arith.constant dense<0.000000e+00> : vector<8x512xf32>
    %352 = tpu.matmul %346, %274, %cst_130 {dimension_numbers = #tpu.dot_dimension_numbers<[1], [0], [0], [1], [0, 0, 1, 1], [], []>} : vector<8x128xf32>, vector<128x512xf32>, vector<8x512xf32> -> vector<8x512xf32>
    %353 = arith.addf %351, %352 : vector<8x512xf32>
    %354 = vector.extract_strided_slice %353 {offsets = [0, 0], sizes = [8, 128], strides = [1, 1]} : vector<8x512xf32> to vector<8x128xf32>
    %355 = arith.negf %354 : vector<8x128xf32>
    %356 = math.exp %355 : vector<8x128xf32>
    %cst_131 = arith.constant 1.000000e+00 : f32
    %357 = vector.broadcast %cst_131 : f32 to vector<8x128xf32>
    %358 = arith.addf %357, %356 : vector<8x128xf32>
    %359 = arith.divf %357, %358 : vector<8x128xf32>
    %360 = vector.extract_strided_slice %353 {offsets = [0, 128], sizes = [8, 128], strides = [1, 1]} : vector<8x512xf32> to vector<8x128xf32>
    %361 = arith.negf %360 : vector<8x128xf32>
    %362 = math.exp %361 : vector<8x128xf32>
    %cst_132 = arith.constant 1.000000e+00 : f32
    %363 = vector.broadcast %cst_132 : f32 to vector<8x128xf32>
    %364 = arith.addf %363, %362 : vector<8x128xf32>
    %365 = arith.divf %363, %364 : vector<8x128xf32>
    %366 = vector.extract_strided_slice %353 {offsets = [0, 256], sizes = [8, 128], strides = [1, 1]} : vector<8x512xf32> to vector<8x128xf32>
    %367 = math.tanh %366 : vector<8x128xf32>
    %368 = vector.extract_strided_slice %353 {offsets = [0, 384], sizes = [8, 128], strides = [1, 1]} : vector<8x512xf32> to vector<8x128xf32>
    %369 = arith.negf %368 : vector<8x128xf32>
    %370 = math.exp %369 : vector<8x128xf32>
    %cst_133 = arith.constant 1.000000e+00 : f32
    %371 = vector.broadcast %cst_133 : f32 to vector<8x128xf32>
    %372 = arith.addf %371, %370 : vector<8x128xf32>
    %373 = arith.divf %371, %372 : vector<8x128xf32>
    %374 = arith.mulf %365, %344 : vector<8x128xf32>
    %375 = arith.mulf %359, %367 : vector<8x128xf32>
    %376 = arith.addf %374, %375 : vector<8x128xf32>
    %377 = math.tanh %376 : vector<8x128xf32>
    %378 = arith.mulf %373, %377 : vector<8x128xf32>
    %c2_134 = arith.constant 2 : index
    %c0_135 = arith.constant 0 : index
    %c0_136 = arith.constant 0 : index
    %379 = vector.load %arg7[%c2_134, %c0_135, %c0_136] : memref<8x8x128xf32, #tpu.memory_space<vmem>>, vector<1x8x128xf32>
    %380 = vector.shape_cast %379 : vector<1x8x128xf32> to vector<8x128xf32>
    %381 = vector.shape_cast %378 : vector<8x128xf32> to vector<1x8x128xf32>
    tpu.vector_store %arg7[%c2_134, %c0_135, %c0_136], %381 {strides = array<i32>} : memref<8x8x128xf32, #tpu.memory_space<vmem>>, vector<1x8x128xf32>,
    %c3_137 = arith.constant 3 : index
    %c0_138 = arith.constant 0 : index
    %c0_139 = arith.constant 0 : index
    %382 = vector.load %arg8[%c3_137, %c0_138, %c0_139] : memref<8x8x512xf32, #tpu.memory_space<vmem>>, vector<1x8x512xf32>
    %383 = vector.shape_cast %382 : vector<1x8x512xf32> to vector<8x512xf32>
    %cst_140 = arith.constant dense<0.000000e+00> : vector<8x512xf32>
    %384 = tpu.matmul %378, %274, %cst_140 {dimension_numbers = #tpu.dot_dimension_numbers<[1], [0], [0], [1], [0, 0, 1, 1], [], []>} : vector<8x128xf32>, vector<128x512xf32>, vector<8x512xf32> -> vector<8x512xf32>
    %385 = arith.addf %383, %384 : vector<8x512xf32>
    %386 = vector.extract_strided_slice %385 {offsets = [0, 0], sizes = [8, 128], strides = [1, 1]} : vector<8x512xf32> to vector<8x128xf32>
    %387 = arith.negf %386 : vector<8x128xf32>
    %388 = math.exp %387 : vector<8x128xf32>
    %cst_141 = arith.constant 1.000000e+00 : f32
    %389 = vector.broadcast %cst_141 : f32 to vector<8x128xf32>
    %390 = arith.addf %389, %388 : vector<8x128xf32>
    %391 = arith.divf %389, %390 : vector<8x128xf32>
    %392 = vector.extract_strided_slice %385 {offsets = [0, 128], sizes = [8, 128], strides = [1, 1]} : vector<8x512xf32> to vector<8x128xf32>
    %393 = arith.negf %392 : vector<8x128xf32>
    %394 = math.exp %393 : vector<8x128xf32>
    %cst_142 = arith.constant 1.000000e+00 : f32
    %395 = vector.broadcast %cst_142 : f32 to vector<8x128xf32>
    %396 = arith.addf %395, %394 : vector<8x128xf32>
    %397 = arith.divf %395, %396 : vector<8x128xf32>
    %398 = vector.extract_strided_slice %385 {offsets = [0, 256], sizes = [8, 128], strides = [1, 1]} : vector<8x512xf32> to vector<8x128xf32>
    %399 = math.tanh %398 : vector<8x128xf32>
    %400 = vector.extract_strided_slice %385 {offsets = [0, 384], sizes = [8, 128], strides = [1, 1]} : vector<8x512xf32> to vector<8x128xf32>
    %401 = arith.negf %400 : vector<8x128xf32>
    %402 = math.exp %401 : vector<8x128xf32>
    %cst_143 = arith.constant 1.000000e+00 : f32
    %403 = vector.broadcast %cst_143 : f32 to vector<8x128xf32>
    %404 = arith.addf %403, %402 : vector<8x128xf32>
    %405 = arith.divf %403, %404 : vector<8x128xf32>
    %406 = arith.mulf %397, %376 : vector<8x128xf32>
    %407 = arith.mulf %391, %399 : vector<8x128xf32>
    %408 = arith.addf %406, %407 : vector<8x128xf32>
    %409 = math.tanh %408 : vector<8x128xf32>
    %410 = arith.mulf %405, %409 : vector<8x128xf32>
    %c3_144 = arith.constant 3 : index
    %c0_145 = arith.constant 0 : index
    %c0_146 = arith.constant 0 : index
    %411 = vector.load %arg7[%c3_144, %c0_145, %c0_146] : memref<8x8x128xf32, #tpu.memory_space<vmem>>, vector<1x8x128xf32>
    %412 = vector.shape_cast %411 : vector<1x8x128xf32> to vector<8x128xf32>
    %413 = vector.shape_cast %410 : vector<8x128xf32> to vector<1x8x128xf32>
    tpu.vector_store %arg7[%c3_144, %c0_145, %c0_146], %413 {strides = array<i32>} : memref<8x8x128xf32, #tpu.memory_space<vmem>>, vector<1x8x128xf32>,
    %c4_147 = arith.constant 4 : index
    %c0_148 = arith.constant 0 : index
    %c0_149 = arith.constant 0 : index
    %414 = vector.load %arg8[%c4_147, %c0_148, %c0_149] : memref<8x8x512xf32, #tpu.memory_space<vmem>>, vector<1x8x512xf32>
    %415 = vector.shape_cast %414 : vector<1x8x512xf32> to vector<8x512xf32>
    %cst_150 = arith.constant dense<0.000000e+00> : vector<8x512xf32>
    %416 = tpu.matmul %410, %274, %cst_150 {dimension_numbers = #tpu.dot_dimension_numbers<[1], [0], [0], [1], [0, 0, 1, 1], [], []>} : vector<8x128xf32>, vector<128x512xf32>, vector<8x512xf32> -> vector<8x512xf32>
    %417 = arith.addf %415, %416 : vector<8x512xf32>
    %418 = vector.extract_strided_slice %417 {offsets = [0, 0], sizes = [8, 128], strides = [1, 1]} : vector<8x512xf32> to vector<8x128xf32>
    %419 = arith.negf %418 : vector<8x128xf32>
    %420 = math.exp %419 : vector<8x128xf32>
    %cst_151 = arith.constant 1.000000e+00 : f32
    %421 = vector.broadcast %cst_151 : f32 to vector<8x128xf32>
    %422 = arith.addf %421, %420 : vector<8x128xf32>
    %423 = arith.divf %421, %422 : vector<8x128xf32>
    %424 = vector.extract_strided_slice %417 {offsets = [0, 128], sizes = [8, 128], strides = [1, 1]} : vector<8x512xf32> to vector<8x128xf32>
    %425 = arith.negf %424 : vector<8x128xf32>
    %426 = math.exp %425 : vector<8x128xf32>
    %cst_152 = arith.constant 1.000000e+00 : f32
    %427 = vector.broadcast %cst_152 : f32 to vector<8x128xf32>
    %428 = arith.addf %427, %426 : vector<8x128xf32>
    %429 = arith.divf %427, %428 : vector<8x128xf32>
    %430 = vector.extract_strided_slice %417 {offsets = [0, 256], sizes = [8, 128], strides = [1, 1]} : vector<8x512xf32> to vector<8x128xf32>
    %431 = math.tanh %430 : vector<8x128xf32>
    %432 = vector.extract_strided_slice %417 {offsets = [0, 384], sizes = [8, 128], strides = [1, 1]} : vector<8x512xf32> to vector<8x128xf32>
    %433 = arith.negf %432 : vector<8x128xf32>
    %434 = math.exp %433 : vector<8x128xf32>
    %cst_153 = arith.constant 1.000000e+00 : f32
    %435 = vector.broadcast %cst_153 : f32 to vector<8x128xf32>
    %436 = arith.addf %435, %434 : vector<8x128xf32>
    %437 = arith.divf %435, %436 : vector<8x128xf32>
    %438 = arith.mulf %429, %408 : vector<8x128xf32>
    %439 = arith.mulf %423, %431 : vector<8x128xf32>
    %440 = arith.addf %438, %439 : vector<8x128xf32>
    %441 = math.tanh %440 : vector<8x128xf32>
    %442 = arith.mulf %437, %441 : vector<8x128xf32>
    %c4_154 = arith.constant 4 : index
    %c0_155 = arith.constant 0 : index
    %c0_156 = arith.constant 0 : index
    %443 = vector.load %arg7[%c4_154, %c0_155, %c0_156] : memref<8x8x128xf32, #tpu.memory_space<vmem>>, vector<1x8x128xf32>
    %444 = vector.shape_cast %443 : vector<1x8x128xf32> to vector<8x128xf32>
    %445 = vector.shape_cast %442 : vector<8x128xf32> to vector<1x8x128xf32>
    tpu.vector_store %arg7[%c4_154, %c0_155, %c0_156], %445 {strides = array<i32>} : memref<8x8x128xf32, #tpu.memory_space<vmem>>, vector<1x8x128xf32>,
    %c5_157 = arith.constant 5 : index
    %c0_158 = arith.constant 0 : index
    %c0_159 = arith.constant 0 : index
    %446 = vector.load %arg8[%c5_157, %c0_158, %c0_159] : memref<8x8x512xf32, #tpu.memory_space<vmem>>, vector<1x8x512xf32>
    %447 = vector.shape_cast %446 : vector<1x8x512xf32> to vector<8x512xf32>
    %cst_160 = arith.constant dense<0.000000e+00> : vector<8x512xf32>
    %448 = tpu.matmul %442, %274, %cst_160 {dimension_numbers = #tpu.dot_dimension_numbers<[1], [0], [0], [1], [0, 0, 1, 1], [], []>} : vector<8x128xf32>, vector<128x512xf32>, vector<8x512xf32> -> vector<8x512xf32>
    %449 = arith.addf %447, %448 : vector<8x512xf32>
    %450 = vector.extract_strided_slice %449 {offsets = [0, 0], sizes = [8, 128], strides = [1, 1]} : vector<8x512xf32> to vector<8x128xf32>
    %451 = arith.negf %450 : vector<8x128xf32>
    %452 = math.exp %451 : vector<8x128xf32>
    %cst_161 = arith.constant 1.000000e+00 : f32
    %453 = vector.broadcast %cst_161 : f32 to vector<8x128xf32>
    %454 = arith.addf %453, %452 : vector<8x128xf32>
    %455 = arith.divf %453, %454 : vector<8x128xf32>
    %456 = vector.extract_strided_slice %449 {offsets = [0, 128], sizes = [8, 128], strides = [1, 1]} : vector<8x512xf32> to vector<8x128xf32>
    %457 = arith.negf %456 : vector<8x128xf32>
    %458 = math.exp %457 : vector<8x128xf32>
    %cst_162 = arith.constant 1.000000e+00 : f32
    %459 = vector.broadcast %cst_162 : f32 to vector<8x128xf32>
    %460 = arith.addf %459, %458 : vector<8x128xf32>
    %461 = arith.divf %459, %460 : vector<8x128xf32>
    %462 = vector.extract_strided_slice %449 {offsets = [0, 256], sizes = [8, 128], strides = [1, 1]} : vector<8x512xf32> to vector<8x128xf32>
    %463 = math.tanh %462 : vector<8x128xf32>
    %464 = vector.extract_strided_slice %449 {offsets = [0, 384], sizes = [8, 128], strides = [1, 1]} : vector<8x512xf32> to vector<8x128xf32>
    %465 = arith.negf %464 : vector<8x128xf32>
    %466 = math.exp %465 : vector<8x128xf32>
    %cst_163 = arith.constant 1.000000e+00 : f32
    %467 = vector.broadcast %cst_163 : f32 to vector<8x128xf32>
    %468 = arith.addf %467, %466 : vector<8x128xf32>
    %469 = arith.divf %467, %468 : vector<8x128xf32>
    %470 = arith.mulf %461, %440 : vector<8x128xf32>
    %471 = arith.mulf %455, %463 : vector<8x128xf32>
    %472 = arith.addf %470, %471 : vector<8x128xf32>
    %473 = math.tanh %472 : vector<8x128xf32>
    %474 = arith.mulf %469, %473 : vector<8x128xf32>
    %c5_164 = arith.constant 5 : index
    %c0_165 = arith.constant 0 : index
    %c0_166 = arith.constant 0 : index
    %475 = vector.load %arg7[%c5_164, %c0_165, %c0_166] : memref<8x8x128xf32, #tpu.memory_space<vmem>>, vector<1x8x128xf32>
    %476 = vector.shape_cast %475 : vector<1x8x128xf32> to vector<8x128xf32>
    %477 = vector.shape_cast %474 : vector<8x128xf32> to vector<1x8x128xf32>
    tpu.vector_store %arg7[%c5_164, %c0_165, %c0_166], %477 {strides = array<i32>} : memref<8x8x128xf32, #tpu.memory_space<vmem>>, vector<1x8x128xf32>,
    %c6_167 = arith.constant 6 : index
    %c0_168 = arith.constant 0 : index
    %c0_169 = arith.constant 0 : index
    %478 = vector.load %arg8[%c6_167, %c0_168, %c0_169] : memref<8x8x512xf32, #tpu.memory_space<vmem>>, vector<1x8x512xf32>
    %479 = vector.shape_cast %478 : vector<1x8x512xf32> to vector<8x512xf32>
    %cst_170 = arith.constant dense<0.000000e+00> : vector<8x512xf32>
    %480 = tpu.matmul %474, %274, %cst_170 {dimension_numbers = #tpu.dot_dimension_numbers<[1], [0], [0], [1], [0, 0, 1, 1], [], []>} : vector<8x128xf32>, vector<128x512xf32>, vector<8x512xf32> -> vector<8x512xf32>
    %481 = arith.addf %479, %480 : vector<8x512xf32>
    %482 = vector.extract_strided_slice %481 {offsets = [0, 0], sizes = [8, 128], strides = [1, 1]} : vector<8x512xf32> to vector<8x128xf32>
    %483 = arith.negf %482 : vector<8x128xf32>
    %484 = math.exp %483 : vector<8x128xf32>
    %cst_171 = arith.constant 1.000000e+00 : f32
    %485 = vector.broadcast %cst_171 : f32 to vector<8x128xf32>
    %486 = arith.addf %485, %484 : vector<8x128xf32>
    %487 = arith.divf %485, %486 : vector<8x128xf32>
    %488 = vector.extract_strided_slice %481 {offsets = [0, 128], sizes = [8, 128], strides = [1, 1]} : vector<8x512xf32> to vector<8x128xf32>
    %489 = arith.negf %488 : vector<8x128xf32>
    %490 = math.exp %489 : vector<8x128xf32>
    %cst_172 = arith.constant 1.000000e+00 : f32
    %491 = vector.broadcast %cst_172 : f32 to vector<8x128xf32>
    %492 = arith.addf %491, %490 : vector<8x128xf32>
    %493 = arith.divf %491, %492 : vector<8x128xf32>
    %494 = vector.extract_strided_slice %481 {offsets = [0, 256], sizes = [8, 128], strides = [1, 1]} : vector<8x512xf32> to vector<8x128xf32>
    %495 = math.tanh %494 : vector<8x128xf32>
    %496 = vector.extract_strided_slice %481 {offsets = [0, 384], sizes = [8, 128], strides = [1, 1]} : vector<8x512xf32> to vector<8x128xf32>
    %497 = arith.negf %496 : vector<8x128xf32>
    %498 = math.exp %497 : vector<8x128xf32>
    %cst_173 = arith.constant 1.000000e+00 : f32
    %499 = vector.broadcast %cst_173 : f32 to vector<8x128xf32>
    %500 = arith.addf %499, %498 : vector<8x128xf32>
    %501 = arith.divf %499, %500 : vector<8x128xf32>
    %502 = arith.mulf %493, %472 : vector<8x128xf32>
    %503 = arith.mulf %487, %495 : vector<8x128xf32>
    %504 = arith.addf %502, %503 : vector<8x128xf32>
    %505 = math.tanh %504 : vector<8x128xf32>
    %506 = arith.mulf %501, %505 : vector<8x128xf32>
    %c6_174 = arith.constant 6 : index
    %c0_175 = arith.constant 0 : index
    %c0_176 = arith.constant 0 : index
    %507 = vector.load %arg7[%c6_174, %c0_175, %c0_176] : memref<8x8x128xf32, #tpu.memory_space<vmem>>, vector<1x8x128xf32>
    %508 = vector.shape_cast %507 : vector<1x8x128xf32> to vector<8x128xf32>
    %509 = vector.shape_cast %506 : vector<8x128xf32> to vector<1x8x128xf32>
    tpu.vector_store %arg7[%c6_174, %c0_175, %c0_176], %509 {strides = array<i32>} : memref<8x8x128xf32, #tpu.memory_space<vmem>>, vector<1x8x128xf32>,
    %c7_177 = arith.constant 7 : index
    %c0_178 = arith.constant 0 : index
    %c0_179 = arith.constant 0 : index
    %510 = vector.load %arg8[%c7_177, %c0_178, %c0_179] : memref<8x8x512xf32, #tpu.memory_space<vmem>>, vector<1x8x512xf32>
    %511 = vector.shape_cast %510 : vector<1x8x512xf32> to vector<8x512xf32>
    %cst_180 = arith.constant dense<0.000000e+00> : vector<8x512xf32>
    %512 = tpu.matmul %506, %274, %cst_180 {dimension_numbers = #tpu.dot_dimension_numbers<[1], [0], [0], [1], [0, 0, 1, 1], [], []>} : vector<8x128xf32>, vector<128x512xf32>, vector<8x512xf32> -> vector<8x512xf32>
    %513 = arith.addf %511, %512 : vector<8x512xf32>
    %514 = vector.extract_strided_slice %513 {offsets = [0, 0], sizes = [8, 128], strides = [1, 1]} : vector<8x512xf32> to vector<8x128xf32>
    %515 = arith.negf %514 : vector<8x128xf32>
    %516 = math.exp %515 : vector<8x128xf32>
    %cst_181 = arith.constant 1.000000e+00 : f32
    %517 = vector.broadcast %cst_181 : f32 to vector<8x128xf32>
    %518 = arith.addf %517, %516 : vector<8x128xf32>
    %519 = arith.divf %517, %518 : vector<8x128xf32>
    %520 = vector.extract_strided_slice %513 {offsets = [0, 128], sizes = [8, 128], strides = [1, 1]} : vector<8x512xf32> to vector<8x128xf32>
    %521 = arith.negf %520 : vector<8x128xf32>
    %522 = math.exp %521 : vector<8x128xf32>
    %cst_182 = arith.constant 1.000000e+00 : f32
    %523 = vector.broadcast %cst_182 : f32 to vector<8x128xf32>
    %524 = arith.addf %523, %522 : vector<8x128xf32>
    %525 = arith.divf %523, %524 : vector<8x128xf32>
    %526 = vector.extract_strided_slice %513 {offsets = [0, 256], sizes = [8, 128], strides = [1, 1]} : vector<8x512xf32> to vector<8x128xf32>
    %527 = math.tanh %526 : vector<8x128xf32>
    %528 = vector.extract_strided_slice %513 {offsets = [0, 384], sizes = [8, 128], strides = [1, 1]} : vector<8x512xf32> to vector<8x128xf32>
    %529 = arith.negf %528 : vector<8x128xf32>
    %530 = math.exp %529 : vector<8x128xf32>
    %cst_183 = arith.constant 1.000000e+00 : f32
    %531 = vector.broadcast %cst_183 : f32 to vector<8x128xf32>
    %532 = arith.addf %531, %530 : vector<8x128xf32>
    %533 = arith.divf %531, %532 : vector<8x128xf32>
    %534 = arith.mulf %525, %504 : vector<8x128xf32>
    %535 = arith.mulf %519, %527 : vector<8x128xf32>
    %536 = arith.addf %534, %535 : vector<8x128xf32>
    %537 = math.tanh %536 : vector<8x128xf32>
    %538 = arith.mulf %533, %537 : vector<8x128xf32>
    %c7_184 = arith.constant 7 : index
    %c0_185 = arith.constant 0 : index
    %c0_186 = arith.constant 0 : index
    %539 = vector.load %arg7[%c7_184, %c0_185, %c0_186] : memref<8x8x128xf32, #tpu.memory_space<vmem>>, vector<1x8x128xf32>
    %540 = vector.shape_cast %539 : vector<1x8x128xf32> to vector<8x128xf32>
    %541 = vector.shape_cast %538 : vector<8x128xf32> to vector<1x8x128xf32>
    tpu.vector_store %arg7[%c7_184, %c0_185, %c0_186], %541 {strides = array<i32>} : memref<8x8x128xf32, #tpu.memory_space<vmem>>, vector<1x8x128xf32>,
    %c0_187 = arith.constant 0 : index
    %c0_188 = arith.constant 0 : index
    %c0_189 = arith.constant 0 : index
    %542 = vector.load %arg7[%c0_187, %c0_188, %c0_189] : memref<8x8x128xf32, #tpu.memory_space<vmem>>, vector<8x8x128xf32>
    %543 = vector.shape_cast %542 : vector<8x8x128xf32> to vector<64x128xf32>
    %544 = math.tanh %543 : vector<64x128xf32>
    %c0_190 = arith.constant 0 : index
    %c0_191 = arith.constant 0 : index
    %545 = vector.load %arg4[%c0_190, %c0_191] : memref<128x128xf32, #tpu.memory_space<vmem>>, vector<128x128xf32>
    %cst_192 = arith.constant dense<0.000000e+00> : vector<64x128xf32>
    %546 = tpu.matmul %544, %545, %cst_192 {dimension_numbers = #tpu.dot_dimension_numbers<[1], [0], [0], [1], [0, 0, 1, 1], [], []>} : vector<64x128xf32>, vector<128x128xf32>, vector<64x128xf32> -> vector<64x128xf32>
    %c0_193 = arith.constant 0 : index
    %c0_194 = arith.constant 0 : index
    %547 = vector.load %arg5[%c0_193, %c0_194] : memref<1x128xf32, #tpu.memory_space<vmem>>, vector<1x128xf32>
    %548 = vector.broadcast %547 : vector<1x128xf32> to vector<64x128xf32>
    %549 = arith.addf %546, %548 : vector<64x128xf32>
    %550 = vector.shape_cast %549 : vector<64x128xf32> to vector<8x8x128xf32>
    %c0_195 = arith.constant 0 : index
    %c0_196 = arith.constant 0 : index
    %c0_197 = arith.constant 0 : index
    %551 = vector.load %arg6[%c0_195, %c0_196, %c0_197] : memref<8x8x128xf32, #tpu.memory_space<vmem>>, vector<8x8x128xf32>
    tpu.vector_store %arg6[%c0_195, %c0_196, %c0_197], %550 {strides = array<i32>} : memref<8x8x128xf32, #tpu.memory_space<vmem>>, vector<8x8x128xf32>,
    return
  }
}

</mosaic_0001>

<bundles_post_ra>
// kernel: expert_lstm_forward.1
= control target key start
LH: loop header
LB: loop body
LE: loop exit
PB: predicated region body
PF: predicated region fallthrough
CT: control target
= control target key end

     0   :  { %11 = vsyncpa [#allocation5], 0  ;;  %s6786_s0 = inlined_call_operand.vmem [shape: f32[8,8,128], index: 0, kind: input, shape index: {}]   ;;  %s6787_s1 = inlined_call_operand.hbm [shape: f32[2,128,512], index: 1, kind: input, shape index: {}]   ;;  %s6788_s2 = inlined_call_operand.hbm [shape: f32[2,128,512], index: 2, kind: input, shape index: {}]   ;;  %s6789_s3 = inlined_call_operand.vmem [shape: f32[2,1,512], index: 3, kind: input, shape index: {}]   ;;  %s6790_s4 = inlined_call_operand.hbm [shape: f32[128,128], index: 4, kind: input, shape index: {}]   ;;  %s6791_s5 = inlined_call_operand.vmem [shape: f32[1,128], index: 5, kind: input, shape index: {}]   ;;  %s6792_s6 = inlined_call_operand.vmem [shape: f32[8,8,128], index: 6, kind: output, shape index: {}]  }
   0x1   :  { %12 = vsyncpa [#allocation7], 0  ;;  %s5651_s21 = smov [#allocation6]   ;;  %s5652_s23 = smov [#allocation4]  }
   0x2   :  { %s32_s22 = sshll.u32 %s5651_s21, 4  ;;  %s20_s24 = sshll.u32 %s5652_s23, 4  ;;  %s33_s22 = int_to_ptr.vmem [resolvable:$true] %s32_s22  ;;  %s5694_s24 = int_to_ptr.vmem [resolvable:$true] %s20_s24 }
   0x3   :  { %s5581_s27 = scalar_lea.hbm %s6788_s2, 16384 }
   0x4   :  { %p5582_p0 = scmp.ne.s32.totalorder %s6788_s2, %s5581_s27  ;;  %p5585_p1 = scmp.lt.u32.totalorder %s5581_s27, %s6788_s2 }
   0x6   :  { %p5587_p2 = pnand %p5585_p1, %p5582_p0 }
   0x8   :  { %5590 = shalt.err (!%p5587_p2)
}
   0x9   :  { %s5591_s8 = scalar_lea.vmem %s33_s22, 16384  ;;  %p5596_p4 = scmp.lt.s32.totalorder %s33_s22, %s33_s22 }
   0xa   :  { %p5592_p3 = scmp.ne.s32.totalorder %s33_s22, %s5591_s8  ;;  %p5597_p5 = scmp.lt.s32.totalorder %s5591_s8, %s5591_s8 }
   0xc   :  { %p5598_p6 = por %p5597_p5, %p5596_p4 }
   0xe   :  { %p5599_p7 = pnand %p5598_p6, %p5592_p3 }
  0x10   :  { %5602 = shalt.err (!%p5599_p7)
}
  0x11   :  { %s5653_s9 = smov 512   ;;  %s5654_s10 = smov 32  }
  0x12   :  { %38 = dma.hbm_to_vmem [thread:$0]  %s6788_s2, 16384, %s33_s22, [#allocation7], %s5653_s9, %s5653_s9, %s5654_s10  }
  0x13   :  { %s5603_s15 = scalar_lea.hbm %s6787_s1, 16384 }
  0x14   :  { %p5604_p8 = scmp.ne.s32.totalorder %s6787_s1, %s5603_s15  ;;  %p5607_p9 = scmp.lt.u32.totalorder %s5603_s15, %s6787_s1 }
  0x16   :  { %p5609_p10 = pnand %p5607_p9, %p5604_p8 }
  0x18   :  { %5612 = shalt.err (!%p5609_p10)
}
  0x19   :  { %s5613_s20 = scalar_lea.vmem %s5694_s24, 16384  ;;  %p5618_p12 = scmp.lt.s32.totalorder %s5694_s24, %s5694_s24 }
  0x1a   :  { %p5614_p11 = scmp.ne.s32.totalorder %s5694_s24, %s5613_s20  ;;  %p5619_p13 = scmp.lt.s32.totalorder %s5613_s20, %s5613_s20 }
  0x1c   :  { %p5620_p0 = por %p5619_p13, %p5618_p12 }
  0x1e   :  { %p5621_p1 = pnand %p5620_p0, %p5614_p11 }
  0x20   :  { %5624 = shalt.err (!%p5621_p1)
}
  0x21   :  { %26 = dma.hbm_to_vmem [thread:$0]  %s6787_s1, 16384, %s5694_s24, [#allocation5], %s5653_s9, %s5653_s9, %s5654_s10  }
  0x22   :  { %s5655_s22 = smov [#allocation8]   ;;  %s5625_s27 = scalar_lea.hbm %s6790_s4, 2048 }
  0x23   :  { %s46_s23 = sshll.u32 %s5655_s22, 4  ;;  %p5626_p2 = scmp.ne.s32.totalorder %s6790_s4, %s5625_s27  ;;  %s47_s23 = int_to_ptr.vmem [resolvable:$true] %s46_s23 }
  0x24   :  { %p5629_p3 = scmp.lt.u32.totalorder %s5625_s27, %s6790_s4 }
  0x26   :  { %p5631_p4 = pnand %p5629_p3, %p5626_p2 }
  0x28   :  { %5634 = shalt.err (!%p5631_p4)
}
  0x29   :  { %s5635_s8 = scalar_lea.vmem %s47_s23, 2048  ;;  %p5640_p6 = scmp.lt.s32.totalorder %s47_s23, %s47_s23 }
  0x2a   :  { %p5636_p5 = scmp.ne.s32.totalorder %s47_s23, %s5635_s8  ;;  %p5641_p7 = scmp.lt.s32.totalorder %s5635_s8, %s5635_s8 }
  0x2c   :  { %p5642_p8 = por %p5641_p7, %p5640_p6 }
  0x2e   :  { %p5643_p9 = pnand %p5642_p8, %p5636_p5 }
  0x30   :  { %5646 = shalt.err (!%p5643_p9)
}
  0x31   :  { %s5656_s1 = smov 128   ;;  %s5657_s24 = smov 8  }
  0x32   :  { %52 = dma.hbm_to_vmem [thread:$0]  %s6790_s4, 2048, %s47_s23, [#allocation7], %s5656_s1, %s5656_s1, %s5657_s24  }
  0x33   :  { %5647 = dma.done.wait [#allocation5], 16384  }
  0x34   :  { %5648 = vsyncadd [#allocation5], 4294950912 }
  0x35   :  { %5649 = dma.done.wait [#allocation7], 18432  }
  0x36   :  { %5650 = vsyncadd [#allocation7], 4294948864  ;;  %v6796_v0 = vmov 0.0   ;;  %v65_v1 = vld [vmem:[#allocation4 + $0x8] sm:$0xff]  ;;  %v64_v3 = vld [vmem:[#allocation4] sm:$0xff] }
  0x37   :  { %286 = vmatprep.mubr.f32.mxu1 %v6796_v0  ;;  %548 = vmatprep.mubr.f32.mxu0 %v6796_v0  ;;  %v69_v2 = vld [vmem:[#allocation4 + $0x28] sm:$0xff]  ;;  %v68_v5 = vld [vmem:[#allocation4 + $0x20] sm:$0xff] }
  0x38   :  { %v3989_v4 = vpack.c.bf16 %v69_v2, %v65_v1  ;;  %v129_v6 = vld [vmem:[#allocation6 + $0x8] sm:$0xff]  ;;  %v3991_v8 = vpack.c.bf16 %v68_v5, %v64_v3  ;;  %v128_v10 = vld [vmem:[#allocation6] sm:$0xff] }
  0x39   :  { %v133_v7 = vld [vmem:[#allocation6 + $0x28] sm:$0xff]  ;;  %v132_v11 = vld [vmem:[#allocation6 + $0x20] sm:$0xff] }
  0x3a   :  { %v5739_v9 = vpack.c.bf16 %v133_v7, %v129_v6  ;;  %v73_v12 = vld [vmem:[#allocation4 + $0x48] sm:$0xff]  ;;  %3990 = vmatprep.subr.bf16.mxu1 %v3989_v4  ;;  %v5741_v13 = vpack.c.bf16 %v132_v11, %v128_v10  ;;  %v72_v15 = vld [vmem:[#allocation4 + $0x40] sm:$0xff] }
  0x3b   :  { %v77_v14 = vld [vmem:[#allocation4 + $0x68] sm:$0xff]  ;;  %v76_v16 = vld [vmem:[#allocation4 + $0x60] sm:$0xff]  ;;  %3992 = vmatpush1.bf16.msra.mxu1 %v3991_v8 }
  0x3c   :  { %4054 = vmatprep.subr.bf16.mxu0 %v5739_v9  ;;  %v3993_v17 = vpack.c.bf16 %v77_v14, %v73_v12  ;;  %v3995_v18 = vpack.c.bf16 %v76_v16, %v72_v15  ;;  %v137_v19 = vld [vmem:[#allocation6 + $0x48] sm:$0xff]  ;;  %v136_v21 = vld [vmem:[#allocation6 + $0x40] sm:$0xff] }
  0x3d   :  { %v141_v20 = vld [vmem:[#allocation6 + $0x68] sm:$0xff]  ;;  %4056 = vmatpush1.bf16.msra.mxu0 %v5741_v13  ;;  %v140_v23 = vld [vmem:[#allocation6 + $0x60] sm:$0xff] }
  0x3e   :  { %v5745_v22 = vpack.c.bf16 %v141_v20, %v137_v19  ;;  %v81_v24 = vld [vmem:[#allocation4 + $0x88] sm:$0xff]  ;;  %3994 = vmatprep.subr.bf16.mxu1 %v3993_v17  ;;  %v5747_v26 = vpack.c.bf16 %v140_v23, %v136_v21  ;;  %v80_v28 = vld [vmem:[#allocation4 + $0x80] sm:$0xff] }
  0x3f   :  { %v85_v25 = vld [vmem:[#allocation4 + $0xa8] sm:$0xff]  ;;  %v84_v29 = vld [vmem:[#allocation4 + $0xa0] sm:$0xff]  ;;  %3996 = vmatpush1.bf16.msra.mxu1 %v3995_v18 }
  0x40   :  { %v3997_v27 = vpack.c.bf16 %v85_v25, %v81_v24  ;;  %v145_v30 = vld [vmem:[#allocation6 + $0x88] sm:$0xff]  ;;  %4058 = vmatprep.subr.bf16.mxu0 %v5745_v22  ;;  %v144_v32 = vld [vmem:[#allocation6 + $0x80] sm:$0xff]  ;;  %v3999_v34 = vpack.c.bf16 %v84_v29, %v80_v28 }
  0x41   :  { %v149_v31 = vld [vmem:[#allocation6 + $0xa8] sm:$0xff]  ;;  %v148_v33 = vld [vmem:[#allocation6 + $0xa0] sm:$0xff]  ;;  %4060 = vmatpush1.bf16.msra.mxu0 %v5747_v26 }
  0x42   :  { %v5750_v35 = vpack.c.bf16 %v149_v31, %v145_v30  ;;  %v89_v36 = vld [vmem:[#allocation4 + $0xc8] sm:$0xff]  ;;  %v88_v38 = vld [vmem:[#allocation4 + $0xc0] sm:$0xff]  ;;  %3998 = vmatprep.subr.bf16.mxu1 %v3997_v27  ;;  %v5753_v39 = vpack.c.bf16 %v148_v33, %v144_v32 }
  0x43   :  { %v93_v37 = vld [vmem:[#allocation4 + $0xe8] sm:$0xff]  ;;  %v92_v41 = vld [vmem:[#allocation4 + $0xe0] sm:$0xff]  ;;  %4000 = vmatpush1.bf16.msra.mxu1 %v3999_v34 }
  0x44   :  { %v4001_v40 = vpack.c.bf16 %v93_v37, %v89_v36  ;;  %v153_v42 = vld [vmem:[#allocation6 + $0xc8] sm:$0xff]  ;;  %4062 = vmatprep.subr.bf16.mxu0 %v5750_v35  ;;  %v152_v45 = vld [vmem:[#allocation6 + $0xc0] sm:$0xff]  ;;  %v4003_v49 = vpack.c.bf16 %v92_v41, %v88_v38  ;;  %v67_v37 = vld [vmem:[#allocation4 + $0x18] sm:$0xff] }
  0x45   :  { %v157_v43 = vld [vmem:[#allocation6 + $0xe8] sm:$0xff]  ;;  %v156_v46 = vld [vmem:[#allocation6 + $0xe0] sm:$0xff]  ;;  %4064 = vmatpush1.bf16.msra.mxu0 %v5753_v39  ;;  %v71_v38 = vld [vmem:[#allocation4 + $0x38] sm:$0xff] }
  0x46   :  { %v5756_v44 = vpack.c.bf16 %v157_v43, %v153_v42  ;;  %v97_v47 = vld [vmem:[#allocation4 + $0x108] sm:$0xff]  ;;  %4002 = vmatprep.subr.bf16.mxu1 %v4001_v40  ;;  %v5759_v52 = vpack.c.bf16 %v156_v46, %v152_v45  ;;  %v96_v54 = vld [vmem:[#allocation4 + $0x100] sm:$0xff]  ;;  %v4021_v42 = vpack.c.bf16 %v71_v38, %v67_v37  ;;  %v66_v43 = vld [vmem:[#allocation4 + $0x10] sm:$0xff] }
  0x47   :  { %v101_v48 = vld [vmem:[#allocation4 + $0x128] sm:$0xff]  ;;  %v100_v55 = vld [vmem:[#allocation4 + $0x120] sm:$0xff]  ;;  %4004 = vmatpush1.bf16.msra.mxu1 %v4003_v49  ;;  %v70_v45 = vld [vmem:[#allocation4 + $0x30] sm:$0xff] }
  0x48   :  { %v161_v50 = vld [vmem:[#allocation6 + $0x108] sm:$0xff]  ;;  %v4005_v53 = vpack.c.bf16 %v101_v48, %v97_v47  ;;  %v160_v56 = vld [vmem:[#allocation6 + $0x100] sm:$0xff]  ;;  %4066 = vmatprep.subr.bf16.mxu0 %v5756_v44  ;;  %v4007_v63 = vpack.c.bf16 %v100_v55, %v96_v54  ;;  %v75_v46 = vld [vmem:[#allocation4 + $0x58] sm:$0xff]  ;;  %v4023_v49 = vpack.c.bf16 %v70_v45, %v66_v43 }
  0x49   :  { %v165_v51 = vld [vmem:[#allocation6 + $0x128] sm:$0xff]  ;;  %v164_v58 = vld [vmem:[#allocation6 + $0x120] sm:$0xff]  ;;  %4068 = vmatpush1.bf16.msra.mxu0 %v5759_v52  ;;  %v79_v47 = vld [vmem:[#allocation4 + $0x78] sm:$0xff] }
  0x4a   :  { %v5762_v57 = vpack.c.bf16 %v165_v51, %v161_v50  ;;  %v105_v59 = vld [vmem:[#allocation4 + $0x148] sm:$0xff]  ;;  %4006 = vmatprep.subr.bf16.mxu1 %v4005_v53  ;;  %v5765_v1 = vpack.c.bf16 %v164_v58, %v160_v56  ;;  %v104_v3 = vld [vmem:[#allocation4 + $0x140] sm:$0xff]  ;;  %v4025_v50 = vpack.c.bf16 %v79_v47, %v75_v46  ;;  %v74_v51 = vld [vmem:[#allocation4 + $0x50] sm:$0xff] }
  0x4b   :  { %v109_v60 = vld [vmem:[#allocation4 + $0x168] sm:$0xff]  ;;  %v108_v4 = vld [vmem:[#allocation4 + $0x160] sm:$0xff]  ;;  %4008 = vmatpush1.bf16.msra.mxu1 %v4007_v63  ;;  %v78_v53 = vld [vmem:[#allocation4 + $0x70] sm:$0xff] }
  0x4c   :  { %v169_v61 = vld [vmem:[#allocation6 + $0x148] sm:$0xff]  ;;  %v4009_v2 = vpack.c.bf16 %v109_v60, %v105_v59  ;;  %v168_v5 = vld [vmem:[#allocation6 + $0x140] sm:$0xff]  ;;  %4070 = vmatprep.subr.bf16.mxu0 %v5762_v57  ;;  %v4011_v14 = vpack.c.bf16 %v108_v4, %v104_v3  ;;  %v83_v54 = vld [vmem:[#allocation4 + $0x98] sm:$0xff]  ;;  %v4027_v58 = vpack.c.bf16 %v78_v53, %v74_v51 }
  0x4d   :  { %v173_v62 = vld [vmem:[#allocation6 + $0x168] sm:$0xff]  ;;  %v172_v7 = vld [vmem:[#allocation6 + $0x160] sm:$0xff]  ;;  %4072 = vmatpush1.bf16.msra.mxu0 %v5765_v1  ;;  %v87_v55 = vld [vmem:[#allocation4 + $0xb8] sm:$0xff] }
  0x4e   :  { %v5768_v6 = vpack.c.bf16 %v173_v62, %v169_v61  ;;  %v113_v8 = vld [vmem:[#allocation4 + $0x188] sm:$0xff]  ;;  %4010 = vmatprep.subr.bf16.mxu1 %v4009_v2  ;;  %v5771_v15 = vpack.c.bf16 %v172_v7, %v168_v5  ;;  %v112_v17 = vld [vmem:[#allocation4 + $0x180] sm:$0xff]  ;;  %v4029_v59 = vpack.c.bf16 %v87_v55, %v83_v54  ;;  %v82_v60 = vld [vmem:[#allocation4 + $0x90] sm:$0xff] }
  0x4f   :  { %v117_v10 = vld [vmem:[#allocation4 + $0x1a8] sm:$0xff]  ;;  %v116_v18 = vld [vmem:[#allocation4 + $0x1a0] sm:$0xff]  ;;  %4012 = vmatpush1.bf16.msra.mxu1 %v4011_v14  ;;  %v86_v61 = vld [vmem:[#allocation4 + $0xb0] sm:$0xff] }
  0x50   :  { %v177_v11 = vld [vmem:[#allocation6 + $0x188] sm:$0xff]  ;;  %v4013_v16 = vpack.c.bf16 %v117_v10, %v113_v8  ;;  %v176_v19 = vld [vmem:[#allocation6 + $0x180] sm:$0xff]  ;;  %4074 = vmatprep.subr.bf16.mxu0 %v5768_v6  ;;  %v4015_v28 = vpack.c.bf16 %v116_v18, %v112_v17  ;;  %v91_v62 = vld [vmem:[#allocation4 + $0xd8] sm:$0xff]  ;;  %v4031_v3 = vpack.c.bf16 %v86_v61, %v82_v60 }
  0x51   :  { %v181_v12 = vld [vmem:[#allocation6 + $0x1a8] sm:$0xff]  ;;  %v180_v21 = vld [vmem:[#allocation6 + $0x1a0] sm:$0xff]  ;;  %4076 = vmatpush1.bf16.msra.mxu0 %v5771_v15  ;;  %v95_v63 = vld [vmem:[#allocation4 + $0xf8] sm:$0xff] }
  0x52   :  { %v5774_v20 = vpack.c.bf16 %v181_v12, %v177_v11  ;;  %v121_v23 = vld [vmem:[#allocation4 + $0x1c8] sm:$0xff]  ;;  %4014 = vmatprep.subr.bf16.mxu1 %v4013_v16  ;;  %v5777_v29 = vpack.c.bf16 %v180_v21, %v176_v19  ;;  %v120_v31 = vld [vmem:[#allocation4 + $0x1c0] sm:$0xff]  ;;  %v5809_v2 = vld [vmem:[%s6786_s0 + $0x10] sm:$0xff]  ;;  %v4033_v4 = vpack.c.bf16 %v95_v63, %v91_v62 }
  0x53   :  { %v125_v24 = vld [vmem:[#allocation4 + $0x1e8] sm:$0xff]  ;;  %v124_v32 = vld [vmem:[#allocation4 + $0x1e0] sm:$0xff]  ;;  %4016 = vmatpush1.bf16.msra.mxu1 %v4015_v28  ;;  %v90_v5 = vld [vmem:[#allocation4 + $0xd0] sm:$0xff] }
  0x54   :  { %v185_v25 = vld [vmem:[#allocation6 + $0x1c8] sm:$0xff]  ;;  %v4017_v30 = vpack.c.bf16 %v125_v24, %v121_v23  ;;  %v184_v33 = vld [vmem:[#allocation6 + $0x1c0] sm:$0xff]  ;;  %4078 = vmatprep.subr.bf16.mxu0 %v5774_v20  ;;  %v4019_v40 = vpack.c.bf16 %v124_v32, %v120_v31  ;;  %v94_v7 = vld [vmem:[#allocation4 + $0xf0] sm:$0xff] }
  0x55   :  { %v189_v27 = vld [vmem:[#allocation6 + $0x1e8] sm:$0xff]  ;;  %v188_v36 = vld [vmem:[#allocation6 + $0x1e0] sm:$0xff]  ;;  %4080 = vmatpush1.bf16.msra.mxu0 %v5777_v29  ;;  %v99_v8 = vld [vmem:[#allocation4 + $0x118] sm:$0xff]  ;;  %v4035_v12 = vpack.c.bf16 %v94_v7, %v90_v5 }
  0x56   :  { %v5780_v34 = vpack.c.bf16 %v189_v27, %v185_v25  ;;  %4018 = vmatprep.subr.bf16.mxu1 %v4017_v30  ;;  %v5783_v41 = vpack.c.bf16 %v188_v36, %v184_v33  ;;  %v5789_v48 = vld [vmem:[%s6786_s0] sm:$0xff]  ;;  %v5798_v56 = vld [vmem:[%s6786_s0 + $0x8] sm:$0xff]  ;;  %v103_v10 = vld [vmem:[#allocation4 + $0x138] sm:$0xff] }
  0x57   :  { %4020 = vmatpush1.bf16.msra.mxu1 %v4019_v40  ;;  %v5818_v11 = vld [vmem:[%s6786_s0 + $0x18] sm:$0xff]  ;;  %v4037_v14 = vpack.c.bf16 %v103_v10, %v99_v8  ;;  %v98_v16 = vld [vmem:[#allocation4 + $0x110] sm:$0xff]  ;;  %v5827_v21 = vld [vmem:[%s6786_s0 + $0x20] sm:$0xff] }
  0x58   :  { %4082 = vmatprep.subr.bf16.mxu0 %v5780_v34  ;;  %4022 = vmatprep.subr.bf16.mxu1 %v4021_v42  ;;  %v102_v17 = vld [vmem:[#allocation4 + $0x130] sm:$0xff]  ;;  %v107_v18 = vld [vmem:[#allocation4 + $0x158] sm:$0xff]  ;;  %v5836_v31 = vld [vmem:[%s6786_s0 + $0x28] sm:$0xff] }
  0x59   :  { %4084 = vmatpush1.bf16.msra.mxu0 %v5783_v41  ;;  %v111_v19 = vld [vmem:[#allocation4 + $0x178] sm:$0xff]  ;;  %v4039_v23 = vpack.c.bf16 %v102_v17, %v98_v16  ;;  %v106_v25 = vld [vmem:[#allocation4 + $0x150] sm:$0xff] }
  0x5a   :  { %4118 = vmatprep.subr.bf16.mxu0 %v5739_v9  ;;  %287 = vmatmul.mubr.f32.vlgmr.msra.gmra.mrb[0].mxu1 %v5789_v48  ;;  %v4041_v24 = vpack.c.bf16 %v111_v19, %v107_v18  ;;  %v110_v27 = vld [vmem:[#allocation4 + $0x170] sm:$0xff]  ;;  %v115_v28 = vld [vmem:[#allocation4 + $0x198] sm:$0xff] }
  0x5b   :  { %4024 = vmatpush1.bf16.msra.mxu1 %v4023_v49  ;;  %292 = vmatprep.mubr.f32.mxu1 %v6796_v0  ;;  %v119_v30 = vld [vmem:[#allocation4 + $0x1b8] sm:$0xff]  ;;  %v4043_v32 = vpack.c.bf16 %v110_v27, %v106_v25  ;;  %v114_v36 = vld [vmem:[#allocation4 + $0x190] sm:$0xff] }
  0x5c   :  { %549 = vmatmul.mubr.f32.vlgmr.msra.gmra.mrb[0].mxu0 %v6796_v0  ;;  %4026 = vmatprep.subr.bf16.mxu1 %v4025_v50  ;;  %v4045_v33 = vpack.c.bf16 %v119_v30, %v115_v28  ;;  %v118_v37 = vld [vmem:[#allocation4 + $0x1b0] sm:$0xff]  ;;  %v123_v38 = vld [vmem:[#allocation4 + $0x1d8] sm:$0xff] }
  0x5d   :  { %4120 = vmatpush1.bf16.msra.mxu0 %v5741_v13  ;;  %724 = vmatprep.mubr.f32.mxu0 %v6796_v0  ;;  %v127_v40 = vld [vmem:[#allocation4 + $0x1f8] sm:$0xff]  ;;  %v5845_v42 = vld [vmem:[%s6786_s0 + $0x30] sm:$0xff]  ;;  %v4047_v43 = vpack.c.bf16 %v118_v37, %v114_v36 }
  0x5e   :  { %293 = vmatmul.mubr.f32.gmra.mrb[2].mxu1 %v5798_v56  ;;  %4122 = vmatprep.subr.bf16.mxu0 %v5745_v22  ;;  %v4049_v45 = vpack.c.bf16 %v127_v40, %v123_v38  ;;  %v122_v46 = vld [vmem:[#allocation4 + $0x1d0] sm:$0xff]  ;;  %v131_v49 = vld [vmem:[#allocation6 + $0x18] sm:$0xff] }
  0x5f   :  { %4028 = vmatpush1.bf16.msra.mxu1 %v4027_v58  ;;  %298 = vmatprep.mubr.f32.mxu1 %v6796_v0  ;;  %v126_v47 = vld [vmem:[#allocation4 + $0x1f0] sm:$0xff]  ;;  %v135_v50 = vld [vmem:[#allocation6 + $0x38] sm:$0xff] }
  0x60   :  { %4030 = vmatprep.subr.bf16.mxu1 %v4029_v59  ;;  %v5854_v51 = vld [vmem:[%s6786_s0 + $0x38] sm:$0xff]  ;;  %v4051_v53 = vpack.c.bf16 %v126_v47, %v122_v46  ;;  %v5856_v54 = vpack.c.bf16 %v135_v50, %v131_v49  ;;  %v130_v55 = vld [vmem:[#allocation6 + $0x10] sm:$0xff] }
  0x61   :  { %4124 = vmatpush1.bf16.msra.mxu0 %v5747_v26  ;;  %v134_v58 = vld [vmem:[#allocation6 + $0x30] sm:$0xff]  ;;  %v139_v59 = vld [vmem:[#allocation6 + $0x58] sm:$0xff] }
  0x62   :  { %299 = vmatmul.mubr.f32.gmra.mrb[4].mxu1 %v5809_v2  ;;  %4126 = vmatprep.subr.bf16.mxu0 %v5750_v35  ;;  %v143_v60 = vld [vmem:[#allocation6 + $0x78] sm:$0xff]  ;;  %v5862_v61 = vpack.c.bf16 %v134_v58, %v130_v55  ;;  %v138_v63 = vld [vmem:[#allocation6 + $0x50] sm:$0xff] }
  0x63   :  { %4032 = vmatpush1.bf16.msra.mxu1 %v4031_v3  ;;  %304 = vmatprep.mubr.f32.mxu1 %v6796_v0  ;;  %v5865_v62 = vpack.c.bf16 %v143_v60, %v139_v59  ;;  %v142_v3 = vld [vmem:[#allocation6 + $0x70] sm:$0xff]  ;;  %v151_v5 = vld [vmem:[#allocation6 + $0xb8] sm:$0xff]  ;;  %v192_v59 = vld [vmem:[%s6789_s3] sm:$0xf] }
  0x64   :  { %4034 = vmatprep.subr.bf16.mxu1 %v4033_v4  ;;  %v147_v4 = vld [vmem:[#allocation6 + $0x98] sm:$0xff]  ;;  %v5872_v7 = vpack.c.bf16 %v142_v3, %v138_v63  ;;  %v146_v10 = vld [vmem:[#allocation6 + $0x90] sm:$0xff] }
  0x65   :  { %4128 = vmatpush1.bf16.msra.mxu0 %v5753_v39  ;;  %v5875_v8 = vpack.c.bf16 %v151_v5, %v147_v4  ;;  %v159_v16 = vld [vmem:[#allocation6 + $0xf8] sm:$0xff]  ;;  %v154_v18 = vld [vmem:[#allocation6 + $0xd0] sm:$0xff] }
  0x66   :  { %305 = vmatmul.mubr.f32.gmra.mrb[6].mxu1 %v5818_v11  ;;  %4130 = vmatprep.subr.bf16.mxu0 %v5756_v44  ;;  %v158_v19 = vld [vmem:[#allocation6 + $0xf0] sm:$0xff]  ;;  %v171_v30 = vld [vmem:[#allocation6 + $0x158] sm:$0xff] }
  0x67   :  { %4036 = vmatpush1.bf16.msra.mxu1 %v4035_v12  ;;  %310 = vmatprep.mubr.f32.mxu1 %v6796_v0  ;;  %v150_v12 = vld [vmem:[#allocation6 + $0xb0] sm:$0xff]  ;;  %v179_v38 = vld [vmem:[#allocation6 + $0x198] sm:$0xff] }
  0x68   :  { %4038 = vmatprep.subr.bf16.mxu1 %v4037_v14  ;;  %v155_v14 = vld [vmem:[#allocation6 + $0xd8] sm:$0xff]  ;;  %v162_v27 = vld [vmem:[#allocation6 + $0x110] sm:$0xff] }
  0x69   :  { %4132 = vmatpush1.bf16.msra.mxu0 %v5759_v52  ;;  %v5883_v17 = vpack.c.bf16 %v159_v16, %v155_v14  ;;  %v166_v28 = vld [vmem:[#allocation6 + $0x130] sm:$0xff]  ;;  %v183_v40 = vld [vmem:[#allocation6 + $0x1b8] sm:$0xff] }
  0x6a   :  { %311 = vmatmul.mubr.f32.gmra.mrb[8].mxu1 %v5827_v21  ;;  %4134 = vmatprep.subr.bf16.mxu0 %v5762_v57  ;;  %v170_v36 = vld [vmem:[#allocation6 + $0x150] sm:$0xff]  ;;  %v187_v47 = vld [vmem:[#allocation6 + $0x1d8] sm:$0xff] }
  0x6b   :  { %4040 = vmatpush1.bf16.msra.mxu1 %v4039_v23  ;;  %316 = vmatprep.mubr.f32.mxu1 %v6796_v0  ;;  %v163_v23 = vld [vmem:[#allocation6 + $0x118] sm:$0xff]  ;;  %v174_v37 = vld [vmem:[#allocation6 + $0x170] sm:$0xff] }
  0x6c   :  { %4042 = vmatprep.subr.bf16.mxu1 %v4041_v24  ;;  %v167_v24 = vld [vmem:[#allocation6 + $0x138] sm:$0xff]  ;;  %v182_v46 = vld [vmem:[#allocation6 + $0x1b0] sm:$0xff] }
  0x6d   :  { %4136 = vmatpush1.bf16.msra.mxu0 %v5765_v1  ;;  %v5891_v25 = vpack.c.bf16 %v167_v24, %v163_v23  ;;  %v191_v49 = vld [vmem:[#allocation6 + $0x1f8] sm:$0xff]  ;;  %v190_v55 = vld [vmem:[#allocation6 + $0x1f0] sm:$0xff] }
  0x6e   :  { %317 = vmatmul.mubr.f32.gmra.mrb[10].mxu1 %v5836_v31  ;;  %4138 = vmatprep.subr.bf16.mxu0 %v5768_v6  ;;  %v5915_v50 = vpack.c.bf16 %v191_v49, %v187_v47 }
  0x6f   :  { %4044 = vmatpush1.bf16.msra.mxu1 %v4043_v32  ;;  %322 = vmatprep.mubr.f32.mxu1 %v6796_v0  ;;  %v175_v32 = vld [vmem:[#allocation6 + $0x178] sm:$0xff] }
  0x70   :  { %4046 = vmatprep.subr.bf16.mxu1 %v4045_v33  ;;  %v5899_v33 = vpack.c.bf16 %v175_v32, %v171_v30 }
  0x71   :  { %4140 = vmatpush1.bf16.msra.mxu0 %v5771_v15 }
  0x72   :  { %323 = vmatmul.mubr.f32.gmra.mrb[12].mxu1 %v5845_v42  ;;  %4142 = vmatprep.subr.bf16.mxu0 %v5774_v20 }
  0x73   :  { %4048 = vmatpush1.bf16.msra.mxu1 %v4047_v43  ;;  %328 = vmatprep.mubr.f32.mxu1 %v6796_v0  ;;  %v5907_v43 = vpack.c.bf16 %v183_v40, %v179_v38 }
  0x74   :  { %4050 = vmatprep.subr.bf16.mxu1 %v4049_v45  ;;  %v178_v45 = vld [vmem:[#allocation6 + $0x190] sm:$0xff] }
  0x75   :  { %4144 = vmatpush1.bf16.msra.mxu0 %v5777_v29 }
  0x76   :  { %329 = vmatmul.mubr.f32.gmra.mrb[14].mxu1 %v5854_v51  ;;  %4146 = vmatprep.subr.bf16.mxu0 %v5780_v34 }
  0x77   :  { %4052 = vmatpush1.bf16.msra.mxu1 %v4051_v53  ;;  %399 = vmatprep.mubr.f32.mxu1 %v6796_v0  ;;  %v186_v53 = vld [vmem:[#allocation6 + $0x1d0] sm:$0xff] }
  0x78   :  { %4086 = vmatprep.subr.bf16.mxu1 %v5856_v54  ;;  %v5920_v58 = vpack.c.bf16 %v190_v55, %v186_v53 }
  0x79   :  { %4148 = vmatpush1.bf16.msra.mxu0 %v5783_v41 }
  0x7a   :  { %400 = vmatmul.mubr.f32.vlgmr.msra.gmra.mrb[16].mxu1 %v5789_v48  ;;  %4182 = vmatprep.subr.bf16.mxu0 %v5739_v9  ;;  %v5880_v48 = vpack.c.bf16 %v150_v12, %v146_v10 }
  0x7b   :  { %4088 = vmatpush1.bf16.msra.mxu1 %v5862_v61  ;;  %405 = vmatprep.mubr.f32.mxu1 %v6796_v0 }
  0x7c   :  { %4090 = vmatprep.subr.bf16.mxu1 %v5865_v62 }
  0x7e   :  { %406 = vmatmul.mubr.f32.gmra.mrb[18].mxu1 %v5798_v56  ;;  %v5888_v56 = vpack.c.bf16 %v158_v19, %v154_v18 }
  0x7f   :  { %4092 = vmatpush1.bf16.msra.mxu1 %v5872_v7  ;;  %411 = vmatprep.mubr.f32.mxu1 %v6796_v0 }
  0x80   :  { %4094 = vmatprep.subr.bf16.mxu1 %v5875_v8 }
  0x82   :  { %412 = vmatmul.mubr.f32.gmra.mrb[20].mxu1 %v5809_v2  ;;  %v5896_v2 = vpack.c.bf16 %v166_v28, %v162_v27 }
  0x83   :  { %4096 = vmatpush1.bf16.msra.mxu1 %v5880_v48  ;;  %417 = vmatprep.mubr.f32.mxu1 %v6796_v0 }
  0x84   :  { %4098 = vmatprep.subr.bf16.mxu1 %v5883_v17 }
  0x86   :  { %418 = vmatmul.mubr.f32.gmra.mrb[22].mxu1 %v5818_v11  ;;  %v5904_v11 = vpack.c.bf16 %v174_v37, %v170_v36 }
  0x87   :  { %4100 = vmatpush1.bf16.msra.mxu1 %v5888_v56  ;;  %423 = vmatprep.mubr.f32.mxu1 %v6796_v0 }
  0x88   :  { %4102 = vmatprep.subr.bf16.mxu1 %v5891_v25 }
  0x8a   :  { %424 = vmatmul.mubr.f32.gmra.mrb[24].mxu1 %v5827_v21  ;;  %v5912_v21 = vpack.c.bf16 %v182_v46, %v178_v45 }
  0x8b   :  { %4104 = vmatpush1.bf16.msra.mxu1 %v5896_v2  ;;  %429 = vmatprep.mubr.f32.mxu1 %v6796_v0 }
  0x8c   :  { %4106 = vmatprep.subr.bf16.mxu1 %v5899_v33 }
  0x8e   :  { %430 = vmatmul.mubr.f32.gmra.mrb[26].mxu1 %v5836_v31  ;;  %v202_v31 = vlaneseq }
  0x8f   :  { %4108 = vmatpush1.bf16.msra.mxu1 %v5904_v11  ;;  %435 = vmatprep.mubr.f32.mxu1 %v6796_v0 }
  0x90   :  { %4110 = vmatprep.subr.bf16.mxu1 %v5907_v43 }
  0x92   :  { %436 = vmatmul.mubr.f32.gmra.mrb[28].mxu1 %v5845_v42  ;;  %v5945_v42 = vshrl.u32 %v202_v31, 7 }
  0x93   :  { %4112 = vmatpush1.bf16.msra.mxu1 %v5912_v21  ;;  %441 = vmatprep.mubr.f32.mxu1 %v6796_v0 }
  0x94   :  { %4114 = vmatprep.subr.bf16.mxu1 %v5915_v50  ;;  %6801 = vst [vmem:[#allocation11_spill] sm:$0xff] %v5945_v42  ;;  %v6793_v60 = vsub.s32 1, %v5945_v42 }
  0x96   :  { %442 = vmatmul.mubr.f32.gmra.mrb[30].mxu1 %v5854_v51  ;;  %v6795_v51 = vsub.s32 0, %v5945_v42  ;;  %v209_v3 = vrot.slane %v192_v59, %v6793_v60 }
  0x97   :  { %4116 = vmatpush1.bf16.msra.mxu1 %v5920_v58  ;;  %619 = vmatprep.mubr.f32.mxu1 %v6796_v0 }
  0x98   :  { %4150 = vmatprep.subr.bf16.mxu1 %v5856_v54  ;;  %v205_v63 = vrot.slane %v192_v59, %v6795_v51 }
  0x9a   :  { %620 = vmatmul.mubr.f32.vlgmr.msra.gmra.mrb[16].mxu1 %v6796_v0 }
  0x9b   :  { %4152 = vmatpush1.bf16.msra.mxu1 %v5862_v61  ;;  %795 = vmatprep.mubr.f32.mxu1 %v6796_v0 }
  0x9c   :  { %4154 = vmatprep.subr.bf16.mxu1 %v5865_v62 }
  0x9f   :  { %4156 = vmatpush1.bf16.msra.mxu1 %v5872_v7 }
  0xa0   :  { %4158 = vmatprep.subr.bf16.mxu1 %v5875_v8 }
  0xa3   :  { %4160 = vmatpush1.bf16.msra.mxu1 %v5880_v48 }
  0xa4   :  { %4162 = vmatprep.subr.bf16.mxu1 %v5883_v17 }
  0xa7   :  { %4164 = vmatpush1.bf16.msra.mxu1 %v5888_v56 }
  0xa8   :  { %4166 = vmatprep.subr.bf16.mxu1 %v5891_v25 }
  0xab   :  { %4168 = vmatpush1.bf16.msra.mxu1 %v5896_v2 }
  0xac   :  { %4170 = vmatprep.subr.bf16.mxu1 %v5899_v33 }
  0xaf   :  { %4172 = vmatpush1.bf16.msra.mxu1 %v5904_v11 }
  0xb0   :  { %4174 = vmatprep.subr.bf16.mxu1 %v5907_v43 }
  0xb3   :  { %4176 = vmatpush1.bf16.msra.mxu1 %v5912_v21 }
  0xb4   :  { %4178 = vmatprep.subr.bf16.mxu1 %v5915_v50 }
  0xb7   :  { %4180 = vmatpush1.bf16.msra.mxu1 %v5920_v58 }
  0xb8   :  { %4214 = vmatprep.subr.bf16.mxu1 %v5856_v54 }
 0x12d   :  { %v288_v4 = vpop.f32.mrb[0].mxu1 }
 0x12e   :  { %v289_v5 = vadd.f32 %v288_v4, %v205_v63  ;;  %v290_v10 = vpop.f32.mrb[1].mxu1 }
 0x12f   :  { %v550_v12 = vpop.f32.mrb[0].mxu0  ;;  %v291_v14 = vadd.f32 %v290_v10, %v209_v3 }
 0x130   :  { %v552_v16 = vpop.f32.mrb[1].mxu0  ;;  %v626_v18 = vadd.f32 %v550_v12, %v289_v5 }
 0x131   :  { %v627_v19 = vadd.f32 %v552_v16, %v291_v14  ;;  %v294_v23 = vpop.f32.mrb[2].mxu1 }
 0x132   :  { %v5956_v24 = vadd.f32 %v294_v23, %v205_v63  ;;  %v296_v27 = vpop.f32.mrb[3].mxu1 }
 0x133   :  { %v5958_v28 = vadd.f32 %v296_v27, %v209_v3 }
 0x135   :  { %v300_v30 = vpop.f32.mrb[4].mxu1 }
 0x136   :  { %v5960_v32 = vadd.f32 %v300_v30, %v205_v63  ;;  %v302_v36 = vpop.f32.mrb[5].mxu1 }
 0x137   :  { %v5962_v37 = vadd.f32 %v302_v36, %v209_v3 }
 0x139   :  { %v306_v38 = vpop.f32.mrb[6].mxu1 }
 0x13a   :  { %v5964_v40 = vadd.f32 %v306_v38, %v205_v63  ;;  %v308_v45 = vpop.f32.mrb[7].mxu1 }
 0x13b   :  { %v5966_v46 = vadd.f32 %v308_v45, %v209_v3  ;;  %v3872_v45 = vmul.f32 -1.442695, %v627_v19 }
 0x13d   :  { %v312_v47 = vpop.f32.mrb[8].mxu1  ;;  %5309 = vpow2.f32 %v3872_v45 }
 0x13e   :  { %v5968_v49 = vadd.f32 %v312_v47, %v205_v63  ;;  %v314_v53 = vpop.f32.mrb[9].mxu1  ;;  %v3871_v47 = vmul.f32 -1.442695, %v626_v18 }
 0x13f   :  { %v5970_v55 = vadd.f32 %v314_v53, %v209_v3  ;;  %v6794_v53 = vsub.s32 2, %v5945_v42 }
 0x140   :  { %5311 = vpow2.f32 %v3871_v47 }
 0x141   :  { %v318_v31 = vpop.f32.mrb[10].mxu1 }
 0x142   :  { %v5972_v4 = vadd.f32 %v318_v31, %v205_v63  ;;  %v320_v5 = vpop.f32.mrb[11].mxu1 }
 0x143   :  { %v5974_v10 = vadd.f32 %v320_v5, %v209_v3  ;;  %v6800_v5 = vsub.s32 3, %v5945_v42 }
 0x145   :  { %v324_v12 = vpop.f32.mrb[12].mxu1 }
 0x146   :  { %v5976_v14 = vadd.f32 %v324_v12, %v205_v63  ;;  %v326_v16 = vpop.f32.mrb[13].mxu1 }
 0x147   :  { %v5978_v23 = vadd.f32 %v326_v16, %v209_v3  ;;  %v5310_v31 = vpop.eup %5309  ;;  %v5988_v16 = vrot.slane %v192_v59, %v6794_v53 }
 0x148   :  { %v639_v60 = vadd.f32 1.0, %v5310_v31 }
 0x149   :  { %v330_v27 = vpop.f32.mrb[14].mxu1 }
 0x14a   :  { %v5980_v30 = vadd.f32 %v330_v27, %v205_v63  ;;  %v332_v36 = vpop.f32.mrb[15].mxu1  ;;  %v5312_v12 = vpop.eup %5311  ;;  %5313 = vrcp.f32 %v639_v60 }
 0x14b   :  { %v5982_v38 = vadd.f32 %v332_v36, %v209_v3  ;;  %v633_v63 = vadd.f32 1.0, %v5312_v12  ;;  %v5992_v3 = vrot.slane %v192_v59, %v6800_v5 }
 0x14c   :  { %6802 = vst [vmem:[#allocation12_spill] sm:$0xff] %v5980_v30 }
 0x14d   :  { %6803 = vst [vmem:[#allocation13_spill] sm:$0xff] %v5982_v38  ;;  %5315 = vrcp.f32 %v633_v63 }
 0x154   :  { %v5314_v47 = vpop.eup %5313 }
 0x155   :  { %v649_v51 = vmul.f32 0.0, %v5314_v47 }
 0x157   :  { %v5316_v31 = vpop.eup %5315 }
 0x16d   :  { %v621_v19 = vpop.f32.mrb[16].mxu1 }
 0x16e   :  { %v5205_v18 = vadd.f32 %v621_v19, %v5988_v16  ;;  %v623_v27 = vpop.f32.mrb[17].mxu1 }
 0x16f   :  { %v5206_v36 = vadd.f32 %v623_v27, %v5992_v3 }
 0x170   :  { %5317 = vtanh.f32 %v5205_v18 }
 0x171   :  { %v3873_v45 = vmul.f32 -1.442695, %v5206_v36 }
 0x173   :  { %5319 = vpow2.f32 %v3873_v45 }
 0x17a   :  { %v5318_v53 = vpop.eup %5317 }
 0x17b   :  { %v650_v12 = vmul.f32 %v5318_v53, %v5316_v31 }
 0x17d   :  { %v5320_v0 = vpop.eup %5319  ;;  %v5996_v42 = vadd.f32 %v650_v12, %v649_v51 }
 0x17e   :  { %v646_v59 = vadd.f32 1.0, %v5320_v0  ;;  %v6804_v0 = vmov 0.0  }
 0x17f   :  { %5321 = vtanh.f32 %v5996_v42 }
 0x180   :  { %5323 = vrcp.f32 %v646_v59 }
 0x189   :  { %v5322_v60 = vpop.eup %5321 }
 0x18a   :  { %v5324_v19 = vpop.eup %5323 }
 0x18b   :  { %v5999_v63 = vmul.f32 %v5324_v19, %v5322_v60 }
 0x18d   :  { %725 = vmatmul.mubr.f32.vlgmr.msra.gmra.mrb[2].mxu0 %v5999_v63  ;;  %796 = vmatmul.mubr.f32.vlgmr.msra.gmra.mrb[18].mxu1 %v5999_v63 }
 0x18e   :  { %4184 = vmatpush1.bf16.msra.mxu0 %v5741_v13  ;;  %4216 = vmatpush1.bf16.msra.mxu1 %v5862_v61 }
 0x18f   :  { %4186 = vmatprep.subr.bf16.mxu0 %v5745_v22  ;;  %4218 = vmatprep.subr.bf16.mxu1 %v5865_v62 }
 0x190   :  { %901 = vmatprep.mubr.f32.mxu0 %v6804_v0  ;;  %972 = vmatprep.mubr.f32.mxu1 %v6804_v0 }
 0x192   :  { %4188 = vmatpush1.bf16.msra.mxu0 %v5747_v26  ;;  %4220 = vmatpush1.bf16.msra.mxu1 %v5872_v7 }
 0x193   :  { %4190 = vmatprep.subr.bf16.mxu0 %v5750_v35  ;;  %4222 = vmatprep.subr.bf16.mxu1 %v5875_v8 }
 0x196   :  { %4192 = vmatpush1.bf16.msra.mxu0 %v5753_v39  ;;  %4224 = vmatpush1.bf16.msra.mxu1 %v5880_v48 }
 0x197   :  { %4194 = vmatprep.subr.bf16.mxu0 %v5756_v44  ;;  %4226 = vmatprep.subr.bf16.mxu1 %v5883_v17 }
 0x19a   :  { %4196 = vmatpush1.bf16.msra.mxu0 %v5759_v52  ;;  %4228 = vmatpush1.bf16.msra.mxu1 %v5888_v56 }
 0x19b   :  { %4198 = vmatprep.subr.bf16.mxu0 %v5762_v57  ;;  %4230 = vmatprep.subr.bf16.mxu1 %v5891_v25 }
 0x19e   :  { %4200 = vmatpush1.bf16.msra.mxu0 %v5765_v1  ;;  %4232 = vmatpush1.bf16.msra.mxu1 %v5896_v2 }
 0x19f   :  { %4202 = vmatprep.subr.bf16.mxu0 %v5768_v6  ;;  %4234 = vmatprep.subr.bf16.mxu1 %v5899_v33 }
 0x1a2   :  { %4204 = vmatpush1.bf16.msra.mxu0 %v5771_v15  ;;  %4236 = vmatpush1.bf16.msra.mxu1 %v5904_v11 }
 0x1a3   :  { %4206 = vmatprep.subr.bf16.mxu0 %v5774_v20  ;;  %4238 = vmatprep.subr.bf16.mxu1 %v5907_v43 }
 0x1a6   :  { %4208 = vmatpush1.bf16.msra.mxu0 %v5777_v29  ;;  %4240 = vmatpush1.bf16.msra.mxu1 %v5912_v21 }
 0x1a7   :  { %4210 = vmatprep.subr.bf16.mxu0 %v5780_v34  ;;  %4242 = vmatprep.subr.bf16.mxu1 %v5915_v50 }
 0x1aa   :  { %4212 = vmatpush1.bf16.msra.mxu0 %v5783_v41  ;;  %4244 = vmatpush1.bf16.msra.mxu1 %v5920_v58 }
 0x1ab   :  { %4246 = vmatprep.subr.bf16.mxu0 %v5739_v9  ;;  %4278 = vmatprep.subr.bf16.mxu1 %v5856_v54 }
 0x260   :  { %v726_v51 = vpop.f32.mrb[2].mxu0  ;;  %v797_v53 = vpop.f32.mrb[18].mxu1 }
 0x261   :  { %v802_v18 = vadd.f32 %v726_v51, %v5956_v24  ;;  %v728_v27 = vpop.f32.mrb[3].mxu0  ;;  %v799_v36 = vpop.f32.mrb[19].mxu1  ;;  %v5207_v60 = vadd.f32 %v797_v53, %v5988_v16 }
 0x262   :  { %v803_v45 = vadd.f32 %v728_v27, %v5958_v28  ;;  %v5208_v12 = vadd.f32 %v799_v36, %v5992_v3 }
 0x263   :  { %v3874_v47 = vmul.f32 -1.442695, %v802_v18 }
 0x264   :  { %v3875_v31 = vmul.f32 -1.442695, %v803_v45  ;;  %v3876_v59 = vmul.f32 -1.442695, %v5208_v12 }
 0x265   :  { %5325 = vpow2.f32 %v3874_v47 }
 0x266   :  { %5327 = vpow2.f32 %v3875_v31 }
 0x267   :  { %5329 = vpow2.f32 %v3876_v59 }
 0x268   :  { %5331 = vtanh.f32 %v5207_v60 }
 0x26f   :  { %v5326_v19 = vpop.eup %5325 }
 0x270   :  { %v5328_v5 = vpop.eup %5327  ;;  %v809_v38 = vadd.f32 1.0, %v5326_v19 }
 0x271   :  { %v815_v30 = vadd.f32 1.0, %v5328_v5  ;;  %v5330_v24 = vpop.eup %5329 }
 0x272   :  { %5333 = vrcp.f32 %v809_v38  ;;  %v5332_v51 = vpop.eup %5331  ;;  %v822_v45 = vadd.f32 1.0, %v5330_v24 }
 0x273   :  { %5335 = vrcp.f32 %v815_v30 }
 0x274   :  { %5337 = vrcp.f32 %v822_v45 }
 0x27c   :  { %v5334_v28 = vpop.eup %5333 }
 0x27d   :  { %v5336_v18 = vpop.eup %5335  ;;  %v826_v27 = vmul.f32 %v5334_v28, %v5332_v51 }
 0x27e   :  { %v825_v47 = vmul.f32 %v5336_v18, %v5996_v42  ;;  %v5338_v53 = vpop.eup %5337 }
 0x280   :  { %v6042_v36 = vadd.f32 %v826_v27, %v825_v47 }
 0x282   :  { %5339 = vtanh.f32 %v6042_v36 }
 0x28c   :  { %v5340_v31 = vpop.eup %5339 }
 0x28d   :  { %v6045_v12 = vmul.f32 %v5340_v31, %v5338_v53 }
 0x28f   :  { %902 = vmatmul.mubr.f32.vlgmr.msra.gmra.mrb[4].mxu0 %v6045_v12  ;;  %973 = vmatmul.mubr.f32.vlgmr.msra.gmra.mrb[20].mxu1 %v6045_v12 }
 0x290   :  { %4248 = vmatpush1.bf16.msra.mxu0 %v5741_v13  ;;  %4280 = vmatpush1.bf16.msra.mxu1 %v5862_v61 }
 0x291   :  { %4250 = vmatprep.subr.bf16.mxu0 %v5745_v22  ;;  %4282 = vmatprep.subr.bf16.mxu1 %v5865_v62 }
 0x292   :  { %1078 = vmatprep.mubr.f32.mxu0 %v6804_v0  ;;  %1149 = vmatprep.mubr.f32.mxu1 %v6804_v0 }
 0x294   :  { %4252 = vmatpush1.bf16.msra.mxu0 %v5747_v26  ;;  %4284 = vmatpush1.bf16.msra.mxu1 %v5872_v7 }
 0x295   :  { %4254 = vmatprep.subr.bf16.mxu0 %v5750_v35  ;;  %4286 = vmatprep.subr.bf16.mxu1 %v5875_v8 }
 0x298   :  { %4256 = vmatpush1.bf16.msra.mxu0 %v5753_v39  ;;  %4288 = vmatpush1.bf16.msra.mxu1 %v5880_v48 }
 0x299   :  { %4258 = vmatprep.subr.bf16.mxu0 %v5756_v44  ;;  %4290 = vmatprep.subr.bf16.mxu1 %v5883_v17 }
 0x29c   :  { %4260 = vmatpush1.bf16.msra.mxu0 %v5759_v52  ;;  %4292 = vmatpush1.bf16.msra.mxu1 %v5888_v56 }
 0x29d   :  { %4262 = vmatprep.subr.bf16.mxu0 %v5762_v57  ;;  %4294 = vmatprep.subr.bf16.mxu1 %v5891_v25 }
 0x2a0   :  { %4264 = vmatpush1.bf16.msra.mxu0 %v5765_v1  ;;  %4296 = vmatpush1.bf16.msra.mxu1 %v5896_v2 }
 0x2a1   :  { %4266 = vmatprep.subr.bf16.mxu0 %v5768_v6  ;;  %4298 = vmatprep.subr.bf16.mxu1 %v5899_v33 }
 0x2a4   :  { %4268 = vmatpush1.bf16.msra.mxu0 %v5771_v15  ;;  %4300 = vmatpush1.bf16.msra.mxu1 %v5904_v11 }
 0x2a5   :  { %4270 = vmatprep.subr.bf16.mxu0 %v5774_v20  ;;  %4302 = vmatprep.subr.bf16.mxu1 %v5907_v43 }
 0x2a8   :  { %4272 = vmatpush1.bf16.msra.mxu0 %v5777_v29  ;;  %4304 = vmatpush1.bf16.msra.mxu1 %v5912_v21 }
 0x2a9   :  { %4274 = vmatprep.subr.bf16.mxu0 %v5780_v34  ;;  %4306 = vmatprep.subr.bf16.mxu1 %v5915_v50 }
 0x2ac   :  { %4276 = vmatpush1.bf16.msra.mxu0 %v5783_v41  ;;  %4308 = vmatpush1.bf16.msra.mxu1 %v5920_v58 }
 0x2ad   :  { %4310 = vmatprep.subr.bf16.mxu0 %v5739_v9  ;;  %4342 = vmatprep.subr.bf16.mxu1 %v5856_v54 }
 0x362   :  { %v903_v42 = vpop.f32.mrb[4].mxu0  ;;  %v974_v30 = vpop.f32.mrb[20].mxu1 }
 0x363   :  { %v979_v38 = vadd.f32 %v903_v42, %v5960_v32  ;;  %v905_v5 = vpop.f32.mrb[5].mxu0  ;;  %v976_v59 = vpop.f32.mrb[21].mxu1  ;;  %v5209_v18 = vadd.f32 %v974_v30, %v5988_v16 }
 0x364   :  { %v980_v60 = vadd.f32 %v905_v5, %v5962_v37  ;;  %v5210_v51 = vadd.f32 %v976_v59, %v5992_v3 }
 0x365   :  { %v3877_v19 = vmul.f32 -1.442695, %v979_v38 }
 0x366   :  { %v3878_v24 = vmul.f32 -1.442695, %v980_v60  ;;  %v3879_v28 = vmul.f32 -1.442695, %v5210_v51 }
 0x367   :  { %5341 = vpow2.f32 %v3877_v19 }
 0x368   :  { %5343 = vpow2.f32 %v3878_v24 }
 0x369   :  { %5345 = vpow2.f32 %v3879_v28 }
 0x36a   :  { %5347 = vtanh.f32 %v5209_v18 }
 0x371   :  { %v5342_v27 = vpop.eup %5341 }
 0x372   :  { %v5344_v45 = vpop.eup %5343  ;;  %v986_v47 = vadd.f32 1.0, %v5342_v27 }
 0x373   :  { %v992_v53 = vadd.f32 1.0, %v5344_v45  ;;  %v5346_v32 = vpop.eup %5345 }
 0x374   :  { %5349 = vrcp.f32 %v986_v47  ;;  %v5348_v31 = vpop.eup %5347  ;;  %v999_v5 = vadd.f32 1.0, %v5346_v32 }
 0x375   :  { %5351 = vrcp.f32 %v992_v53 }
 0x376   :  { %5353 = vrcp.f32 %v999_v5 }
 0x37e   :  { %v5350_v37 = vpop.eup %5349 }
 0x37f   :  { %v5352_v42 = vpop.eup %5351  ;;  %v1003_v38 = vmul.f32 %v5350_v37, %v5348_v31 }
 0x380   :  { %v1002_v60 = vmul.f32 %v5352_v42, %v6042_v36  ;;  %v5354_v30 = vpop.eup %5353 }
 0x382   :  { %v6088_v59 = vadd.f32 %v1003_v38, %v1002_v60 }
 0x384   :  { %5355 = vtanh.f32 %v6088_v59 }
 0x38e   :  { %v5356_v19 = vpop.eup %5355 }
 0x38f   :  { %v6091_v24 = vmul.f32 %v5356_v19, %v5354_v30 }
 0x391   :  { %1079 = vmatmul.mubr.f32.vlgmr.msra.gmra.mrb[6].mxu0 %v6091_v24  ;;  %1150 = vmatmul.mubr.f32.vlgmr.msra.gmra.mrb[22].mxu1 %v6091_v24 }
 0x392   :  { %4312 = vmatpush1.bf16.msra.mxu0 %v5741_v13  ;;  %4344 = vmatpush1.bf16.msra.mxu1 %v5862_v61 }
 0x393   :  { %4314 = vmatprep.subr.bf16.mxu0 %v5745_v22  ;;  %4346 = vmatprep.subr.bf16.mxu1 %v5865_v62 }
 0x394   :  { %1255 = vmatprep.mubr.f32.mxu0 %v6804_v0  ;;  %1326 = vmatprep.mubr.f32.mxu1 %v6804_v0 }
 0x396   :  { %4316 = vmatpush1.bf16.msra.mxu0 %v5747_v26  ;;  %4348 = vmatpush1.bf16.msra.mxu1 %v5872_v7 }
 0x397   :  { %4318 = vmatprep.subr.bf16.mxu0 %v5750_v35  ;;  %4350 = vmatprep.subr.bf16.mxu1 %v5875_v8 }
 0x39a   :  { %4320 = vmatpush1.bf16.msra.mxu0 %v5753_v39  ;;  %4352 = vmatpush1.bf16.msra.mxu1 %v5880_v48 }
 0x39b   :  { %4322 = vmatprep.subr.bf16.mxu0 %v5756_v44  ;;  %4354 = vmatprep.subr.bf16.mxu1 %v5883_v17 }
 0x39e   :  { %4324 = vmatpush1.bf16.msra.mxu0 %v5759_v52  ;;  %4356 = vmatpush1.bf16.msra.mxu1 %v5888_v56 }
 0x39f   :  { %4326 = vmatprep.subr.bf16.mxu0 %v5762_v57  ;;  %4358 = vmatprep.subr.bf16.mxu1 %v5891_v25 }
 0x3a2   :  { %4328 = vmatpush1.bf16.msra.mxu0 %v5765_v1  ;;  %4360 = vmatpush1.bf16.msra.mxu1 %v5896_v2 }
 0x3a3   :  { %4330 = vmatprep.subr.bf16.mxu0 %v5768_v6  ;;  %4362 = vmatprep.subr.bf16.mxu1 %v5899_v33 }
 0x3a6   :  { %4332 = vmatpush1.bf16.msra.mxu0 %v5771_v15  ;;  %4364 = vmatpush1.bf16.msra.mxu1 %v5904_v11 }
 0x3a7   :  { %4334 = vmatprep.subr.bf16.mxu0 %v5774_v20  ;;  %4366 = vmatprep.subr.bf16.mxu1 %v5907_v43 }
 0x3aa   :  { %4336 = vmatpush1.bf16.msra.mxu0 %v5777_v29  ;;  %4368 = vmatpush1.bf16.msra.mxu1 %v5912_v21 }
 0x3ab   :  { %4338 = vmatprep.subr.bf16.mxu0 %v5780_v34  ;;  %4370 = vmatprep.subr.bf16.mxu1 %v5915_v50 }
 0x3ae   :  { %4340 = vmatpush1.bf16.msra.mxu0 %v5783_v41  ;;  %4372 = vmatpush1.bf16.msra.mxu1 %v5920_v58 }
 0x3af   :  { %4374 = vmatprep.subr.bf16.mxu0 %v5739_v9  ;;  %4406 = vmatprep.subr.bf16.mxu1 %v5856_v54 }
 0x464   :  { %v1080_v36 = vpop.f32.mrb[6].mxu0  ;;  %v1151_v51 = vpop.f32.mrb[22].mxu1 }
 0x465   :  { %v1156_v28 = vadd.f32 %v1080_v36, %v5964_v40  ;;  %v1082_v18 = vpop.f32.mrb[7].mxu0  ;;  %v1153_v27 = vpop.f32.mrb[23].mxu1  ;;  %v5211_v37 = vadd.f32 %v1151_v51, %v5988_v16 }
 0x466   :  { %v1157_v45 = vadd.f32 %v1082_v18, %v5966_v46  ;;  %v5212_v32 = vadd.f32 %v1153_v27, %v5992_v3 }
 0x467   :  { %v3880_v47 = vmul.f32 -1.442695, %v1156_v28 }
 0x468   :  { %v3881_v53 = vmul.f32 -1.442695, %v1157_v45  ;;  %v3882_v31 = vmul.f32 -1.442695, %v5212_v32 }
 0x469   :  { %5357 = vpow2.f32 %v3880_v47 }
 0x46a   :  { %5359 = vpow2.f32 %v3881_v53 }
 0x46b   :  { %5361 = vpow2.f32 %v3882_v31 }
 0x46c   :  { %5363 = vtanh.f32 %v5211_v37 }
 0x473   :  { %v5358_v42 = vpop.eup %5357 }
 0x474   :  { %v5360_v38 = vpop.eup %5359  ;;  %v1163_v5 = vadd.f32 1.0, %v5358_v42 }
 0x475   :  { %v1169_v60 = vadd.f32 1.0, %v5360_v38  ;;  %v5362_v40 = vpop.eup %5361 }
 0x476   :  { %5365 = vrcp.f32 %v1163_v5  ;;  %v5364_v30 = vpop.eup %5363  ;;  %v1176_v28 = vadd.f32 1.0, %v5362_v40 }
 0x477   :  { %5367 = vrcp.f32 %v1169_v60 }
 0x478   :  { %5369 = vrcp.f32 %v1176_v28 }
 0x480   :  { %v5366_v46 = vpop.eup %5365 }
 0x481   :  { %v5368_v19 = vpop.eup %5367  ;;  %v1180_v36 = vmul.f32 %v5366_v46, %v5364_v30 }
 0x482   :  { %v1179_v18 = vmul.f32 %v5368_v19, %v6088_v59  ;;  %v5370_v51 = vpop.eup %5369 }
 0x484   :  { %v6134_v27 = vadd.f32 %v1180_v36, %v1179_v18 }
 0x486   :  { %5371 = vtanh.f32 %v6134_v27 }
 0x490   :  { %v5372_v45 = vpop.eup %5371 }
 0x491   :  { %v6137_v47 = vmul.f32 %v5372_v45, %v5370_v51 }
 0x493   :  { %1256 = vmatmul.mubr.f32.vlgmr.msra.gmra.mrb[8].mxu0 %v6137_v47  ;;  %1327 = vmatmul.mubr.f32.vlgmr.msra.gmra.mrb[24].mxu1 %v6137_v47 }
 0x494   :  { %4376 = vmatpush1.bf16.msra.mxu0 %v5741_v13  ;;  %4408 = vmatpush1.bf16.msra.mxu1 %v5862_v61 }
 0x495   :  { %4378 = vmatprep.subr.bf16.mxu0 %v5745_v22  ;;  %4410 = vmatprep.subr.bf16.mxu1 %v5865_v62 }
 0x496   :  { %1432 = vmatprep.mubr.f32.mxu0 %v6804_v0  ;;  %1503 = vmatprep.mubr.f32.mxu1 %v6804_v0 }
 0x498   :  { %4380 = vmatpush1.bf16.msra.mxu0 %v5747_v26  ;;  %4412 = vmatpush1.bf16.msra.mxu1 %v5872_v7 }
 0x499   :  { %4382 = vmatprep.subr.bf16.mxu0 %v5750_v35  ;;  %4414 = vmatprep.subr.bf16.mxu1 %v5875_v8 }
 0x49c   :  { %4384 = vmatpush1.bf16.msra.mxu0 %v5753_v39  ;;  %4416 = vmatpush1.bf16.msra.mxu1 %v5880_v48 }
 0x49d   :  { %4386 = vmatprep.subr.bf16.mxu0 %v5756_v44  ;;  %4418 = vmatprep.subr.bf16.mxu1 %v5883_v17 }
 0x4a0   :  { %4388 = vmatpush1.bf16.msra.mxu0 %v5759_v52  ;;  %4420 = vmatpush1.bf16.msra.mxu1 %v5888_v56 }
 0x4a1   :  { %4390 = vmatprep.subr.bf16.mxu0 %v5762_v57  ;;  %4422 = vmatprep.subr.bf16.mxu1 %v5891_v25 }
 0x4a4   :  { %4392 = vmatpush1.bf16.msra.mxu0 %v5765_v1  ;;  %4424 = vmatpush1.bf16.msra.mxu1 %v5896_v2 }
 0x4a5   :  { %4394 = vmatprep.subr.bf16.mxu0 %v5768_v6  ;;  %4426 = vmatprep.subr.bf16.mxu1 %v5899_v33 }
 0x4a8   :  { %4396 = vmatpush1.bf16.msra.mxu0 %v5771_v15  ;;  %4428 = vmatpush1.bf16.msra.mxu1 %v5904_v11 }
 0x4a9   :  { %4398 = vmatprep.subr.bf16.mxu0 %v5774_v20  ;;  %4430 = vmatprep.subr.bf16.mxu1 %v5907_v43 }
 0x4ac   :  { %4400 = vmatpush1.bf16.msra.mxu0 %v5777_v29  ;;  %4432 = vmatpush1.bf16.msra.mxu1 %v5912_v21 }
 0x4ad   :  { %4402 = vmatprep.subr.bf16.mxu0 %v5780_v34  ;;  %4434 = vmatprep.subr.bf16.mxu1 %v5915_v50 }
 0x4b0   :  { %4404 = vmatpush1.bf16.msra.mxu0 %v5783_v41  ;;  %4436 = vmatpush1.bf16.msra.mxu1 %v5920_v58 }
 0x4b1   :  { %4438 = vmatprep.subr.bf16.mxu0 %v5739_v9  ;;  %4470 = vmatprep.subr.bf16.mxu1 %v5856_v54 }
 0x566   :  { %v1257_v59 = vpop.f32.mrb[8].mxu0  ;;  %v1328_v53 = vpop.f32.mrb[24].mxu1 }
 0x567   :  { %v1333_v32 = vadd.f32 %v1257_v59, %v5968_v49  ;;  %v1259_v31 = vpop.f32.mrb[9].mxu0  ;;  %v1330_v37 = vpop.f32.mrb[25].mxu1  ;;  %v5213_v30 = vadd.f32 %v1328_v53, %v5988_v16 }
 0x568   :  { %v1334_v42 = vadd.f32 %v1259_v31, %v5970_v55  ;;  %v5214_v60 = vadd.f32 %v1330_v37, %v5992_v3 }
 0x569   :  { %v3883_v38 = vmul.f32 -1.442695, %v1333_v32 }
 0x56a   :  { %v3884_v5 = vmul.f32 -1.442695, %v1334_v42  ;;  %v3885_v40 = vmul.f32 -1.442695, %v5214_v60 }
 0x56b   :  { %5373 = vpow2.f32 %v3883_v38 }
 0x56c   :  { %5375 = vpow2.f32 %v3884_v5 }
 0x56d   :  { %5377 = vpow2.f32 %v3885_v40 }
 0x56e   :  { %5379 = vtanh.f32 %v5213_v30 }
 0x575   :  { %v5374_v46 = vpop.eup %5373 }
 0x576   :  { %v5376_v19 = vpop.eup %5375  ;;  %v1340_v36 = vadd.f32 1.0, %v5374_v46 }
 0x577   :  { %v1346_v28 = vadd.f32 1.0, %v5376_v19  ;;  %v5378_v49 = vpop.eup %5377 }
 0x578   :  { %5381 = vrcp.f32 %v1340_v36  ;;  %v5380_v18 = vpop.eup %5379  ;;  %v1353_v59 = vadd.f32 1.0, %v5378_v49 }
 0x579   :  { %5383 = vrcp.f32 %v1346_v28 }
 0x57a   :  { %5385 = vrcp.f32 %v1353_v59 }
 0x582   :  { %v5382_v55 = vpop.eup %5381 }
 0x583   :  { %v5384_v51 = vpop.eup %5383  ;;  %v1357_v45 = vmul.f32 %v5382_v55, %v5380_v18 }
 0x584   :  { %v1356_v32 = vmul.f32 %v5384_v51, %v6134_v27  ;;  %v5386_v53 = vpop.eup %5385 }
 0x586   :  { %v6180_v31 = vadd.f32 %v1357_v45, %v1356_v32 }
 0x588   :  { %5387 = vtanh.f32 %v6180_v31 }
 0x592   :  { %v5388_v37 = vpop.eup %5387 }
 0x593   :  { %v6183_v42 = vmul.f32 %v5388_v37, %v5386_v53 }
 0x595   :  { %1433 = vmatmul.mubr.f32.vlgmr.msra.gmra.mrb[10].mxu0 %v6183_v42  ;;  %1504 = vmatmul.mubr.f32.vlgmr.msra.gmra.mrb[26].mxu1 %v6183_v42 }
 0x596   :  { %4440 = vmatpush1.bf16.msra.mxu0 %v5741_v13  ;;  %4472 = vmatpush1.bf16.msra.mxu1 %v5862_v61 }
 0x597   :  { %4442 = vmatprep.subr.bf16.mxu0 %v5745_v22  ;;  %4474 = vmatprep.subr.bf16.mxu1 %v5865_v62 }
 0x598   :  { %1609 = vmatprep.mubr.f32.mxu0 %v6804_v0  ;;  %1680 = vmatprep.mubr.f32.mxu1 %v6804_v0 }
 0x59a   :  { %4444 = vmatpush1.bf16.msra.mxu0 %v5747_v26  ;;  %4476 = vmatpush1.bf16.msra.mxu1 %v5872_v7 }
 0x59b   :  { %4446 = vmatprep.subr.bf16.mxu0 %v5750_v35  ;;  %4478 = vmatprep.subr.bf16.mxu1 %v5875_v8 }
 0x59e   :  { %4448 = vmatpush1.bf16.msra.mxu0 %v5753_v39  ;;  %4480 = vmatpush1.bf16.msra.mxu1 %v5880_v48 }
 0x59f   :  { %4450 = vmatprep.subr.bf16.mxu0 %v5756_v44  ;;  %4482 = vmatprep.subr.bf16.mxu1 %v5883_v17 }
 0x5a2   :  { %4452 = vmatpush1.bf16.msra.mxu0 %v5759_v52  ;;  %4484 = vmatpush1.bf16.msra.mxu1 %v5888_v56 }
 0x5a3   :  { %4454 = vmatprep.subr.bf16.mxu0 %v5762_v57  ;;  %4486 = vmatprep.subr.bf16.mxu1 %v5891_v25 }
 0x5a6   :  { %4456 = vmatpush1.bf16.msra.mxu0 %v5765_v1  ;;  %4488 = vmatpush1.bf16.msra.mxu1 %v5896_v2 }
 0x5a7   :  { %4458 = vmatprep.subr.bf16.mxu0 %v5768_v6  ;;  %4490 = vmatprep.subr.bf16.mxu1 %v5899_v33 }
 0x5aa   :  { %4460 = vmatpush1.bf16.msra.mxu0 %v5771_v15  ;;  %4492 = vmatpush1.bf16.msra.mxu1 %v5904_v11 }
 0x5ab   :  { %4462 = vmatprep.subr.bf16.mxu0 %v5774_v20  ;;  %4494 = vmatprep.subr.bf16.mxu1 %v5907_v43 }
 0x5ae   :  { %4464 = vmatpush1.bf16.msra.mxu0 %v5777_v29  ;;  %4496 = vmatpush1.bf16.msra.mxu1 %v5912_v21 }
 0x5af   :  { %4466 = vmatprep.subr.bf16.mxu0 %v5780_v34  ;;  %4498 = vmatprep.subr.bf16.mxu1 %v5915_v50 }
 0x5b2   :  { %4468 = vmatpush1.bf16.msra.mxu0 %v5783_v41  ;;  %4500 = vmatpush1.bf16.msra.mxu1 %v5920_v58 }
 0x5b3   :  { %4502 = vmatprep.subr.bf16.mxu0 %v5739_v9  ;;  %4534 = vmatprep.subr.bf16.mxu1 %v5856_v54 }
 0x668   :  { %v1434_v27 = vpop.f32.mrb[10].mxu0  ;;  %v1505_v38 = vpop.f32.mrb[26].mxu1 }
 0x669   :  { %v1510_v5 = vadd.f32 %v1434_v27, %v5972_v4  ;;  %v1436_v60 = vpop.f32.mrb[11].mxu0  ;;  %v1507_v40 = vpop.f32.mrb[27].mxu1  ;;  %v5215_v49 = vadd.f32 %v1505_v38, %v5988_v16 }
 0x66a   :  { %v1511_v30 = vadd.f32 %v1436_v60, %v5974_v10  ;;  %v5216_v36 = vadd.f32 %v1507_v40, %v5992_v3  ;;  %v1904_v60 = vld [vmem:[#allocation4 + $0x248] sm:$0xff] }
 0x66b   :  { %v3886_v46 = vmul.f32 -1.442695, %v1510_v5  ;;  %v1908_v40 = vld [vmem:[#allocation4 + $0x268] sm:$0xff] }
 0x66c   :  { %v3887_v19 = vmul.f32 -1.442695, %v1511_v30  ;;  %v3888_v28 = vmul.f32 -1.442695, %v5216_v36  ;;  %v1906_v30 = vld [vmem:[#allocation4 + $0x258] sm:$0xff] }
 0x66d   :  { %5389 = vpow2.f32 %v3886_v46  ;;  %v1910_v46 = vld [vmem:[#allocation4 + $0x278] sm:$0xff] }
 0x66e   :  { %5391 = vpow2.f32 %v3887_v19 }
 0x66f   :  { %5393 = vpow2.f32 %v3888_v28 }
 0x670   :  { %5395 = vtanh.f32 %v5215_v49 }
 0x677   :  { %v5390_v9 = vpop.eup %5389 }
 0x678   :  { %v5392_v18 = vpop.eup %5391  ;;  %v1517_v54 = vadd.f32 1.0, %v5390_v9  ;;  %v1903_v9 = vld [vmem:[#allocation4 + $0x240] sm:$0xff] }
 0x679   :  { %v1523_v55 = vadd.f32 1.0, %v5392_v18  ;;  %v5394_v4 = vpop.eup %5393  ;;  %v1907_v18 = vld [vmem:[#allocation4 + $0x260] sm:$0xff] }
 0x67a   :  { %5397 = vrcp.f32 %v1517_v54  ;;  %v5396_v51 = vpop.eup %5395  ;;  %v1530_v32 = vadd.f32 1.0, %v5394_v4  ;;  %v4601_v4 = vpack.c.bf16 %v1910_v46, %v1906_v30  ;;  %v1935_v46 = vld [vmem:[#allocation4 + $0x340] sm:$0xff] }
 0x67b   :  { %5399 = vrcp.f32 %v1523_v55  ;;  %v4569_v55 = vpack.c.bf16 %v1908_v40, %v1904_v60  ;;  %v1942_v60 = vld [vmem:[#allocation4 + $0x378] sm:$0xff] }
 0x67c   :  { %5401 = vrcp.f32 %v1530_v32  ;;  %v1914_v32 = vld [vmem:[#allocation4 + $0x298] sm:$0xff] }
 0x684   :  { %v5398_v10 = vpop.eup %5397 }
 0x685   :  { %v5400_v45 = vpop.eup %5399  ;;  %v1534_v59 = vmul.f32 %v5398_v10, %v5396_v51  ;;  %v1905_v51 = vld [vmem:[#allocation4 + $0x250] sm:$0xff] }
 0x686   :  { %v1533_v53 = vmul.f32 %v5400_v45, %v6180_v31  ;;  %v5402_v27 = vpop.eup %5401  ;;  %v1901_v31 = vld [vmem:[#allocation4 + $0x230] sm:$0xff]  ;;  %v1912_v45 = vld [vmem:[#allocation4 + $0x288] sm:$0xff] }
 0x687   :  { %v1909_v10 = vld [vmem:[#allocation4 + $0x270] sm:$0xff] }
 0x688   :  { %v6226_v37 = vadd.f32 %v1534_v59, %v1533_v53  ;;  %v1916_v59 = vld [vmem:[#allocation4 + $0x2a8] sm:$0xff]  ;;  %v1918_v53 = vld [vmem:[#allocation4 + $0x2b8] sm:$0xff] }
 0x68a   :  { %5403 = vtanh.f32 %v6226_v37 }
 0x694   :  { %v5404_v38 = vpop.eup %5403 }
 0x695   :  { %v6229_v5 = vmul.f32 %v5404_v38, %v5402_v27  ;;  %v4603_v27 = vpack.c.bf16 %v1909_v10, %v1905_v51  ;;  %v1911_v38 = vld [vmem:[#allocation4 + $0x280] sm:$0xff]  ;;  %v1950_v51 = vld [vmem:[#allocation4 + $0x3b8] sm:$0xff] }
 0x697   :  { %1610 = vmatmul.mubr.f32.vlgmr.msra.gmra.mrb[12].mxu0 %v6229_v5  ;;  %1681 = vmatmul.mubr.f32.vlgmr.msra.gmra.mrb[28].mxu1 %v6229_v5 }
 0x698   :  { %4504 = vmatpush1.bf16.msra.mxu0 %v5741_v13  ;;  %4536 = vmatpush1.bf16.msra.mxu1 %v5862_v61  ;;  %v1896_v13 = vld [vmem:[#allocation4 + $0x208] sm:$0xff] }
 0x699   :  { %4506 = vmatprep.subr.bf16.mxu0 %v5745_v22  ;;  %4538 = vmatprep.subr.bf16.mxu1 %v5865_v62  ;;  %v1900_v22 = vld [vmem:[#allocation4 + $0x228] sm:$0xff] }
 0x69a   :  { %1786 = vmatprep.mubr.f32.mxu0 %v6804_v0  ;;  %1857 = vmatprep.mubr.f32.mxu1 %v6804_v0 }
 0x69c   :  { %4508 = vmatpush1.bf16.msra.mxu0 %v5747_v26  ;;  %4540 = vmatpush1.bf16.msra.mxu1 %v5872_v7  ;;  %v1898_v26 = vld [vmem:[#allocation4 + $0x218] sm:$0xff] }
 0x69d   :  { %4510 = vmatprep.subr.bf16.mxu0 %v5750_v35  ;;  %4542 = vmatprep.subr.bf16.mxu1 %v5875_v8  ;;  %v4565_v35 = vpack.c.bf16 %v1900_v22, %v1896_v13  ;;  %v1915_v13 = vld [vmem:[#allocation4 + $0x2a0] sm:$0xff]  ;;  %v4573_v22 = vpack.c.bf16 %v1916_v59, %v1912_v45 }
 0x69e   :  { %v1943_v59 = vld [vmem:[#allocation4 + $0x380] sm:$0xff] }
 0x6a0   :  { %4512 = vmatpush1.bf16.msra.mxu0 %v5753_v39  ;;  %4544 = vmatpush1.bf16.msra.mxu1 %v5880_v48  ;;  %v1902_v39 = vld [vmem:[#allocation4 + $0x238] sm:$0xff] }
 0x6a1   :  { %4514 = vmatprep.subr.bf16.mxu0 %v5756_v44  ;;  %4546 = vmatprep.subr.bf16.mxu1 %v5883_v17  ;;  %v4597_v44 = vpack.c.bf16 %v1902_v39, %v1898_v26  ;;  %v4605_v26 = vpack.c.bf16 %v1918_v53, %v1914_v32  ;;  %v1917_v39 = vld [vmem:[#allocation4 + $0x2b0] sm:$0xff]  ;;  %v1947_v32 = vld [vmem:[#allocation4 + $0x3a0] sm:$0xff] }
 0x6a4   :  { %4516 = vmatpush1.bf16.msra.mxu0 %v5759_v52  ;;  %4548 = vmatpush1.bf16.msra.mxu1 %v5888_v56 }
 0x6a5   :  { %4518 = vmatprep.subr.bf16.mxu0 %v5762_v57  ;;  %4550 = vmatprep.subr.bf16.mxu1 %v5891_v25 }
 0x6a8   :  { %4520 = vmatpush1.bf16.msra.mxu0 %v5765_v1  ;;  %4552 = vmatpush1.bf16.msra.mxu1 %v5896_v2 }
 0x6a9   :  { %4522 = vmatprep.subr.bf16.mxu0 %v5768_v6  ;;  %4554 = vmatprep.subr.bf16.mxu1 %v5899_v33 }
 0x6ac   :  { %4524 = vmatpush1.bf16.msra.mxu0 %v5771_v15  ;;  %4556 = vmatpush1.bf16.msra.mxu1 %v5904_v11 }
 0x6ad   :  { %4526 = vmatprep.subr.bf16.mxu0 %v5774_v20  ;;  %4558 = vmatprep.subr.bf16.mxu1 %v5907_v43 }
 0x6b0   :  { %4528 = vmatpush1.bf16.msra.mxu0 %v5777_v29  ;;  %4560 = vmatpush1.bf16.msra.mxu1 %v5912_v21 }
 0x6b1   :  { %4530 = vmatprep.subr.bf16.mxu0 %v5780_v34  ;;  %4562 = vmatprep.subr.bf16.mxu1 %v5915_v50 }
 0x6b4   :  { %4532 = vmatpush1.bf16.msra.mxu0 %v5783_v41  ;;  %4564 = vmatpush1.bf16.msra.mxu1 %v5920_v58  ;;  %v1895_v58 = vld [vmem:[#allocation4 + $0x200] sm:$0xff] }
 0x6b5   :  { %4566 = vmatprep.subr.bf16.mxu0 %v4565_v35  ;;  %4598 = vmatprep.subr.bf16.mxu1 %v4597_v44  ;;  %v1913_v35 = vld [vmem:[#allocation4 + $0x290] sm:$0xff]  ;;  %v1920_v44 = vld [vmem:[#allocation4 + $0x2c8] sm:$0xff] }
 0x76a   :  { %v1611_v52 = vpop.f32.mrb[12].mxu0  ;;  %v1682_v57 = vpop.f32.mrb[28].mxu1 }
 0x76b   :  { %v1687_v1 = vadd.f32 %v1611_v52, %v5976_v14  ;;  %v1613_v6 = vpop.f32.mrb[13].mxu0  ;;  %v1684_v15 = vpop.f32.mrb[29].mxu1  ;;  %v5217_v62 = vadd.f32 %v1682_v57, %v5988_v16  ;;  %v1899_v14 = vld [vmem:[#allocation4 + $0x220] sm:$0xff]  ;;  %v1924_v52 = vld [vmem:[#allocation4 + $0x2e8] sm:$0xff]  ;;  %v1922_v57 = vld [vmem:[#allocation4 + $0x2d8] sm:$0xff] }
 0x76c   :  { %v1688_v20 = vadd.f32 %v1613_v6, %v5978_v23  ;;  %v5218_v41 = vadd.f32 %v1684_v15, %v5992_v3  ;;  %v1897_v23 = vld [vmem:[#allocation4 + $0x210] sm:$0xff]  ;;  %v4567_v28 = vpack.c.bf16 %v1899_v14, %v1895_v58  ;;  %v4575_v6 = vpack.c.bf16 %v1915_v13, %v1911_v38  ;;  %v1936_v14 = vld [vmem:[#allocation4 + $0x348] sm:$0xff] }
 0x76d   :  { %v3889_v29 = vmul.f32 -1.442695, %v1687_v1  ;;  %v4599_v49 = vpack.c.bf16 %v1901_v31, %v1897_v23  ;;  %v1926_v1 = vld [vmem:[#allocation4 + $0x2f8] sm:$0xff]  ;;  %v4607_v15 = vpack.c.bf16 %v1917_v39, %v1913_v35  ;;  %v1933_v58 = vld [vmem:[#allocation4 + $0x330] sm:$0xff]  ;;  %v1940_v23 = vld [vmem:[#allocation4 + $0x368] sm:$0xff]  ;;  %v4591_v39 = vpack.c.bf16 %v1947_v32, %v1943_v59 }
 0x76e   :  { %v3890_v34 = vmul.f32 -1.442695, %v1688_v20  ;;  %v3891_v61 = vmul.f32 -1.442695, %v5218_v41  ;;  %v1919_v20 = vld [vmem:[#allocation4 + $0x2c0] sm:$0xff]  ;;  %v4609_v41 = vpack.c.bf16 %v1926_v1, %v1922_v57  ;;  %v1938_v31 = vld [vmem:[#allocation4 + $0x358] sm:$0xff] }
 0x76f   :  { %5405 = vpow2.f32 %v3889_v29  ;;  %v1923_v29 = vld [vmem:[#allocation4 + $0x2e0] sm:$0xff]  ;;  %v1949_v38 = vld [vmem:[#allocation4 + $0x3b0] sm:$0xff]  ;;  %v1952_v13 = vld [vmem:[#allocation4 + $0x3c8] sm:$0xff] }
 0x770   :  { %5407 = vpow2.f32 %v3890_v34  ;;  %v4577_v34 = vpack.c.bf16 %v1924_v52, %v1920_v44  ;;  %v1958_v35 = vld [vmem:[#allocation4 + $0x3f8] sm:$0xff]  ;;  %v1951_v52 = vld [vmem:[#allocation4 + $0x3c0] sm:$0xff] }
 0x771   :  { %5409 = vpow2.f32 %v3891_v61  ;;  %v1921_v61 = vld [vmem:[#allocation4 + $0x2d0] sm:$0xff]  ;;  %v1991_v59 = vld [vmem:[#allocation6 + $0x2f8] sm:$0xff]  ;;  %v1984_v32 = vld [vmem:[#allocation6 + $0x2c0] sm:$0xff] }
 0x772   :  { %5411 = vtanh.f32 %v5217_v62  ;;  %v1925_v62 = vld [vmem:[#allocation4 + $0x2f0] sm:$0xff] }
 0x779   :  { %v5406_v7 = vpop.eup %5405 }
 0x77a   :  { %v5408_v8 = vpop.eup %5407  ;;  %v1694_v48 = vadd.f32 1.0, %v5406_v7  ;;  %v1928_v7 = vld [vmem:[#allocation4 + $0x308] sm:$0xff] }
 0x77b   :  { %v1700_v17 = vadd.f32 1.0, %v5408_v8  ;;  %v5410_v56 = vpop.eup %5409  ;;  %v1932_v8 = vld [vmem:[#allocation4 + $0x328] sm:$0xff] }
 0x77c   :  { %5413 = vrcp.f32 %v1694_v48  ;;  %v5412_v25 = vpop.eup %5411  ;;  %v1707_v43 = vadd.f32 1.0, %v5410_v56  ;;  %v1930_v48 = vld [vmem:[#allocation4 + $0x318] sm:$0xff]  ;;  %v4579_v56 = vpack.c.bf16 %v1923_v29, %v1919_v20  ;;  %v1957_v20 = vld [vmem:[#allocation4 + $0x3f0] sm:$0xff] }
 0x77d   :  { %5415 = vrcp.f32 %v1700_v17  ;;  %v1934_v17 = vld [vmem:[#allocation4 + $0x338] sm:$0xff] }
 0x77e   :  { %5417 = vrcp.f32 %v1707_v43  ;;  %v4613_v43 = vpack.c.bf16 %v1934_v17, %v1930_v48  ;;  %v1969_v48 = vld [vmem:[#allocation6 + $0x248] sm:$0xff] }
 0x77f   :  { %v1973_v17 = vld [vmem:[#allocation6 + $0x268] sm:$0xff] }
 0x786   :  { %v5414_v2 = vpop.eup %5413 }
 0x787   :  { %v5416_v33 = vpop.eup %5415  ;;  %v1711_v11 = vmul.f32 %v5414_v2, %v5412_v25  ;;  %v4611_v25 = vpack.c.bf16 %v1925_v62, %v1921_v61  ;;  %v1927_v2 = vld [vmem:[#allocation4 + $0x300] sm:$0xff] }
 0x788   :  { %v1710_v21 = vmul.f32 %v5416_v33, %v6226_v37  ;;  %v5418_v19 = vpop.eup %5417  ;;  %v4571_v37 = vpack.c.bf16 %v1907_v18, %v1903_v9  ;;  %v1931_v33 = vld [vmem:[#allocation4 + $0x320] sm:$0xff]  ;;  %v1941_v9 = vld [vmem:[#allocation4 + $0x370] sm:$0xff]  ;;  %v1944_v18 = vld [vmem:[#allocation4 + $0x388] sm:$0xff] }
 0x789   :  { %v4583_v40 = vpack.c.bf16 %v1931_v33, %v1927_v2  ;;  %v1975_v2 = vld [vmem:[#allocation6 + $0x278] sm:$0xff]  ;;  %v1968_v33 = vld [vmem:[#allocation6 + $0x240] sm:$0xff] }
 0x78a   :  { %v6270_v50 = vadd.f32 %v1711_v11, %v1710_v21  ;;  %v4581_v11 = vpack.c.bf16 %v1932_v8, %v1928_v7  ;;  %v1929_v21 = vld [vmem:[#allocation4 + $0x310] sm:$0xff] }
 0x78b   :  { %v4615_v30 = vpack.c.bf16 %v1933_v58, %v1929_v21  ;;  %v1962_v7 = vld [vmem:[#allocation6 + $0x210] sm:$0xff] }
 0x78c   :  { %5419 = vtanh.f32 %v6270_v50  ;;  %v1966_v8 = vld [vmem:[#allocation6 + $0x230] sm:$0xff] }
 0x78d   :  { %v1970_v58 = vld [vmem:[#allocation6 + $0x250] sm:$0xff] }
 0x796   :  { %v5420_v36 = vpop.eup %5419 }
 0x797   :  { %v6273_v54 = vmul.f32 %v5420_v36, %v5418_v19  ;;  %v1939_v19 = vld [vmem:[#allocation4 + $0x360] sm:$0xff]  ;;  %v4585_v36 = vpack.c.bf16 %v1940_v23, %v1936_v14  ;;  %v1974_v14 = vld [vmem:[#allocation6 + $0x270] sm:$0xff] }
 0x798   :  { %v4587_v10 = vpack.c.bf16 %v1939_v19, %v1935_v46  ;;  %v6326_v23 = vpack.c.bf16 %v1974_v14, %v1970_v58  ;;  %v1983_v46 = vld [vmem:[#allocation6 + $0x2b8] sm:$0xff]  ;;  %v1976_v19 = vld [vmem:[#allocation6 + $0x280] sm:$0xff] }
 0x799   :  { %1787 = vmatmul.mubr.f32.vlgmr.msra.gmra.mrb[14].mxu0 %v6273_v54  ;;  %1858 = vmatmul.mubr.f32.vlgmr.msra.gmra.mrb[30].mxu1 %v6273_v54 }
 0x79a   :  { %4568 = vmatpush1.bf16.msra.mxu0 %v4567_v28  ;;  %4600 = vmatpush1.bf16.msra.mxu1 %v4599_v49  ;;  %v4617_v28 = vpack.c.bf16 %v1942_v60, %v1938_v31  ;;  %v1937_v49 = vld [vmem:[#allocation4 + $0x350] sm:$0xff]  ;;  %v1977_v31 = vld [vmem:[#allocation6 + $0x288] sm:$0xff] }
 0x79b   :  { %4570 = vmatprep.subr.bf16.mxu0 %v4569_v55  ;;  %4602 = vmatprep.subr.bf16.mxu1 %v4601_v4  ;;  %v1948_v55 = vld [vmem:[#allocation4 + $0x3a8] sm:$0xff]  ;;  %v1946_v4 = vld [vmem:[#allocation4 + $0x398] sm:$0xff]  ;;  %v4619_v45 = vpack.c.bf16 %v1941_v9, %v1937_v49  ;;  %v1978_v9 = vld [vmem:[#allocation6 + $0x290] sm:$0xff] }
 0x79c   :  { %2119 = vmatprep.mubr.f32.mxu0 %v6804_v0  ;;  %2232 = vmatprep.mubr.f32.mxu1 %v6804_v0  ;;  %v4589_v53 = vpack.c.bf16 %v1948_v55, %v1944_v18  ;;  %v1981_v60 = vld [vmem:[#allocation6 + $0x2a8] sm:$0xff]  ;;  %v1982_v18 = vld [vmem:[#allocation6 + $0x2b0] sm:$0xff] }
 0x79d   :  { %v6338_v55 = vpack.c.bf16 %v1982_v18, %v1978_v9 }
 0x79e   :  { %4572 = vmatpush1.bf16.msra.mxu0 %v4571_v37  ;;  %4604 = vmatpush1.bf16.msra.mxu1 %v4603_v27  ;;  %v4621_v37 = vpack.c.bf16 %v1950_v51, %v1946_v4  ;;  %v1945_v27 = vld [vmem:[#allocation4 + $0x390] sm:$0xff]  ;;  %v1985_v4 = vld [vmem:[#allocation6 + $0x2c8] sm:$0xff] }
 0x79f   :  { %4574 = vmatprep.subr.bf16.mxu0 %v4573_v22  ;;  %4606 = vmatprep.subr.bf16.mxu1 %v4605_v26  ;;  %v1956_v22 = vld [vmem:[#allocation4 + $0x3e8] sm:$0xff]  ;;  %v1954_v26 = vld [vmem:[#allocation4 + $0x3d8] sm:$0xff]  ;;  %v4623_v44 = vpack.c.bf16 %v1949_v38, %v1945_v27  ;;  %v1986_v38 = vld [vmem:[#allocation6 + $0x2d0] sm:$0xff] }
 0x7a0   :  { %v4593_v57 = vpack.c.bf16 %v1956_v22, %v1952_v13  ;;  %v4625_v1 = vpack.c.bf16 %v1958_v35, %v1954_v26  ;;  %v1989_v51 = vld [vmem:[#allocation6 + $0x2e8] sm:$0xff]  ;;  %v1990_v13 = vld [vmem:[#allocation6 + $0x2f0] sm:$0xff] }
 0x7a1   :  { %v1993_v22 = vld [vmem:[#allocation6 + $0x308] sm:$0xff]  ;;  %v6350_v26 = vpack.c.bf16 %v1990_v13, %v1986_v38  ;;  %v2020_v38 = vld [vmem:[#allocation6 + $0x3e0] sm:$0xff] }
 0x7a2   :  { %4576 = vmatpush1.bf16.msra.mxu0 %v4575_v6  ;;  %4608 = vmatpush1.bf16.msra.mxu1 %v4607_v15  ;;  %v1955_v6 = vld [vmem:[#allocation4 + $0x3e0] sm:$0xff]  ;;  %v1953_v15 = vld [vmem:[#allocation4 + $0x3d0] sm:$0xff]  ;;  %v1997_v35 = vld [vmem:[#allocation6 + $0x328] sm:$0xff] }
 0x7a3   :  { %4578 = vmatprep.subr.bf16.mxu0 %v4577_v34  ;;  %4610 = vmatprep.subr.bf16.mxu1 %v4609_v41  ;;  %v4595_v29 = vpack.c.bf16 %v1955_v6, %v1951_v52  ;;  %v4627_v34 = vpack.c.bf16 %v1957_v20, %v1953_v15  ;;  %v1960_v41 = vld [vmem:[#allocation6 + $0x200] sm:$0xff]  ;;  %v6354_v52 = vpack.c.bf16 %v1997_v35, %v1993_v22  ;;  %v1994_v15 = vld [vmem:[#allocation6 + $0x310] sm:$0xff] }
 0x7a4   :  { %v1996_v6 = vld [vmem:[#allocation6 + $0x320] sm:$0xff]  ;;  %v2018_v35 = vld [vmem:[#allocation6 + $0x3d0] sm:$0xff] }
 0x7a6   :  { %4580 = vmatpush1.bf16.msra.mxu0 %v4579_v56  ;;  %4612 = vmatpush1.bf16.msra.mxu1 %v4611_v25  ;;  %v1971_v56 = vld [vmem:[#allocation6 + $0x258] sm:$0xff]  ;;  %v6319_v25 = vpack.c.bf16 %v1973_v17, %v1969_v48  ;;  %v2002_v48 = vld [vmem:[#allocation6 + $0x350] sm:$0xff] }
 0x7a7   :  { %4582 = vmatprep.subr.bf16.mxu0 %v4581_v11  ;;  %4614 = vmatprep.subr.bf16.mxu1 %v4613_v43  ;;  %v1972_v11 = vld [vmem:[#allocation6 + $0x260] sm:$0xff]  ;;  %v6321_v43 = vpack.c.bf16 %v1975_v2, %v1971_v56  ;;  %v2006_v17 = vld [vmem:[#allocation6 + $0x370] sm:$0xff]  ;;  %v2009_v2 = vld [vmem:[#allocation6 + $0x388] sm:$0xff] }
 0x7a8   :  { %v6323_v21 = vpack.c.bf16 %v1972_v11, %v1968_v33  ;;  %v2013_v33 = vld [vmem:[#allocation6 + $0x3a8] sm:$0xff]  ;;  %v2011_v11 = vld [vmem:[#allocation6 + $0x398] sm:$0xff]  ;;  %v6374_v58 = vpack.c.bf16 %v2006_v17, %v2002_v48 }
 0x7a9   :  { %v6376_v14 = vpack.c.bf16 %v2013_v33, %v2009_v2 }
 0x7aa   :  { %4584 = vmatpush1.bf16.msra.mxu0 %v4583_v40  ;;  %4616 = vmatpush1.bf16.msra.mxu1 %v4615_v30  ;;  %v1979_v40 = vld [vmem:[#allocation6 + $0x298] sm:$0xff]  ;;  %v6331_v30 = vpack.c.bf16 %v1981_v60, %v1977_v31  ;;  %v2008_v60 = vld [vmem:[#allocation6 + $0x380] sm:$0xff] }
 0x7ab   :  { %4586 = vmatprep.subr.bf16.mxu0 %v4585_v36  ;;  %4618 = vmatprep.subr.bf16.mxu1 %v4617_v28  ;;  %v1980_v36 = vld [vmem:[#allocation6 + $0x2a0] sm:$0xff]  ;;  %v6333_v28 = vpack.c.bf16 %v1983_v46, %v1979_v40  ;;  %v2015_v31 = vld [vmem:[#allocation6 + $0x3b8] sm:$0xff] }
 0x7ac   :  { %v6335_v49 = vpack.c.bf16 %v1980_v36, %v1976_v19  ;;  %v2012_v40 = vld [vmem:[#allocation6 + $0x3a0] sm:$0xff]  ;;  %v6379_v46 = vpack.c.bf16 %v2015_v31, %v2011_v11  ;;  %v2010_v19 = vld [vmem:[#allocation6 + $0x390] sm:$0xff] }
 0x7ad   :  { %v2014_v36 = vld [vmem:[#allocation6 + $0x3b0] sm:$0xff]  ;;  %v6382_v9 = vpack.c.bf16 %v2012_v40, %v2008_v60 }
 0x7ae   :  { %4588 = vmatpush1.bf16.msra.mxu0 %v4587_v10  ;;  %4620 = vmatpush1.bf16.msra.mxu1 %v4619_v45  ;;  %v1987_v10 = vld [vmem:[#allocation6 + $0x2d8] sm:$0xff]  ;;  %v6343_v45 = vpack.c.bf16 %v1989_v51, %v1985_v4  ;;  %v6386_v18 = vpack.c.bf16 %v2014_v36, %v2010_v19  ;;  %v2017_v4 = vld [vmem:[#allocation6 + $0x3c8] sm:$0xff] }
 0x7af   :  { %4590 = vmatprep.subr.bf16.mxu0 %v4589_v53  ;;  %4622 = vmatprep.subr.bf16.mxu1 %v4621_v37  ;;  %v1988_v53 = vld [vmem:[#allocation6 + $0x2e0] sm:$0xff]  ;;  %v6345_v37 = vpack.c.bf16 %v1991_v59, %v1987_v10  ;;  %v2021_v51 = vld [vmem:[#allocation6 + $0x3e8] sm:$0xff]  ;;  %v2019_v10 = vld [vmem:[#allocation6 + $0x3d8] sm:$0xff] }
 0x7b0   :  { %v6347_v27 = vpack.c.bf16 %v1988_v53, %v1984_v32  ;;  %v6391_v59 = vpack.c.bf16 %v2021_v51, %v2017_v4  ;;  %v2023_v32 = vld [vmem:[#allocation6 + $0x3f8] sm:$0xff]  ;;  %v2016_v53 = vld [vmem:[#allocation6 + $0x3c0] sm:$0xff] }
 0x7b1   :  { %v6393_v13 = vpack.c.bf16 %v2023_v32, %v2019_v10  ;;  %v6395_v22 = vpack.c.bf16 %v2020_v38, %v2016_v53 }
 0x7b2   :  { %4592 = vmatpush1.bf16.msra.mxu0 %v4591_v39  ;;  %4624 = vmatpush1.bf16.msra.mxu1 %v4623_v44  ;;  %v1995_v39 = vld [vmem:[#allocation6 + $0x318] sm:$0xff] }
 0x7b3   :  { %4594 = vmatprep.subr.bf16.mxu0 %v4593_v57  ;;  %4626 = vmatprep.subr.bf16.mxu1 %v4625_v1  ;;  %v1999_v44 = vld [vmem:[#allocation6 + $0x338] sm:$0xff]  ;;  %v1992_v1 = vld [vmem:[#allocation6 + $0x300] sm:$0xff] }
 0x7b4   :  { %v6356_v57 = vpack.c.bf16 %v1999_v44, %v1995_v39  ;;  %v6359_v20 = vpack.c.bf16 %v1996_v6, %v1992_v1  ;;  %v2022_v39 = vld [vmem:[#allocation6 + $0x3f0] sm:$0xff] }
 0x7b5   :  { %v6398_v44 = vpack.c.bf16 %v2022_v39, %v2018_v35  ;;  %v6807_v35 = vld [vmem:[#allocation11_spill] sm:$0xff] }
 0x7b6   :  { %4596 = vmatpush1.bf16.msra.mxu0 %v4595_v29  ;;  %4628 = vmatpush1.bf16.msra.mxu1 %v4627_v34  ;;  %v1998_v29 = vld [vmem:[#allocation6 + $0x330] sm:$0xff]  ;;  %v2001_v34 = vld [vmem:[#allocation6 + $0x348] sm:$0xff]  ;;  %v6808_v39 = vsub.s32 0, %v6807_v35 }
 0x7b9   :  { %2120 = vmatmul.mubr.f32.vlgmr.msra.gmra.mrb[16].mxu0 %v5999_v63  ;;  %2233 = vmatmul.mubr.f32.vlgmr.msra.gmra.mrb[32].mxu1 %v5999_v63  ;;  %v1961_v63 = vld [vmem:[#allocation6 + $0x208] sm:$0xff] }
 0x7ba   :  { %2125 = vmatprep.mubr.f32.mxu0 %v6804_v0  ;;  %2238 = vmatprep.mubr.f32.mxu1 %v6804_v0 }
 0x7bd   :  { %2126 = vmatmul.mubr.f32.gmra.mrb[18].mxu0 %v6045_v12  ;;  %2239 = vmatmul.mubr.f32.gmra.mrb[34].mxu1 %v6045_v12  ;;  %v1965_v12 = vld [vmem:[#allocation6 + $0x228] sm:$0xff] }
 0x7be   :  { %2131 = vmatprep.mubr.f32.mxu0 %v6804_v0  ;;  %2244 = vmatprep.mubr.f32.mxu1 %v6804_v0 }
 0x7c1   :  { %2132 = vmatmul.mubr.f32.gmra.mrb[20].mxu0 %v6091_v24  ;;  %2245 = vmatmul.mubr.f32.gmra.mrb[36].mxu1 %v6091_v24  ;;  %v1963_v24 = vld [vmem:[#allocation6 + $0x218] sm:$0xff] }
 0x7c2   :  { %2137 = vmatprep.mubr.f32.mxu0 %v6804_v0  ;;  %2250 = vmatprep.mubr.f32.mxu1 %v6804_v0 }
 0x7c5   :  { %2138 = vmatmul.mubr.f32.gmra.mrb[22].mxu0 %v6137_v47  ;;  %2251 = vmatmul.mubr.f32.gmra.mrb[38].mxu1 %v6137_v47  ;;  %v6307_v47 = vpack.c.bf16 %v1965_v12, %v1961_v63  ;;  %v2005_v63 = vld [vmem:[#allocation6 + $0x368] sm:$0xff]  ;;  %v6363_v12 = vpack.c.bf16 %v1998_v29, %v1994_v15 }
 0x7c6   :  { %2143 = vmatprep.mubr.f32.mxu0 %v6804_v0  ;;  %2256 = vmatprep.mubr.f32.mxu1 %v6804_v0  ;;  %v6805_v15 = vld [vmem:[#allocation12_spill] sm:$0xff] }
 0x7c7   :  { %4630 = vmatprep.subr.bf16.mxu0 %v6307_v47 }
 0x7c9   :  { %2144 = vmatmul.mubr.f32.gmra.mrb[24].mxu0 %v6183_v42  ;;  %2257 = vmatmul.mubr.f32.gmra.mrb[40].mxu1 %v6183_v42  ;;  %v1967_v42 = vld [vmem:[#allocation6 + $0x238] sm:$0xff] }
 0x7ca   :  { %2149 = vmatprep.mubr.f32.mxu0 %v6804_v0  ;;  %2262 = vmatprep.mubr.f32.mxu1 %v6804_v0  ;;  %v6309_v61 = vpack.c.bf16 %v1967_v42, %v1963_v24  ;;  %v6365_v24 = vpack.c.bf16 %v2005_v63, %v2001_v34  ;;  %v2003_v42 = vld [vmem:[#allocation6 + $0x358] sm:$0xff] }
 0x7cc   :  { %4662 = vmatprep.subr.bf16.mxu1 %v6309_v61 }
 0x7cd   :  { %2150 = vmatmul.mubr.f32.gmra.mrb[26].mxu0 %v6229_v5  ;;  %2263 = vmatmul.mubr.f32.gmra.mrb[42].mxu1 %v6229_v5  ;;  %v1964_v5 = vld [vmem:[#allocation6 + $0x220] sm:$0xff] }
 0x7ce   :  { %2155 = vmatprep.mubr.f32.mxu0 %v6804_v0  ;;  %2268 = vmatprep.mubr.f32.mxu1 %v6804_v0  ;;  %v6311_v62 = vpack.c.bf16 %v1964_v5, %v1960_v41  ;;  %v2007_v41 = vld [vmem:[#allocation6 + $0x378] sm:$0xff]  ;;  %v2000_v5 = vld [vmem:[#allocation6 + $0x340] sm:$0xff] }
 0x7d0   :  { %4632 = vmatpush1.bf16.msra.mxu0 %v6311_v62 }
 0x7d1   :  { %2156 = vmatmul.mubr.f32.gmra.mrb[28].mxu0 %v6273_v54  ;;  %2269 = vmatmul.mubr.f32.gmra.mrb[44].mxu1 %v6273_v54  ;;  %v6314_v54 = vpack.c.bf16 %v1966_v8, %v1962_v7  ;;  %v6367_v7 = vpack.c.bf16 %v2007_v41, %v2003_v42  ;;  %v2004_v8 = vld [vmem:[#allocation6 + $0x360] sm:$0xff]  ;;  %v6806_v42 = vld [vmem:[#allocation13_spill] sm:$0xff] }
 0x7d2   :  { %2161 = vmatprep.mubr.f32.mxu0 %v6804_v0  ;;  %2274 = vmatprep.mubr.f32.mxu1 %v6804_v0  ;;  %v6370_v56 = vpack.c.bf16 %v2004_v8, %v2000_v5 }
 0x7d3   :  { %4664 = vmatpush1.bf16.msra.mxu1 %v6314_v54  ;;  %4634 = vmatprep.subr.bf16.mxu0 %v6319_v25 }
 0x7d4   :  { %4666 = vmatprep.subr.bf16.mxu1 %v6321_v43  ;;  %4636 = vmatpush1.bf16.msra.mxu0 %v6323_v21 }
 0x7d5   :  { %4638 = vmatprep.subr.bf16.mxu0 %v6331_v30 }
 0x7d7   :  { %4668 = vmatpush1.bf16.msra.mxu1 %v6326_v23 }
 0x7d8   :  { %4670 = vmatprep.subr.bf16.mxu1 %v6333_v28  ;;  %4640 = vmatpush1.bf16.msra.mxu0 %v6335_v49 }
 0x7d9   :  { %4642 = vmatprep.subr.bf16.mxu0 %v6343_v45 }
 0x7db   :  { %4672 = vmatpush1.bf16.msra.mxu1 %v6338_v55 }
 0x7dc   :  { %4674 = vmatprep.subr.bf16.mxu1 %v6345_v37  ;;  %4644 = vmatpush1.bf16.msra.mxu0 %v6347_v27 }
 0x7dd   :  { %4646 = vmatprep.subr.bf16.mxu0 %v6354_v52 }
 0x7df   :  { %4676 = vmatpush1.bf16.msra.mxu1 %v6350_v26 }
 0x7e0   :  { %4678 = vmatprep.subr.bf16.mxu1 %v6356_v57  ;;  %4648 = vmatpush1.bf16.msra.mxu0 %v6359_v20 }
 0x7e1   :  { %4650 = vmatprep.subr.bf16.mxu0 %v6365_v24 }
 0x7e3   :  { %4680 = vmatpush1.bf16.msra.mxu1 %v6363_v12 }
 0x7e4   :  { %4682 = vmatprep.subr.bf16.mxu1 %v6367_v7  ;;  %4652 = vmatpush1.bf16.msra.mxu0 %v6370_v56 }
 0x7e5   :  { %4654 = vmatprep.subr.bf16.mxu0 %v6376_v14 }
 0x7e7   :  { %4684 = vmatpush1.bf16.msra.mxu1 %v6374_v58 }
 0x7e8   :  { %4686 = vmatprep.subr.bf16.mxu1 %v6379_v46  ;;  %4656 = vmatpush1.bf16.msra.mxu0 %v6382_v9 }
 0x7e9   :  { %4658 = vmatprep.subr.bf16.mxu0 %v6391_v59 }
 0x7eb   :  { %4688 = vmatpush1.bf16.msra.mxu1 %v6386_v18 }
 0x7ec   :  { %4690 = vmatprep.subr.bf16.mxu1 %v6393_v13  ;;  %4660 = vmatpush1.bf16.msra.mxu0 %v6395_v22 }
 0x7ed   :  { %4694 = vmatprep.subr.bf16.mxu0 %v6307_v47 }
 0x7ef   :  { %4692 = vmatpush1.bf16.msra.mxu1 %v6398_v44 }
 0x7f0   :  { %4726 = vmatprep.subr.bf16.mxu1 %v6309_v61 }
 0x86c   :  { %v1788_v1 = vpop.f32.mrb[14].mxu0  ;;  %v1859_v6 = vpop.f32.mrb[30].mxu1 }
 0x86d   :  { %v1864_v29 = vadd.f32 %v1788_v1, %v6805_v15  ;;  %v1790_v34 = vpop.f32.mrb[15].mxu0  ;;  %v1861_v63 = vpop.f32.mrb[31].mxu1  ;;  %v5219_v2 = vadd.f32 %v1859_v6, %v5988_v16  ;;  %v6809_v6 = vsub.s32 1, %v6807_v35 }
 0x86e   :  { %v1865_v41 = vadd.f32 %v1790_v34, %v6806_v42  ;;  %v5220_v48 = vadd.f32 %v1861_v63, %v5992_v3 }
 0x86f   :  { %v3892_v5 = vmul.f32 -1.442695, %v1864_v29 }
 0x870   :  { %v3893_v8 = vmul.f32 -1.442695, %v1865_v41  ;;  %v3894_v17 = vmul.f32 -1.442695, %v5220_v48 }
 0x871   :  { %5421 = vpow2.f32 %v3892_v5 }
 0x872   :  { %5423 = vpow2.f32 %v3893_v8 }
 0x873   :  { %5425 = vpow2.f32 %v3894_v17  ;;  %v6810_v17 = vsub.s32 3, %v6807_v35 }
 0x874   :  { %5427 = vtanh.f32 %v5219_v2 }
 0x87b   :  { %v5422_v33 = vpop.eup %5421 }
 0x87c   :  { %v5424_v11 = vpop.eup %5423  ;;  %v1871_v31 = vadd.f32 1.0, %v5422_v33 }
 0x87d   :  { %v1877_v60 = vadd.f32 1.0, %v5424_v11  ;;  %v5426_v40 = vpop.eup %5425  ;;  %v6811_v11 = vsub.s32 2, %v6807_v35 }
 0x87e   :  { %5429 = vrcp.f32 %v1871_v31  ;;  %v5428_v19 = vpop.eup %5427  ;;  %v1884_v10 = vadd.f32 1.0, %v5426_v40 }
 0x87f   :  { %5431 = vrcp.f32 %v1877_v60 }
 0x880   :  { %5433 = vrcp.f32 %v1884_v10 }
 0x888   :  { %v5430_v36 = vpop.eup %5429 }
 0x889   :  { %v5432_v4 = vpop.eup %5431  ;;  %v1888_v51 = vmul.f32 %v5430_v36, %v5428_v19 }
 0x88a   :  { %v1887_v32 = vmul.f32 %v5432_v4, %v6270_v50  ;;  %v5434_v16 = vpop.eup %5433  ;;  %v3895_v50 = vld [vmem:[%s6789_s3 + $0x4] sm:$0xf] }
 0x88b   :  { %v6453_v1 = vrot.slane %v3895_v50, %v6808_v39  ;;  %v6457_v15 = vrot.slane %v3895_v50, %v6809_v6  ;;  %v6463_v2 = vrot.slane %v3895_v50, %v6810_v17  ;;  %v6468_v31 = vrot.slane %v3895_v50, %v6811_v11 }
 0x88c   :  { %v1889_v3 = vadd.f32 %v1888_v51, %v1887_v32 }
 0x88e   :  { %5435 = vtanh.f32 %v1889_v3 }
 0x898   :  { %v5436_v53 = vpop.eup %5435 }
 0x899   :  { %v1891_v38 = vmul.f32 %v5436_v53, %v5434_v16 }
 0x89b   :  { %2162 = vmatmul.mubr.f32.gmra.mrb[30].mxu0 %v1891_v38  ;;  %2275 = vmatmul.mubr.f32.gmra.mrb[46].mxu1 %v1891_v38 }
 0x89c   :  { %2381 = vmatprep.mubr.f32.mxu0 %v6804_v0  ;;  %2452 = vmatprep.mubr.f32.mxu1 %v6804_v0 }
 0x89f   :  { %2382 = vmatmul.mubr.f32.vlgmr.msra.gmra.mrb[16].mxu0 %v6804_v0  ;;  %2453 = vmatmul.mubr.f32.vlgmr.msra.gmra.mrb[32].mxu1 %v6804_v0 }
 0x8a0   :  { %4696 = vmatpush1.bf16.msra.mxu0 %v6311_v62  ;;  %4728 = vmatpush1.bf16.msra.mxu1 %v6314_v54 }
 0x8a1   :  { %4698 = vmatprep.subr.bf16.mxu0 %v6319_v25  ;;  %4730 = vmatprep.subr.bf16.mxu1 %v6321_v43 }
 0x8a2   :  { %2556 = vmatprep.mubr.f32.mxu0 %v6804_v0  ;;  %2627 = vmatprep.mubr.f32.mxu1 %v6804_v0 }
 0x8a4   :  { %4700 = vmatpush1.bf16.msra.mxu0 %v6323_v21  ;;  %4732 = vmatpush1.bf16.msra.mxu1 %v6326_v23 }
 0x8a5   :  { %4702 = vmatprep.subr.bf16.mxu0 %v6331_v30  ;;  %4734 = vmatprep.subr.bf16.mxu1 %v6333_v28 }
 0x8a8   :  { %4704 = vmatpush1.bf16.msra.mxu0 %v6335_v49  ;;  %4736 = vmatpush1.bf16.msra.mxu1 %v6338_v55 }
 0x8a9   :  { %4706 = vmatprep.subr.bf16.mxu0 %v6343_v45  ;;  %4738 = vmatprep.subr.bf16.mxu1 %v6345_v37 }
 0x8ac   :  { %4708 = vmatpush1.bf16.msra.mxu0 %v6347_v27  ;;  %4740 = vmatpush1.bf16.msra.mxu1 %v6350_v26 }
 0x8ad   :  { %4710 = vmatprep.subr.bf16.mxu0 %v6354_v52  ;;  %4742 = vmatprep.subr.bf16.mxu1 %v6356_v57 }
 0x8b0   :  { %4712 = vmatpush1.bf16.msra.mxu0 %v6359_v20  ;;  %4744 = vmatpush1.bf16.msra.mxu1 %v6363_v12 }
 0x8b1   :  { %4714 = vmatprep.subr.bf16.mxu0 %v6365_v24  ;;  %4746 = vmatprep.subr.bf16.mxu1 %v6367_v7 }
 0x8b4   :  { %4716 = vmatpush1.bf16.msra.mxu0 %v6370_v56  ;;  %4748 = vmatpush1.bf16.msra.mxu1 %v6374_v58 }
 0x8b5   :  { %4718 = vmatprep.subr.bf16.mxu0 %v6376_v14  ;;  %4750 = vmatprep.subr.bf16.mxu1 %v6379_v46 }
 0x8b8   :  { %4720 = vmatpush1.bf16.msra.mxu0 %v6382_v9  ;;  %4752 = vmatpush1.bf16.msra.mxu1 %v6386_v18 }
 0x8b9   :  { %4722 = vmatprep.subr.bf16.mxu0 %v6391_v59  ;;  %4754 = vmatprep.subr.bf16.mxu1 %v6393_v13 }
 0x8bc   :  { %4724 = vmatpush1.bf16.msra.mxu0 %v6395_v22  ;;  %4756 = vmatpush1.bf16.msra.mxu1 %v6398_v44 }
 0x8bd   :  { %4758 = vmatprep.subr.bf16.mxu0 %v6307_v47  ;;  %4790 = vmatprep.subr.bf16.mxu1 %v6309_v61 }
 0x972   :  { %v2383_v29 = vpop.f32.mrb[16].mxu0  ;;  %v2454_v34 = vpop.f32.mrb[32].mxu1 }
 0x973   :  { %v5221_v63 = vadd.f32 %v2383_v29, %v6453_v1  ;;  %v2385_v42 = vpop.f32.mrb[17].mxu0  ;;  %v2456_v41 = vpop.f32.mrb[33].mxu1  ;;  %v5237_v40 = vadd.f32 %v2454_v34, %v6468_v31 }
 0x974   :  { %v5222_v5 = vadd.f32 %v2385_v42, %v6457_v15  ;;  %v5238_v33 = vadd.f32 %v2456_v41, %v6463_v2 }
 0x975   :  { %v3896_v8 = vmul.f32 -1.442695, %v5221_v63 }
 0x976   :  { %v3897_v48 = vmul.f32 -1.442695, %v5222_v5  ;;  %v3898_v60 = vmul.f32 -1.442695, %v5238_v33 }
 0x977   :  { %5437 = vpow2.f32 %v3896_v8 }
 0x978   :  { %5439 = vpow2.f32 %v3897_v48 }
 0x979   :  { %5441 = vpow2.f32 %v3898_v60 }
 0x97a   :  { %5443 = vtanh.f32 %v5237_v40 }
 0x981   :  { %v5438_v19 = vpop.eup %5437 }
 0x982   :  { %v5440_v36 = vpop.eup %5439  ;;  %v2466_v4 = vadd.f32 1.0, %v5438_v19 }
 0x983   :  { %v2472_v51 = vadd.f32 1.0, %v5440_v36  ;;  %v5442_v10 = vpop.eup %5441 }
 0x984   :  { %5445 = vrcp.f32 %v2466_v4  ;;  %v5444_v32 = vpop.eup %5443  ;;  %v2479_v38 = vadd.f32 1.0, %v5442_v10 }
 0x985   :  { %5447 = vrcp.f32 %v2472_v51 }
 0x986   :  { %5449 = vrcp.f32 %v2479_v38 }
 0x98e   :  { %v5446_v3 = vpop.eup %5445 }
 0x98f   :  { %v5448_v16 = vpop.eup %5447  ;;  %v2483_v53 = vmul.f32 %v5446_v3, %v5444_v32 }
 0x990   :  { %v2482_v35 = vmul.f32 0.0, %v5448_v16  ;;  %v5450_v39 = vpop.eup %5449 }
 0x992   :  { %v6471_v50 = vadd.f32 %v2483_v53, %v2482_v35 }
 0x994   :  { %5451 = vtanh.f32 %v6471_v50 }
 0x99e   :  { %v5452_v6 = vpop.eup %5451 }
 0x99f   :  { %v6474_v29 = vmul.f32 %v5452_v6, %v5450_v39 }
 0x9a1   :  { %2557 = vmatmul.mubr.f32.vlgmr.msra.gmra.mrb[18].mxu0 %v6474_v29  ;;  %2628 = vmatmul.mubr.f32.vlgmr.msra.gmra.mrb[34].mxu1 %v6474_v29 }
 0x9a2   :  { %4760 = vmatpush1.bf16.msra.mxu0 %v6311_v62  ;;  %4792 = vmatpush1.bf16.msra.mxu1 %v6314_v54 }
 0x9a3   :  { %4762 = vmatprep.subr.bf16.mxu0 %v6319_v25  ;;  %4794 = vmatprep.subr.bf16.mxu1 %v6321_v43 }
 0x9a4   :  { %2731 = vmatprep.mubr.f32.mxu0 %v6804_v0  ;;  %2802 = vmatprep.mubr.f32.mxu1 %v6804_v0 }
 0x9a6   :  { %4764 = vmatpush1.bf16.msra.mxu0 %v6323_v21  ;;  %4796 = vmatpush1.bf16.msra.mxu1 %v6326_v23 }
 0x9a7   :  { %4766 = vmatprep.subr.bf16.mxu0 %v6331_v30  ;;  %4798 = vmatprep.subr.bf16.mxu1 %v6333_v28 }
 0x9aa   :  { %4768 = vmatpush1.bf16.msra.mxu0 %v6335_v49  ;;  %4800 = vmatpush1.bf16.msra.mxu1 %v6338_v55 }
 0x9ab   :  { %4770 = vmatprep.subr.bf16.mxu0 %v6343_v45  ;;  %4802 = vmatprep.subr.bf16.mxu1 %v6345_v37 }
 0x9ae   :  { %4772 = vmatpush1.bf16.msra.mxu0 %v6347_v27  ;;  %4804 = vmatpush1.bf16.msra.mxu1 %v6350_v26 }
 0x9af   :  { %4774 = vmatprep.subr.bf16.mxu0 %v6354_v52  ;;  %4806 = vmatprep.subr.bf16.mxu1 %v6356_v57 }
 0x9b2   :  { %4776 = vmatpush1.bf16.msra.mxu0 %v6359_v20  ;;  %4808 = vmatpush1.bf16.msra.mxu1 %v6363_v12 }
 0x9b3   :  { %4778 = vmatprep.subr.bf16.mxu0 %v6365_v24  ;;  %4810 = vmatprep.subr.bf16.mxu1 %v6367_v7 }
 0x9b6   :  { %4780 = vmatpush1.bf16.msra.mxu0 %v6370_v56  ;;  %4812 = vmatpush1.bf16.msra.mxu1 %v6374_v58 }
 0x9b7   :  { %4782 = vmatprep.subr.bf16.mxu0 %v6376_v14  ;;  %4814 = vmatprep.subr.bf16.mxu1 %v6379_v46 }
 0x9ba   :  { %4784 = vmatpush1.bf16.msra.mxu0 %v6382_v9  ;;  %4816 = vmatpush1.bf16.msra.mxu1 %v6386_v18 }
 0x9bb   :  { %4786 = vmatprep.subr.bf16.mxu0 %v6391_v59  ;;  %4818 = vmatprep.subr.bf16.mxu1 %v6393_v13 }
 0x9be   :  { %4788 = vmatpush1.bf16.msra.mxu0 %v6395_v22  ;;  %4820 = vmatpush1.bf16.msra.mxu1 %v6398_v44 }
 0x9bf   :  { %4822 = vmatprep.subr.bf16.mxu0 %v6307_v47  ;;  %4854 = vmatprep.subr.bf16.mxu1 %v6309_v61 }
 0xa74   :  { %v2558_v34 = vpop.f32.mrb[18].mxu0  ;;  %v2629_v63 = vpop.f32.mrb[34].mxu1 }
 0xa75   :  { %v5223_v42 = vadd.f32 %v2558_v34, %v6453_v1  ;;  %v2560_v41 = vpop.f32.mrb[19].mxu0  ;;  %v2631_v5 = vpop.f32.mrb[35].mxu1  ;;  %v5239_v60 = vadd.f32 %v2629_v63, %v6468_v31 }
 0xa76   :  { %v5224_v8 = vadd.f32 %v2560_v41, %v6457_v15  ;;  %v5240_v33 = vadd.f32 %v2631_v5, %v6463_v2 }
 0xa77   :  { %v3899_v48 = vmul.f32 -1.442695, %v5223_v42 }
 0xa78   :  { %v3900_v17 = vmul.f32 -1.442695, %v5224_v8  ;;  %v3901_v11 = vmul.f32 -1.442695, %v5240_v33 }
 0xa79   :  { %5453 = vpow2.f32 %v3899_v48 }
 0xa7a   :  { %5455 = vpow2.f32 %v3900_v17 }
 0xa7b   :  { %5457 = vpow2.f32 %v3901_v11 }
 0xa7c   :  { %5459 = vtanh.f32 %v5239_v60 }
 0xa83   :  { %v5454_v40 = vpop.eup %5453 }
 0xa84   :  { %v5456_v19 = vpop.eup %5455  ;;  %v2641_v36 = vadd.f32 1.0, %v5454_v40 }
 0xa85   :  { %v2647_v4 = vadd.f32 1.0, %v5456_v19  ;;  %v5458_v51 = vpop.eup %5457 }
 0xa86   :  { %5461 = vrcp.f32 %v2641_v36  ;;  %v5460_v10 = vpop.eup %5459  ;;  %v2654_v53 = vadd.f32 1.0, %v5458_v51 }
 0xa87   :  { %5463 = vrcp.f32 %v2647_v4 }
 0xa88   :  { %5465 = vrcp.f32 %v2654_v53 }
 0xa90   :  { %v5462_v32 = vpop.eup %5461 }
 0xa91   :  { %v5464_v3 = vpop.eup %5463  ;;  %v2658_v16 = vmul.f32 %v5462_v32, %v5460_v10 }
 0xa92   :  { %v2657_v38 = vmul.f32 %v5464_v3, %v6471_v50  ;;  %v5466_v39 = vpop.eup %5465 }
 0xa94   :  { %v6517_v35 = vadd.f32 %v2658_v16, %v2657_v38 }
 0xa96   :  { %5467 = vtanh.f32 %v6517_v35 }
 0xaa0   :  { %v5468_v6 = vpop.eup %5467 }
 0xaa1   :  { %v6520_v34 = vmul.f32 %v5468_v6, %v5466_v39 }
 0xaa3   :  { %2732 = vmatmul.mubr.f32.vlgmr.msra.gmra.mrb[20].mxu0 %v6520_v34  ;;  %2803 = vmatmul.mubr.f32.vlgmr.msra.gmra.mrb[36].mxu1 %v6520_v34 }
 0xaa4   :  { %4824 = vmatpush1.bf16.msra.mxu0 %v6311_v62  ;;  %4856 = vmatpush1.bf16.msra.mxu1 %v6314_v54 }
 0xaa5   :  { %4826 = vmatprep.subr.bf16.mxu0 %v6319_v25  ;;  %4858 = vmatprep.subr.bf16.mxu1 %v6321_v43 }
 0xaa6   :  { %2906 = vmatprep.mubr.f32.mxu0 %v6804_v0  ;;  %2977 = vmatprep.mubr.f32.mxu1 %v6804_v0 }
 0xaa8   :  { %4828 = vmatpush1.bf16.msra.mxu0 %v6323_v21  ;;  %4860 = vmatpush1.bf16.msra.mxu1 %v6326_v23 }
 0xaa9   :  { %4830 = vmatprep.subr.bf16.mxu0 %v6331_v30  ;;  %4862 = vmatprep.subr.bf16.mxu1 %v6333_v28 }
 0xaac   :  { %4832 = vmatpush1.bf16.msra.mxu0 %v6335_v49  ;;  %4864 = vmatpush1.bf16.msra.mxu1 %v6338_v55 }
 0xaad   :  { %4834 = vmatprep.subr.bf16.mxu0 %v6343_v45  ;;  %4866 = vmatprep.subr.bf16.mxu1 %v6345_v37 }
 0xab0   :  { %4836 = vmatpush1.bf16.msra.mxu0 %v6347_v27  ;;  %4868 = vmatpush1.bf16.msra.mxu1 %v6350_v26 }
 0xab1   :  { %4838 = vmatprep.subr.bf16.mxu0 %v6354_v52  ;;  %4870 = vmatprep.subr.bf16.mxu1 %v6356_v57 }
 0xab4   :  { %4840 = vmatpush1.bf16.msra.mxu0 %v6359_v20  ;;  %4872 = vmatpush1.bf16.msra.mxu1 %v6363_v12 }
 0xab5   :  { %4842 = vmatprep.subr.bf16.mxu0 %v6365_v24  ;;  %4874 = vmatprep.subr.bf16.mxu1 %v6367_v7 }
 0xab8   :  { %4844 = vmatpush1.bf16.msra.mxu0 %v6370_v56  ;;  %4876 = vmatpush1.bf16.msra.mxu1 %v6374_v58 }
 0xab9   :  { %4846 = vmatprep.subr.bf16.mxu0 %v6376_v14  ;;  %4878 = vmatprep.subr.bf16.mxu1 %v6379_v46 }
 0xabc   :  { %4848 = vmatpush1.bf16.msra.mxu0 %v6382_v9  ;;  %4880 = vmatpush1.bf16.msra.mxu1 %v6386_v18 }
 0xabd   :  { %4850 = vmatprep.subr.bf16.mxu0 %v6391_v59  ;;  %4882 = vmatprep.subr.bf16.mxu1 %v6393_v13 }
 0xac0   :  { %4852 = vmatpush1.bf16.msra.mxu0 %v6395_v22  ;;  %4884 = vmatpush1.bf16.msra.mxu1 %v6398_v44 }
 0xac1   :  { %4886 = vmatprep.subr.bf16.mxu0 %v6307_v47  ;;  %4918 = vmatprep.subr.bf16.mxu1 %v6309_v61 }
 0xb76   :  { %v2733_v50 = vpop.f32.mrb[20].mxu0  ;;  %v2804_v63 = vpop.f32.mrb[36].mxu1 }
 0xb77   :  { %v5225_v42 = vadd.f32 %v2733_v50, %v6453_v1  ;;  %v2735_v41 = vpop.f32.mrb[21].mxu0  ;;  %v2806_v5 = vpop.f32.mrb[37].mxu1  ;;  %v5241_v60 = vadd.f32 %v2804_v63, %v6468_v31 }
 0xb78   :  { %v5226_v8 = vadd.f32 %v2735_v41, %v6457_v15  ;;  %v5242_v33 = vadd.f32 %v2806_v5, %v6463_v2 }
 0xb79   :  { %v3902_v48 = vmul.f32 -1.442695, %v5225_v42 }
 0xb7a   :  { %v3903_v17 = vmul.f32 -1.442695, %v5226_v8  ;;  %v3904_v11 = vmul.f32 -1.442695, %v5242_v33 }
 0xb7b   :  { %5469 = vpow2.f32 %v3902_v48 }
 0xb7c   :  { %5471 = vpow2.f32 %v3903_v17 }
 0xb7d   :  { %5473 = vpow2.f32 %v3904_v11 }
 0xb7e   :  { %5475 = vtanh.f32 %v5241_v60 }
 0xb85   :  { %v5470_v40 = vpop.eup %5469 }
 0xb86   :  { %v5472_v19 = vpop.eup %5471  ;;  %v2816_v36 = vadd.f32 1.0, %v5470_v40 }
 0xb87   :  { %v2822_v4 = vadd.f32 1.0, %v5472_v19  ;;  %v5474_v51 = vpop.eup %5473 }
 0xb88   :  { %5477 = vrcp.f32 %v2816_v36  ;;  %v5476_v10 = vpop.eup %5475  ;;  %v2829_v53 = vadd.f32 1.0, %v5474_v51 }
 0xb89   :  { %5479 = vrcp.f32 %v2822_v4 }
 0xb8a   :  { %5481 = vrcp.f32 %v2829_v53 }
 0xb92   :  { %v5478_v32 = vpop.eup %5477 }
 0xb93   :  { %v5480_v3 = vpop.eup %5479  ;;  %v2833_v16 = vmul.f32 %v5478_v32, %v5476_v10 }
 0xb94   :  { %v2832_v38 = vmul.f32 %v5480_v3, %v6517_v35  ;;  %v5482_v6 = vpop.eup %5481 }
 0xb96   :  { %v6563_v39 = vadd.f32 %v2833_v16, %v2832_v38 }
 0xb98   :  { %5483 = vtanh.f32 %v6563_v39 }
 0xba2   :  { %v5484_v50 = vpop.eup %5483 }
 0xba3   :  { %v6566_v63 = vmul.f32 %v5484_v50, %v5482_v6 }
 0xba5   :  { %2907 = vmatmul.mubr.f32.vlgmr.msra.gmra.mrb[22].mxu0 %v6566_v63  ;;  %2978 = vmatmul.mubr.f32.vlgmr.msra.gmra.mrb[38].mxu1 %v6566_v63 }
 0xba6   :  { %4888 = vmatpush1.bf16.msra.mxu0 %v6311_v62  ;;  %4920 = vmatpush1.bf16.msra.mxu1 %v6314_v54 }
 0xba7   :  { %4890 = vmatprep.subr.bf16.mxu0 %v6319_v25  ;;  %4922 = vmatprep.subr.bf16.mxu1 %v6321_v43 }
 0xba8   :  { %3081 = vmatprep.mubr.f32.mxu0 %v6804_v0  ;;  %3152 = vmatprep.mubr.f32.mxu1 %v6804_v0 }
 0xbaa   :  { %4892 = vmatpush1.bf16.msra.mxu0 %v6323_v21  ;;  %4924 = vmatpush1.bf16.msra.mxu1 %v6326_v23 }
 0xbab   :  { %4894 = vmatprep.subr.bf16.mxu0 %v6331_v30  ;;  %4926 = vmatprep.subr.bf16.mxu1 %v6333_v28 }
 0xbae   :  { %4896 = vmatpush1.bf16.msra.mxu0 %v6335_v49  ;;  %4928 = vmatpush1.bf16.msra.mxu1 %v6338_v55 }
 0xbaf   :  { %4898 = vmatprep.subr.bf16.mxu0 %v6343_v45  ;;  %4930 = vmatprep.subr.bf16.mxu1 %v6345_v37 }
 0xbb2   :  { %4900 = vmatpush1.bf16.msra.mxu0 %v6347_v27  ;;  %4932 = vmatpush1.bf16.msra.mxu1 %v6350_v26 }
 0xbb3   :  { %4902 = vmatprep.subr.bf16.mxu0 %v6354_v52  ;;  %4934 = vmatprep.subr.bf16.mxu1 %v6356_v57 }
 0xbb6   :  { %4904 = vmatpush1.bf16.msra.mxu0 %v6359_v20  ;;  %4936 = vmatpush1.bf16.msra.mxu1 %v6363_v12 }
 0xbb7   :  { %4906 = vmatprep.subr.bf16.mxu0 %v6365_v24  ;;  %4938 = vmatprep.subr.bf16.mxu1 %v6367_v7 }
 0xbba   :  { %4908 = vmatpush1.bf16.msra.mxu0 %v6370_v56  ;;  %4940 = vmatpush1.bf16.msra.mxu1 %v6374_v58 }
 0xbbb   :  { %4910 = vmatprep.subr.bf16.mxu0 %v6376_v14  ;;  %4942 = vmatprep.subr.bf16.mxu1 %v6379_v46 }
 0xbbe   :  { %4912 = vmatpush1.bf16.msra.mxu0 %v6382_v9  ;;  %4944 = vmatpush1.bf16.msra.mxu1 %v6386_v18 }
 0xbbf   :  { %4914 = vmatprep.subr.bf16.mxu0 %v6391_v59  ;;  %4946 = vmatprep.subr.bf16.mxu1 %v6393_v13 }
 0xbc2   :  { %4916 = vmatpush1.bf16.msra.mxu0 %v6395_v22  ;;  %4948 = vmatpush1.bf16.msra.mxu1 %v6398_v44 }
 0xbc3   :  { %4950 = vmatprep.subr.bf16.mxu0 %v6307_v47  ;;  %4982 = vmatprep.subr.bf16.mxu1 %v6309_v61 }
 0xc78   :  { %v2908_v35 = vpop.f32.mrb[22].mxu0  ;;  %v2979_v42 = vpop.f32.mrb[38].mxu1 }
 0xc79   :  { %v5227_v41 = vadd.f32 %v2908_v35, %v6453_v1  ;;  %v2910_v5 = vpop.f32.mrb[23].mxu0  ;;  %v2981_v8 = vpop.f32.mrb[39].mxu1  ;;  %v5243_v40 = vadd.f32 %v2979_v42, %v6468_v31 }
 0xc7a   :  { %v5228_v48 = vadd.f32 %v2910_v5, %v6457_v15  ;;  %v5244_v11 = vadd.f32 %v2981_v8, %v6463_v2 }
 0xc7b   :  { %v3905_v17 = vmul.f32 -1.442695, %v5227_v41 }
 0xc7c   :  { %v3906_v33 = vmul.f32 -1.442695, %v5228_v48  ;;  %v3907_v60 = vmul.f32 -1.442695, %v5244_v11 }
 0xc7d   :  { %5485 = vpow2.f32 %v3905_v17 }
 0xc7e   :  { %5487 = vpow2.f32 %v3906_v33 }
 0xc7f   :  { %5489 = vpow2.f32 %v3907_v60 }
 0xc80   :  { %5491 = vtanh.f32 %v5243_v40 }
 0xc87   :  { %v5486_v19 = vpop.eup %5485 }
 0xc88   :  { %v5488_v36 = vpop.eup %5487  ;;  %v2991_v4 = vadd.f32 1.0, %v5486_v19 }
 0xc89   :  { %v2997_v51 = vadd.f32 1.0, %v5488_v36  ;;  %v5490_v10 = vpop.eup %5489 }
 0xc8a   :  { %5493 = vrcp.f32 %v2991_v4  ;;  %v5492_v32 = vpop.eup %5491  ;;  %v3004_v38 = vadd.f32 1.0, %v5490_v10 }
 0xc8b   :  { %5495 = vrcp.f32 %v2997_v51 }
 0xc8c   :  { %5497 = vrcp.f32 %v3004_v38 }
 0xc94   :  { %v5494_v3 = vpop.eup %5493 }
 0xc95   :  { %v5496_v16 = vpop.eup %5495  ;;  %v3008_v53 = vmul.f32 %v5494_v3, %v5492_v32 }
 0xc96   :  { %v3007_v6 = vmul.f32 %v5496_v16, %v6563_v39  ;;  %v5498_v35 = vpop.eup %5497 }
 0xc98   :  { %v6609_v50 = vadd.f32 %v3008_v53, %v3007_v6 }
 0xc9a   :  { %5499 = vtanh.f32 %v6609_v50 }
 0xca4   :  { %v5500_v42 = vpop.eup %5499 }
 0xca5   :  { %v6612_v41 = vmul.f32 %v5500_v42, %v5498_v35 }
 0xca7   :  { %3082 = vmatmul.mubr.f32.vlgmr.msra.gmra.mrb[24].mxu0 %v6612_v41  ;;  %3153 = vmatmul.mubr.f32.vlgmr.msra.gmra.mrb[40].mxu1 %v6612_v41 }
 0xca8   :  { %4952 = vmatpush1.bf16.msra.mxu0 %v6311_v62  ;;  %4984 = vmatpush1.bf16.msra.mxu1 %v6314_v54 }
 0xca9   :  { %4954 = vmatprep.subr.bf16.mxu0 %v6319_v25  ;;  %4986 = vmatprep.subr.bf16.mxu1 %v6321_v43 }
 0xcaa   :  { %3256 = vmatprep.mubr.f32.mxu0 %v6804_v0  ;;  %3327 = vmatprep.mubr.f32.mxu1 %v6804_v0 }
 0xcac   :  { %4956 = vmatpush1.bf16.msra.mxu0 %v6323_v21  ;;  %4988 = vmatpush1.bf16.msra.mxu1 %v6326_v23 }
 0xcad   :  { %4958 = vmatprep.subr.bf16.mxu0 %v6331_v30  ;;  %4990 = vmatprep.subr.bf16.mxu1 %v6333_v28 }
 0xcb0   :  { %4960 = vmatpush1.bf16.msra.mxu0 %v6335_v49  ;;  %4992 = vmatpush1.bf16.msra.mxu1 %v6338_v55 }
 0xcb1   :  { %4962 = vmatprep.subr.bf16.mxu0 %v6343_v45  ;;  %4994 = vmatprep.subr.bf16.mxu1 %v6345_v37 }
 0xcb4   :  { %4964 = vmatpush1.bf16.msra.mxu0 %v6347_v27  ;;  %4996 = vmatpush1.bf16.msra.mxu1 %v6350_v26 }
 0xcb5   :  { %4966 = vmatprep.subr.bf16.mxu0 %v6354_v52  ;;  %4998 = vmatprep.subr.bf16.mxu1 %v6356_v57 }
 0xcb8   :  { %4968 = vmatpush1.bf16.msra.mxu0 %v6359_v20  ;;  %5000 = vmatpush1.bf16.msra.mxu1 %v6363_v12 }
 0xcb9   :  { %4970 = vmatprep.subr.bf16.mxu0 %v6365_v24  ;;  %5002 = vmatprep.subr.bf16.mxu1 %v6367_v7 }
 0xcbc   :  { %4972 = vmatpush1.bf16.msra.mxu0 %v6370_v56  ;;  %5004 = vmatpush1.bf16.msra.mxu1 %v6374_v58 }
 0xcbd   :  { %4974 = vmatprep.subr.bf16.mxu0 %v6376_v14  ;;  %5006 = vmatprep.subr.bf16.mxu1 %v6379_v46 }
 0xcc0   :  { %4976 = vmatpush1.bf16.msra.mxu0 %v6382_v9  ;;  %5008 = vmatpush1.bf16.msra.mxu1 %v6386_v18 }
 0xcc1   :  { %4978 = vmatprep.subr.bf16.mxu0 %v6391_v59  ;;  %5010 = vmatprep.subr.bf16.mxu1 %v6393_v13 }
 0xcc4   :  { %4980 = vmatpush1.bf16.msra.mxu0 %v6395_v22  ;;  %5012 = vmatpush1.bf16.msra.mxu1 %v6398_v44 }
 0xcc5   :  { %5014 = vmatprep.subr.bf16.mxu0 %v6307_v47  ;;  %5046 = vmatprep.subr.bf16.mxu1 %v6309_v61 }
 0xd7a   :  { %v3083_v39 = vpop.f32.mrb[24].mxu0  ;;  %v3154_v5 = vpop.f32.mrb[40].mxu1 }
 0xd7b   :  { %v5229_v8 = vadd.f32 %v3083_v39, %v6453_v1  ;;  %v3085_v48 = vpop.f32.mrb[25].mxu0  ;;  %v3156_v17 = vpop.f32.mrb[41].mxu1  ;;  %v5245_v36 = vadd.f32 %v3154_v5, %v6468_v31 }
 0xd7c   :  { %v5230_v33 = vadd.f32 %v3085_v48, %v6457_v15  ;;  %v5246_v40 = vadd.f32 %v3156_v17, %v6463_v2 }
 0xd7d   :  { %v3908_v11 = vmul.f32 -1.442695, %v5229_v8 }
 0xd7e   :  { %v3909_v60 = vmul.f32 -1.442695, %v5230_v33  ;;  %v3910_v19 = vmul.f32 -1.442695, %v5246_v40 }
 0xd7f   :  { %5501 = vpow2.f32 %v3908_v11 }
 0xd80   :  { %5503 = vpow2.f32 %v3909_v60 }
 0xd81   :  { %5505 = vpow2.f32 %v3910_v19 }
 0xd82   :  { %5507 = vtanh.f32 %v5245_v36 }
 0xd89   :  { %v5502_v4 = vpop.eup %5501 }
 0xd8a   :  { %v5504_v51 = vpop.eup %5503  ;;  %v3166_v10 = vadd.f32 1.0, %v5502_v4 }
 0xd8b   :  { %v3172_v32 = vadd.f32 1.0, %v5504_v51  ;;  %v5506_v3 = vpop.eup %5505 }
 0xd8c   :  { %5509 = vrcp.f32 %v3166_v10  ;;  %v5508_v16 = vpop.eup %5507  ;;  %v3179_v35 = vadd.f32 1.0, %v5506_v3 }
 0xd8d   :  { %5511 = vrcp.f32 %v3172_v32 }
 0xd8e   :  { %5513 = vrcp.f32 %v3179_v35 }
 0xd96   :  { %v5510_v53 = vpop.eup %5509 }
 0xd97   :  { %v5512_v38 = vpop.eup %5511  ;;  %v3183_v6 = vmul.f32 %v5510_v53, %v5508_v16 }
 0xd98   :  { %v3182_v42 = vmul.f32 %v5512_v38, %v6609_v50  ;;  %v5514_v5 = vpop.eup %5513 }
 0xd9a   :  { %v6655_v39 = vadd.f32 %v3183_v6, %v3182_v42 }
 0xd9c   :  { %5515 = vtanh.f32 %v6655_v39 }
 0xda6   :  { %v5516_v8 = vpop.eup %5515 }
 0xda7   :  { %v6658_v48 = vmul.f32 %v5516_v8, %v5514_v5 }
 0xda9   :  { %3257 = vmatmul.mubr.f32.vlgmr.msra.gmra.mrb[26].mxu0 %v6658_v48  ;;  %3328 = vmatmul.mubr.f32.vlgmr.msra.gmra.mrb[42].mxu1 %v6658_v48 }
 0xdaa   :  { %5016 = vmatpush1.bf16.msra.mxu0 %v6311_v62  ;;  %5048 = vmatpush1.bf16.msra.mxu1 %v6314_v54 }
 0xdab   :  { %5018 = vmatprep.subr.bf16.mxu0 %v6319_v25  ;;  %5050 = vmatprep.subr.bf16.mxu1 %v6321_v43 }
 0xdac   :  { %3431 = vmatprep.mubr.f32.mxu0 %v6804_v0  ;;  %3502 = vmatprep.mubr.f32.mxu1 %v6804_v0 }
 0xdae   :  { %5020 = vmatpush1.bf16.msra.mxu0 %v6323_v21  ;;  %5052 = vmatpush1.bf16.msra.mxu1 %v6326_v23 }
 0xdaf   :  { %5022 = vmatprep.subr.bf16.mxu0 %v6331_v30  ;;  %5054 = vmatprep.subr.bf16.mxu1 %v6333_v28 }
 0xdb2   :  { %5024 = vmatpush1.bf16.msra.mxu0 %v6335_v49  ;;  %5056 = vmatpush1.bf16.msra.mxu1 %v6338_v55 }
 0xdb3   :  { %5026 = vmatprep.subr.bf16.mxu0 %v6343_v45  ;;  %5058 = vmatprep.subr.bf16.mxu1 %v6345_v37 }
 0xdb6   :  { %5028 = vmatpush1.bf16.msra.mxu0 %v6347_v27  ;;  %5060 = vmatpush1.bf16.msra.mxu1 %v6350_v26 }
 0xdb7   :  { %5030 = vmatprep.subr.bf16.mxu0 %v6354_v52  ;;  %5062 = vmatprep.subr.bf16.mxu1 %v6356_v57 }
 0xdba   :  { %5032 = vmatpush1.bf16.msra.mxu0 %v6359_v20  ;;  %5064 = vmatpush1.bf16.msra.mxu1 %v6363_v12 }
 0xdbb   :  { %5034 = vmatprep.subr.bf16.mxu0 %v6365_v24  ;;  %5066 = vmatprep.subr.bf16.mxu1 %v6367_v7 }
 0xdbe   :  { %5036 = vmatpush1.bf16.msra.mxu0 %v6370_v56  ;;  %5068 = vmatpush1.bf16.msra.mxu1 %v6374_v58 }
 0xdbf   :  { %5038 = vmatprep.subr.bf16.mxu0 %v6376_v14  ;;  %5070 = vmatprep.subr.bf16.mxu1 %v6379_v46 }
 0xdc2   :  { %5040 = vmatpush1.bf16.msra.mxu0 %v6382_v9  ;;  %5072 = vmatpush1.bf16.msra.mxu1 %v6386_v18 }
 0xdc3   :  { %5042 = vmatprep.subr.bf16.mxu0 %v6391_v59  ;;  %5074 = vmatprep.subr.bf16.mxu1 %v6393_v13 }
 0xdc6   :  { %5044 = vmatpush1.bf16.msra.mxu0 %v6395_v22  ;;  %5076 = vmatpush1.bf16.msra.mxu1 %v6398_v44 }
 0xdc7   :  { %5078 = vmatprep.subr.bf16.mxu0 %v6307_v47  ;;  %5110 = vmatprep.subr.bf16.mxu1 %v6309_v61 }
 0xe7c   :  { %v3258_v50 = vpop.f32.mrb[26].mxu0  ;;  %v3329_v17 = vpop.f32.mrb[42].mxu1 }
 0xe7d   :  { %v5231_v33 = vadd.f32 %v3258_v50, %v6453_v1  ;;  %v3260_v11 = vpop.f32.mrb[27].mxu0  ;;  %v3331_v60 = vpop.f32.mrb[43].mxu1  ;;  %v5247_v10 = vadd.f32 %v3329_v17, %v6468_v31 }
 0xe7e   :  { %v5232_v40 = vadd.f32 %v3260_v11, %v6457_v15  ;;  %v5248_v4 = vadd.f32 %v3331_v60, %v6463_v2  ;;  %v3733_v11 = vld [vmem:[#allocation8 + $0x20] sm:$0xff]  ;;  %v3734_v60 = vld [vmem:[#allocation8 + $0x28] sm:$0xff] }
 0xe7f   :  { %v3911_v19 = vmul.f32 -1.442695, %v5231_v33 }
 0xe80   :  { %v3912_v36 = vmul.f32 -1.442695, %v5232_v40  ;;  %v3913_v51 = vmul.f32 -1.442695, %v5248_v4  ;;  %v3736_v4 = vld [vmem:[#allocation8 + $0x38] sm:$0xff] }
 0xe81   :  { %5517 = vpow2.f32 %v3911_v19  ;;  %v5149_v19 = vpack.c.bf16 %v3734_v60, %v3733_v11 }
 0xe82   :  { %5519 = vpow2.f32 %v3912_v36  ;;  %v3735_v36 = vld [vmem:[#allocation8 + $0x30] sm:$0xff] }
 0xe83   :  { %5521 = vpow2.f32 %v3913_v51  ;;  %v3737_v51 = vld [vmem:[#allocation8 + $0x40] sm:$0xff] }
 0xe84   :  { %5523 = vtanh.f32 %v5247_v10  ;;  %v3738_v10 = vld [vmem:[#allocation8 + $0x48] sm:$0xff] }
 0xe8b   :  { %v5518_v47 = vpop.eup %5517 }
 0xe8c   :  { %v5520_v32 = vpop.eup %5519  ;;  %v3341_v61 = vadd.f32 1.0, %v5518_v47  ;;  %v5157_v47 = vpack.c.bf16 %v3738_v10, %v3737_v51 }
 0xe8d   :  { %v3347_v3 = vadd.f32 1.0, %v5520_v32  ;;  %v5522_v16 = vpop.eup %5521  ;;  %v3739_v32 = vld [vmem:[#allocation8 + $0x50] sm:$0xff] }
 0xe8e   :  { %5525 = vrcp.f32 %v3341_v61  ;;  %v5524_v53 = vpop.eup %5523  ;;  %v3354_v42 = vadd.f32 1.0, %v5522_v16  ;;  %v3740_v61 = vld [vmem:[#allocation8 + $0x58] sm:$0xff]  ;;  %v3741_v16 = vld [vmem:[#allocation8 + $0x60] sm:$0xff] }
 0xe8f   :  { %5527 = vrcp.f32 %v3347_v3  ;;  %v5161_v3 = vpack.c.bf16 %v3740_v61, %v3739_v32 }
 0xe90   :  { %5529 = vrcp.f32 %v3354_v42 }
 0xe98   :  { %v5526_v38 = vpop.eup %5525 }
 0xe99   :  { %v5528_v6 = vpop.eup %5527  ;;  %v3358_v35 = vmul.f32 %v5526_v38, %v5524_v53  ;;  %v3742_v53 = vld [vmem:[#allocation8 + $0x68] sm:$0xff] }
 0xe9a   :  { %v3357_v5 = vmul.f32 %v5528_v6, %v6655_v39  ;;  %v5530_v50 = vpop.eup %5529  ;;  %v5165_v38 = vpack.c.bf16 %v3742_v53, %v3741_v16  ;;  %v3743_v6 = vld [vmem:[#allocation8 + $0x70] sm:$0xff] }
 0xe9c   :  { %v6701_v8 = vadd.f32 %v3358_v35, %v3357_v5  ;;  %v3744_v35 = vld [vmem:[#allocation8 + $0x78] sm:$0xff] }
 0xe9d   :  { %v5169_v42 = vpack.c.bf16 %v3744_v35, %v3743_v6 }
 0xe9e   :  { %5531 = vtanh.f32 %v6701_v8 }
 0xea8   :  { %v5532_v17 = vpop.eup %5531 }
 0xea9   :  { %v6704_v33 = vmul.f32 %v5532_v17, %v5530_v50 }
 0xeab   :  { %3432 = vmatmul.mubr.f32.vlgmr.msra.gmra.mrb[28].mxu0 %v6704_v33  ;;  %3503 = vmatmul.mubr.f32.vlgmr.msra.gmra.mrb[44].mxu1 %v6704_v33 }
 0xeac   :  { %5080 = vmatpush1.bf16.msra.mxu0 %v6311_v62  ;;  %5112 = vmatpush1.bf16.msra.mxu1 %v6314_v54  ;;  %v3730_v62 = vld [vmem:[#allocation8 + $0x8] sm:$0xff] }
 0xead   :  { %5082 = vmatprep.subr.bf16.mxu0 %v6319_v25  ;;  %5114 = vmatprep.subr.bf16.mxu1 %v6321_v43 }
 0xeae   :  { %3606 = vmatprep.mubr.f32.mxu0 %v6804_v0  ;;  %3677 = vmatprep.mubr.f32.mxu1 %v6804_v0  ;;  %v3729_v0 = vld [vmem:[#allocation8] sm:$0xff] }
 0xeaf   :  { %v5141_v54 = vpack.c.bf16 %v3730_v62, %v3729_v0 }
 0xeb0   :  { %5084 = vmatpush1.bf16.msra.mxu0 %v6323_v21  ;;  %5116 = vmatpush1.bf16.msra.mxu1 %v6326_v23 }
 0xeb1   :  { %5086 = vmatprep.subr.bf16.mxu0 %v6331_v30  ;;  %5118 = vmatprep.subr.bf16.mxu1 %v6333_v28 }
 0xeb4   :  { %5088 = vmatpush1.bf16.msra.mxu0 %v6335_v49  ;;  %5120 = vmatpush1.bf16.msra.mxu1 %v6338_v55 }
 0xeb5   :  { %5090 = vmatprep.subr.bf16.mxu0 %v6343_v45  ;;  %5122 = vmatprep.subr.bf16.mxu1 %v6345_v37 }
 0xeb8   :  { %5092 = vmatpush1.bf16.msra.mxu0 %v6347_v27  ;;  %5124 = vmatpush1.bf16.msra.mxu1 %v6350_v26 }
 0xeb9   :  { %5094 = vmatprep.subr.bf16.mxu0 %v6354_v52  ;;  %5126 = vmatprep.subr.bf16.mxu1 %v6356_v57 }
 0xebc   :  { %5096 = vmatpush1.bf16.msra.mxu0 %v6359_v20  ;;  %5128 = vmatpush1.bf16.msra.mxu1 %v6363_v12 }
 0xebd   :  { %5098 = vmatprep.subr.bf16.mxu0 %v6365_v24  ;;  %5130 = vmatprep.subr.bf16.mxu1 %v6367_v7 }
 0xec0   :  { %5100 = vmatpush1.bf16.msra.mxu0 %v6370_v56  ;;  %5132 = vmatpush1.bf16.msra.mxu1 %v6374_v58 }
 0xec1   :  { %5102 = vmatprep.subr.bf16.mxu0 %v6376_v14  ;;  %5134 = vmatprep.subr.bf16.mxu1 %v6379_v46 }
 0xec4   :  { %5104 = vmatpush1.bf16.msra.mxu0 %v6382_v9  ;;  %5136 = vmatpush1.bf16.msra.mxu1 %v6386_v18  ;;  %v3731_v18 = vld [vmem:[#allocation8 + $0x10] sm:$0xff] }
 0xec5   :  { %5106 = vmatprep.subr.bf16.mxu0 %v6391_v59  ;;  %5138 = vmatprep.subr.bf16.mxu1 %v6393_v13  ;;  %v3732_v59 = vld [vmem:[#allocation8 + $0x18] sm:$0xff] }
 0xec6   :  { %v5145_v39 = vpack.c.bf16 %v3732_v59, %v3731_v18 }
 0xec8   :  { %5108 = vmatpush1.bf16.msra.mxu0 %v6395_v22  ;;  %5140 = vmatpush1.bf16.msra.mxu1 %v6398_v44 }
 0xec9   :  { %5142 = vmatprep.subr.bf16.mxu0 %v5141_v54 }
 0xf7e   :  { %v3433_v25 = vpop.f32.mrb[28].mxu0  ;;  %v3504_v43 = vpop.f32.mrb[44].mxu1 }
 0xf7f   :  { %v5233_v21 = vadd.f32 %v3433_v25, %v6453_v1  ;;  %v3435_v23 = vpop.f32.mrb[29].mxu0  ;;  %v3506_v30 = vpop.f32.mrb[45].mxu1  ;;  %v5249_v27 = vadd.f32 %v3504_v43, %v6468_v31 }
 0xf80   :  { %v5234_v28 = vadd.f32 %v3435_v23, %v6457_v15  ;;  %v5250_v45 = vadd.f32 %v3506_v30, %v6463_v2 }
 0xf81   :  { %v3914_v49 = vmul.f32 -1.442695, %v5233_v21 }
 0xf82   :  { %v3915_v55 = vmul.f32 -1.442695, %v5234_v28  ;;  %v3916_v37 = vmul.f32 -1.442695, %v5250_v45 }
 0xf83   :  { %5533 = vpow2.f32 %v3914_v49 }
 0xf84   :  { %5535 = vpow2.f32 %v3915_v55 }
 0xf85   :  { %5537 = vpow2.f32 %v3916_v37 }
 0xf86   :  { %5539 = vtanh.f32 %v5249_v27 }
 0xf8d   :  { %v5534_v26 = vpop.eup %5533 }
 0xf8e   :  { %v5536_v52 = vpop.eup %5535  ;;  %v3516_v57 = vadd.f32 1.0, %v5534_v26 }
 0xf8f   :  { %v3522_v20 = vadd.f32 1.0, %v5536_v52  ;;  %v5538_v12 = vpop.eup %5537 }
 0xf90   :  { %5541 = vrcp.f32 %v3516_v57  ;;  %v5540_v24 = vpop.eup %5539  ;;  %v3529_v14 = vadd.f32 1.0, %v5538_v12 }
 0xf91   :  { %5543 = vrcp.f32 %v3522_v20 }
 0xf92   :  { %5545 = vrcp.f32 %v3529_v14 }
 0xf9a   :  { %v5542_v7 = vpop.eup %5541 }
 0xf9b   :  { %v5544_v56 = vpop.eup %5543  ;;  %v3533_v58 = vmul.f32 %v5542_v7, %v5540_v24 }
 0xf9c   :  { %v3532_v46 = vmul.f32 %v5544_v56, %v6701_v8  ;;  %v5546_v13 = vpop.eup %5545 }
 0xf9e   :  { %v6745_v9 = vadd.f32 %v3533_v58, %v3532_v46 }
 0xfa0   :  { %5547 = vtanh.f32 %v6745_v9 }
 0xfa1   :  { %5549 = vtanh.f32 %v6474_v29  ;;  %v5153_v29 = vpack.c.bf16 %v3736_v4, %v3735_v36 }
 0xfa2   :  { %5551 = vtanh.f32 %v6520_v34 }
 0xfa3   :  { %5553 = vtanh.f32 %v6566_v63 }
 0xfa4   :  { %5555 = vtanh.f32 %v6612_v41 }
 0xfa5   :  { %5557 = vtanh.f32 %v6658_v48 }
 0xfa6   :  { %5559 = vtanh.f32 %v6704_v33 }
 0xfaa   :  { %v5548_v22 = vpop.eup %5547 }
 0xfab   :  { %v3536_v44 = vmul.f32 %v5548_v22, %v5546_v13  ;;  %v5550_v40 = vpop.eup %5549 }
 0xfac   :  { %v5552_v5 = vpop.eup %5551 }
 0xfad   :  { %3607 = vmatmul.mubr.f32.vlgmr.msra.gmra.mrb[30].mxu0 %v3536_v44  ;;  %3678 = vmatmul.mubr.f32.vlgmr.msra.gmra.mrb[46].mxu1 %v3536_v44  ;;  %5561 = vtanh.f32 %v3536_v44  ;;  %v5554_v8 = vpop.eup %5553 }
 0xfae   :  { %5144 = vmatpush3.bf16.msra.mxu0 %v5141_v54  ;;  %3977 = vmatprep.mubr.f32.mxu0 %v5550_v40  ;;  %v5556_v34 = vpop.eup %5555 }
 0xfaf   :  { %5146 = vmatprep.subr.bf16.mxu0 %v5145_v39  ;;  %v5558_v50 = vpop.eup %5557 }
 0xfb0   :  { %v5560_v63 = vpop.eup %5559 }
 0xfb2   :  { %5148 = vmatpush3.bf16.msra.mxu0 %v5145_v39 }
 0xfb3   :  { %5150 = vmatprep.subr.bf16.mxu0 %v5149_v19 }
 0xfb6   :  { %5152 = vmatpush3.bf16.msra.mxu0 %v5149_v19 }
 0xfb7   :  { %5154 = vmatprep.subr.bf16.mxu0 %v5153_v29  ;;  %v5562_v17 = vpop.eup %5561 }
 0xfba   :  { %5156 = vmatpush3.bf16.msra.mxu0 %v5153_v29 }
 0xfbb   :  { %5158 = vmatprep.subr.bf16.mxu0 %v5157_v47 }
 0xfbe   :  { %5160 = vmatpush3.bf16.msra.mxu0 %v5157_v47 }
 0xfbf   :  { %5162 = vmatprep.subr.bf16.mxu0 %v5161_v3 }
 0xfc2   :  { %5164 = vmatpush3.bf16.msra.mxu0 %v5161_v3 }
 0xfc3   :  { %5166 = vmatprep.subr.bf16.mxu0 %v5165_v38 }
 0xfc6   :  { %5168 = vmatpush3.bf16.msra.mxu0 %v5165_v38 }
 0xfc7   :  { %5170 = vmatprep.subr.bf16.mxu0 %v5169_v42 }
 0xfca   :  { %5172 = vmatpush3.bf16.msra.mxu0 %v5169_v42 }
 0xfcd   :  { %3978 = vmatmul.mubr.f32.vlgmr.msra.gmra.mrb[32].mxu0 %v5552_v5 }
 0xfce   :  { %3980 = vmatprep.mubr.f32.mxu0 %v5554_v8 }
 0xfd1   :  { %3981 = vmatmul.mubr.f32.gmra.mrb[34].mxu0 %v5556_v34 }
 0xfd2   :  { %3983 = vmatprep.mubr.f32.mxu0 %v5558_v50 }
 0xfd5   :  { %3984 = vmatmul.mubr.f32.gmra.mrb[36].mxu0 %v5560_v63 }
 0xfd6   :  { %3986 = vmatprep.mubr.f32.mxu0 %v5562_v17 }
0x1080   :  { %v3608_v41 = vpop.f32.mrb[30].mxu0  ;;  %v3679_v0 = vpop.f32.mrb[46].mxu1 }
0x1081   :  { %v5235_v48 = vadd.f32 %v3608_v41, %v6453_v1  ;;  %v3610_v62 = vpop.f32.mrb[31].mxu0  ;;  %v3681_v33 = vpop.f32.mrb[47].mxu1  ;;  %v5251_v30 = vadd.f32 %v3679_v0, %v6468_v31 }
0x1082   :  { %v5236_v54 = vadd.f32 %v3610_v62, %v6457_v15  ;;  %v5252_v21 = vadd.f32 %v3681_v33, %v6463_v2  ;;  %v3920_v2 = vld [vmem:[%s6791_s5] ss:$0 sm:$0xff] }
0x1083   :  { %v3917_v25 = vmul.f32 -1.442695, %v5235_v48 }
0x1084   :  { %v3918_v43 = vmul.f32 -1.442695, %v5236_v54  ;;  %v3919_v23 = vmul.f32 -1.442695, %v5252_v21 }
0x1085   :  { %5563 = vpow2.f32 %v3917_v25 }
0x1086   :  { %5565 = vpow2.f32 %v3918_v43 }
0x1087   :  { %5567 = vpow2.f32 %v3919_v23 }
0x1088   :  { %5569 = vtanh.f32 %v5251_v30 }
0x108f   :  { %v5564_v28 = vpop.eup %5563 }
0x1090   :  { %v5566_v49 = vpop.eup %5565  ;;  %v3691_v55 = vadd.f32 1.0, %v5564_v28 }
0x1091   :  { %v3697_v45 = vadd.f32 1.0, %v5566_v49  ;;  %v5568_v1 = vpop.eup %5567 }
0x1092   :  { %5571 = vrcp.f32 %v3691_v55  ;;  %v5570_v37 = vpop.eup %5569  ;;  %v3704_v52 = vadd.f32 1.0, %v5568_v1 }
0x1093   :  { %5573 = vrcp.f32 %v3697_v45 }
0x1094   :  { %5575 = vrcp.f32 %v3704_v52 }
0x109c   :  { %v5572_v15 = vpop.eup %5571 }
0x109d   :  { %v5574_v27 = vpop.eup %5573  ;;  %v3708_v26 = vmul.f32 %v5572_v15, %v5570_v37 }
0x109e   :  { %v3707_v57 = vmul.f32 %v5574_v27, %v6745_v9  ;;  %v5576_v22 = vpop.eup %5575 }
0x10a0   :  { %v3709_v31 = vadd.f32 %v3708_v26, %v3707_v57  ;;  %v3979_v20 = vpop.f32.mrb[32].mxu0 }
0x10a1   :  { %v3824_v12 = vadd.f32 %v3979_v20, %v3920_v2  ;;  %v3818_v24 = vpop.f32.mrb[33].mxu0 }
0x10a2   :  { %5577 = vtanh.f32 %v3709_v31  ;;  %v3819_v7 = vadd.f32 %v3920_v2, %v3818_v24 }
0x10a3   :  { %3858 = vst [vmem:[%s6792_s6 + $0x8] sm:$0xff] %v3824_v12 }
0x10a4   :  { %3857 = vst [vmem:[%s6792_s6] sm:$0xff] %v3819_v7  ;;  %v3982_v56 = vpop.f32.mrb[34].mxu0 }
0x10a5   :  { %v3834_v58 = vadd.f32 %v3982_v56, %v3920_v2  ;;  %v3828_v14 = vpop.f32.mrb[35].mxu0 }
0x10a6   :  { %v3829_v46 = vadd.f32 %v3920_v2, %v3828_v14 }
0x10a7   :  { %3860 = vst [vmem:[%s6792_s6 + $0x18] sm:$0xff] %v3834_v58 }
0x10a8   :  { %3859 = vst [vmem:[%s6792_s6 + $0x10] sm:$0xff] %v3829_v46  ;;  %v3985_v9 = vpop.f32.mrb[36].mxu0 }
0x10a9   :  { %v3844_v18 = vadd.f32 %v3985_v9, %v3920_v2  ;;  %v3838_v59 = vpop.f32.mrb[37].mxu0 }
0x10aa   :  { %v3839_v13 = vadd.f32 %v3920_v2, %v3838_v59 }
0x10ab   :  { %3862 = vst [vmem:[%s6792_s6 + $0x28] sm:$0xff] %v3844_v18 }
0x10ac   :  { %v5578_v44 = vpop.eup %5577  ;;  %3861 = vst [vmem:[%s6792_s6 + $0x20] sm:$0xff] %v3839_v13 }
0x10ad   :  { %v3711_v39 = vmul.f32 %v5578_v44, %v5576_v22 }
0x10af   :  { %5579 = vtanh.f32 %v3711_v39 }
0x10b9   :  { %v5580_v11 = vpop.eup %5579 }
0x10ba   :  { %3987 = vmatmul.mubr.f32.gmra.mrb[38].mxu0 %v5580_v11 }
0x118d   :  { %v3988_v60 = vpop.f32.mrb[38].mxu0 }
0x118e   :  { %v3854_v40 = vadd.f32 %v3988_v60, %v3920_v2  ;;  %v3848_v19 = vpop.f32.mrb[39].mxu0 }
0x118f   :  { %v3849_v36 = vadd.f32 %v3920_v2, %v3848_v19 }
0x1190   :  { %3864 = vst [vmem:[%s6792_s6 + $0x38] sm:$0xff] %v3854_v40 }
0x1191   :  { %3863 = vst [vmem:[%s6792_s6 + $0x30] sm:$0xff] %v3849_v36 }
0x1192   :  { %3869 = vsyncpa [#allocation5], 1 }
0x1193   :  { %3870 = vsyncpa [#allocation7], 1 }

</bundles_post_ra>
